<compile_context>
chip_gen: v5e
topology: v5e:2x2
jax: 0.10.0
libtpu: 0.0.40
codegen_flags: <defaults>
</compile_context>

<pallas_src>
import jax
import jax.numpy as jnp
from jax import lax
from jax.experimental import pallas as pl
from jax.experimental.pallas import tpu as pltpu


# ----------------------------------------------------------------------------
# Pallas kernel
# ----------------------------------------------------------------------------
def attention_sent_rnn_kernel(
    # inputs
    x_ref, h0_ref,
    wih_ref, bih_ref, whh_ref, bhn_ref,
    wsent_ref, bsent_ref, proj_ref, wfin_ref, bfin_ref,
    eb_ref, et_ref, etT_ref,
    # output (packed lane-dense slab)
    out_ref,
    # scratch
    xp_scr, outs_scr,
):
    TB = x_ref.shape[0]              # T * Bt
    Bt = eb_ref.shape[0]             # batch tile (multiple of 8 sublanes)
    T = et_ref.shape[1]
    H = bhn_ref.shape[1] // 2
    H2, H3 = 2 * H, 3 * H
    C = bfin_ref.shape[1]

    # ---- 1) single fused input projection: both directions, all gates -------
    # wih = [W_ix_fwd(r|z|n) | W_ix_bwd(r|z|n)] (Din, 6H); bih has b_ir+b_hr,
    # b_iz+b_hz, b_in folded in per direction.
    xp_scr[...] = (jnp.dot(x_ref[...], wih_ref[...],
                           preferred_element_type=jnp.float32) + bih_ref[...])

    whh = whh_ref[...]               # (2H, 6H) block-diagonal [fwd|bwd] hidden weight
    bhn_f = bhn_ref[:, :H]           # (1, H)
    bhn_b = bhn_ref[:, H:]

    # ---- 2) interleaved fwd/bwd recurrence: ONE MXU matmul per step ---------
    # Kept as a static Python unroll (T is tiny).  If T grows past ~16, switch
    # to lax.fori_loop(..., unroll=True) to bound live ranges and avoid spills.
    h_f = h0_ref[0]                  # (Bt, H)
    h_b = h0_ref[1]
    h_cat = jnp.concatenate([h_f, h_b], axis=-1)          # (Bt, 2H)
    for i in range(T):
        tf, tb = i, T - 1 - i
        pre_f = xp_scr[tf * Bt:(tf + 1) * Bt, :H3]        # (Bt, 3H)  fwd, time tf
        pre_b = xp_scr[tb * Bt:(tb + 1) * Bt, H3:]        # (Bt, 3H)  bwd, time tb

        gh = jnp.dot(h_cat, whh, preferred_element_type=jnp.float32)  # (Bt, 6H)

        rz_f = jax.nn.sigmoid(pre_f[:, :H2] + gh[:, :H2])             # one sigmoid / dir
        rz_b = jax.nn.sigmoid(pre_b[:, :H2] + gh[:, H3:H3 + H2])
        n_f = jnp.tanh(pre_f[:, H2:] + rz_f[:, :H] * (gh[:, H2:H3] + bhn_f))
        n_b = jnp.tanh(pre_b[:, H2:] + rz_b[:, :H] * (gh[:, H3 + H2:] + bhn_b))
        h_f = (1.0 - rz_f[:, H:]) * n_f + rz_f[:, H:] * h_cat[:, :H]
        h_b = (1.0 - rz_b[:, H:]) * n_b + rz_b[:, H:] * h_cat[:, H:]
        h_cat = jnp.concatenate([h_f, h_b], axis=-1)

        # combined output scratch: no epilogue concat needed
        outs_scr[tf * Bt:(tf + 1) * Bt, :H] = h_f
        outs_scr[tb * Bt:(tb + 1) * Bt, H:] = h_b

    # ---- 3) attention scores: one batched matmul over all (t, b) rows -------
    outs = outs_scr[...]                                              # (TB, 2H)
    sq = jnp.tanh(jnp.dot(outs.astype(wsent_ref.dtype), wsent_ref[...],
                          preferred_element_type=jnp.float32)
                  + bsent_ref[...])                                   # (TB, 2H)
    scores = jnp.sum(sq * proj_ref[...], axis=-1, keepdims=True)      # (TB, 1)

    # lane-dense (Bt, T) scores via precomputed (wrapper-side) selection masks
    scores_bt = jnp.dot(eb_ref[...], scores * et_ref[...],
                        preferred_element_type=jnp.float32)           # (Bt, T)

    # ---- 4) exact softmax over time (lane-direction reduce) -----------------
    m = jnp.max(scores_bt, axis=-1, keepdims=True)
    e = jnp.exp(scores_bt - m)
    attn_bt = e / jnp.sum(e, axis=-1, keepdims=True)                  # (Bt, T)

    # ---- 5) attention-weighted sum as a single matmul -----------------------
    w_big = eb_ref[...] * jnp.dot(attn_bt, etT_ref[...],
                                  preferred_element_type=jnp.float32)  # (Bt, TB)
    sent = jnp.dot(w_big, outs, preferred_element_type=jnp.float32)    # (Bt, 2H)

    # ---- 6) fused final linear + log-softmax --------------------------------
    logits = (jnp.dot(sent.astype(wfin_ref.dtype), wfin_ref[...],
                      preferred_element_type=jnp.float32) + bfin_ref[...])  # (Bt, C)
    lmax = jnp.max(logits, axis=-1, keepdims=True)
    logp = logits - (lmax + jnp.log(jnp.sum(jnp.exp(logits - lmax),
                                            axis=-1, keepdims=True)))

    # ---- 7) pack everything into one lane-dense output slab -----------------
    pad_w = out_ref.shape[1] - (C + T + 2 * H)
    pieces = [logp, attn_bt, h_f, h_b]
    if pad_w > 0:
        pieces.append(jnp.zeros((Bt, pad_w), jnp.float32))
    out_ref[...] = jnp.concatenate(pieces, axis=-1)                   # (Bt, OUT_W)


# ----------------------------------------------------------------------------
# Wrapper
# ----------------------------------------------------------------------------
def attention_sent_rnn(x, h0, p, *, batch_tile=8, use_bf16=False):
    """Forward pass.  Returns (log_probs (B,C), new_state (2,B,H), attn_norm (B,T)).

    use_bf16=True casts x / W_ih / W_sent / W_fin to bf16 (f32 accumulation);
    recommended on v6e/v7x, keep False (f32) on v5e.
    """
    T, B, Din = x.shape
    H = h0.shape[2]
    H2 = 2 * H
    C = p["bfin"].shape[1]

    Bt = batch_tile
    assert Bt % 8 == 0, "batch_tile must be a sublane multiple (8)"
    B_pad = ((B + Bt - 1) // Bt) * Bt
    if B_pad != B:
        x = jnp.pad(x, ((0, 0), (0, B_pad - B), (0, 0)))
        h0 = jnp.pad(h0, ((0, 0), (0, B_pad - B), (0, 0)))
    G = B_pad // Bt                                     # "document" grid axis

    # Per-tile row layout: row (g, t*Bt + b) = x[t, g*Bt + b, :]
    x_g = x.reshape(T, G, Bt, Din).transpose(1, 0, 2, 3).reshape(G * T * Bt, Din)

    mm_dtype = jnp.bfloat16 if use_bf16 else jnp.float32
    x_g = x_g.astype(mm_dtype)
    wih = p["wih6"].astype(mm_dtype)
    wsent = p["wsent"].astype(mm_dtype)
    wfin = p["wfin"].astype(mm_dtype)

    # Static selection masks (shape constants; hoisted out of the kernel).
    j = jnp.arange(T * Bt)
    e_b = (j[None, :] % Bt == jnp.arange(Bt)[:, None]).astype(jnp.float32)   # (Bt, TB)
    e_t = (j[:, None] // Bt == jnp.arange(T)[None, :]).astype(jnp.float32)   # (TB, T)
    e_tT = e_t.T                                                             # (T, TB)

    OUT_W = ((C + T + 2 * H + 127) // 128) * 128        # lane-dense packed output

    grid_spec = pltpu.PrefetchScalarGridSpec(
        num_scalar_prefetch=0,
        grid=(G,),
        in_specs=[
            pl.BlockSpec((T * Bt, Din), lambda g: (g, 0)),        # x tile
            pl.BlockSpec((2, Bt, H), lambda g: (0, g, 0)),        # h0 tile
            pl.BlockSpec((Din, 6 * H), lambda g: (0, 0)),         # wih6
            pl.BlockSpec((1, 6 * H), lambda g: (0, 0)),           # bih6
            pl.BlockSpec((H2, 6 * H), lambda g: (0, 0)),          # whh block-diag
            pl.BlockSpec((1, H2), lambda g: (0, 0)),              # bhn [f|b]
            pl.BlockSpec((H2, H2), lambda g: (0, 0)),             # wsent
            pl.BlockSpec((1, H2), lambda g: (0, 0)),              # bsent
            pl.BlockSpec((1, H2), lambda g: (0, 0)),              # proj
            pl.BlockSpec((H2, C), lambda g: (0, 0)),              # wfin
            pl.BlockSpec((1, C), lambda g: (0, 0)),               # bfin
            pl.BlockSpec((Bt, T * Bt), lambda g: (0, 0)),         # e_b
            pl.BlockSpec((T * Bt, T), lambda g: (0, 0)),          # e_t
            pl.BlockSpec((T, T * Bt), lambda g: (0, 0)),          # e_tT
        ],
        out_specs=pl.BlockSpec((Bt, OUT_W), lambda g: (g, 0)),
        scratch_shapes=[
            pltpu.VMEM((T * Bt, 6 * H), jnp.float32),             # fused input projections
            pltpu.VMEM((T * Bt, 2 * H), jnp.float32),             # combined GRU outputs
        ],
    )
    # VMEM footprint is tiny here; if T or Bt grows, re-budget against v7x's
    # 64 MiB and set pltpu.CompilerParams(vmem_limit_bytes=...) explicitly.
    slab = pl.pallas_call(
        attention_sent_rnn_kernel,
        out_shape=jax.ShapeDtypeStruct((B_pad, OUT_W), jnp.float32),
        grid_spec=grid_spec,
        compiler_params=pltpu.CompilerParams(dimension_semantics=("parallel",)),
    )(
        x_g, h0,
        wih, p["bih6"], p["whh_blk"], p["bhn"],
        wsent, p["bsent"], p["proj"], wfin, p["bfin"],
        e_b, e_t, e_tT,
    )

    # Unpack the lane-dense slab (and drop batch padding).
    s_off = C + T
    logp = slab[:B, :C]
    attn = slab[:B, C:C + T]
    state = jnp.stack([slab[:B, s_off:s_off + H],
                       slab[:B, s_off + H:s_off + 2 * H]], axis=0)
    return logp, state, attn


# ----------------------------------------------------------------------------
# Deterministic parameter initialization (mirrors module shapes, fused layout)
# ----------------------------------------------------------------------------
def init_params(key, word_gru_hidden, sent_gru_hidden, n_classes):
    Hw, H = word_gru_hidden, sent_gru_hidden
    Din, H2, H3 = 2 * Hw, 2 * H, 3 * H
    ks = jax.random.split(key, 9)

    def u(k, shape, a, b):
        return jax.random.uniform(k, shape, jnp.float32, a, b)

    # GRU weights in PyTorch layout: (num_dirs, 3H, in), gate order (r, z, n)
    kk = 1.0 / float(H) ** 0.5
    w_ih = u(ks[0], (2, 3 * H, Din), -kk, kk)
    w_hh = u(ks[1], (2, 3 * H, H), -kk, kk)
    b_ih = u(ks[2], (2, 3 * H), -kk, kk)
    b_hh = u(ks[3], (2, 3 * H), -kk, kk)

    wih = jnp.transpose(w_ih, (0, 2, 1))                 # (2, Din, 3H)
    whh = jnp.transpose(w_hh, (0, 2, 1))                 # (2, H, 3H)
    b_rz = b_ih[:, :H2] + b_hh[:, :H2]                   # r,z biases fold together
    b_in = b_ih[:, H2:]
    b_hn = b_hh[:, H2:]

    # Fused kernel layouts
    wih6 = jnp.concatenate([wih[0], wih[1]], axis=-1)                       # (Din, 6H)
    bih6 = jnp.concatenate([b_rz[0], b_in[0], b_rz[1], b_in[1]])[None, :]   # (1, 6H)
    whh_blk = jnp.zeros((H2, 6 * H), jnp.float32)
    whh_blk = whh_blk.at[:H, :H3].set(whh[0]).at[H:, H3:].set(whh[1])       # block-diag
    bhn = jnp.concatenate([b_hn[0], b_hn[1]])[None, :]                      # (1, 2H)

    # attention parameters (module: uniform(-0.1, 0.1); bias_sent is uninitialized
    # in the PyTorch code, here deterministic)
    w_sent = u(ks[4], (H2, H2), -0.1, 0.1)
    bias_sent = u(ks[5], (H2, 1), -0.1, 0.1)
    w_proj = u(ks[6], (H2, 1), -0.1, 0.1)

    # final_linear (PyTorch default uniform(-1/sqrt(in), 1/sqrt(in)))
    kf = 1.0 / float(H2) ** 0.5
    w_fin = u(ks[7], (n_classes, H2), -kf, kf)
    b_fin = u(ks[8], (n_classes,), -kf, kf)

    return dict(
        wih6=wih6, bih6=bih6, whh_blk=whh_blk, bhn=bhn,
        wsent=w_sent,
        bsent=bias_sent[:, 0][None, :],
        proj=w_proj[:, 0][None, :],
        wfin=w_fin.T,                                    # (2H, C)
        bfin=b_fin[None, :],
    )


# ----------------------------------------------------------------------------
# Pure-JAX reference (for correctness check only)
# ----------------------------------------------------------------------------
def reference_forward(x, h0, p):
    H = h0.shape[2]
    H2, H3 = 2 * H, 3 * H
    wih = (p["wih6"][:, :H3], p["wih6"][:, H3:])
    bih = (p["bih6"][:, :H3], p["bih6"][:, H3:])
    whh = (p["whh_blk"][:H, :H3], p["whh_blk"][H:, H3:])
    bhn = (p["bhn"][:, :H], p["bhn"][:, H:])

    def run_dir(d, reverse):
        xs = x[::-1] if reverse else x

        def step(h, x_t):
            pre = x_t @ wih[d] + bih[d]
            gh = h @ whh[d]
            r = jax.nn.sigmoid(pre[:, :H] + gh[:, :H])
            z = jax.nn.sigmoid(pre[:, H:H2] + gh[:, H:H2])
            n = jnp.tanh(pre[:, H2:] + r * (gh[:, H2:] + bhn[d]))
            h_new = (1.0 - z) * n + z * h
            return h_new, h_new

        h_last, hs = lax.scan(step, h0[d], xs)
        if reverse:
            hs = hs[::-1]
        return hs, h_last

    hs_f, hl_f = run_dir(0, False)
    hs_b, hl_b = run_dir(1, True)
    outs = jnp.concatenate([hs_f, hs_b], axis=-1)                 # (T, B, 2H)
    sq = jnp.tanh(outs @ p["wsent"] + p["bsent"])
    scores = jnp.sum(sq * p["proj"], axis=-1)                     # (T, B)
    attn_norm = jax.nn.softmax(scores.T, axis=1)                  # (B, T)
    sent = jnp.sum(attn_norm.T[:, :, None] * outs, axis=0)        # (B, 2H)
    logits = sent @ p["wfin"] + p["bfin"]
    logp = jax.nn.log_softmax(logits, axis=1)
    state = jnp.stack([hl_f, hl_b], axis=0)
    return logp, state, attn_norm


# ----------------------------------------------------------------------------
if __name__ == "__main__":
    T, B = 8, 4                       # number of sentences, batch size
    word_gru_hidden = 16              # word-level GRU hidden (input is 2*Hw, bidirectional)
    sent_gru_hidden = 32
    n_classes = 5

    key = jax.random.PRNGKey(0)
    kx, kp = jax.random.split(key, 2)
    params = init_params(kp, word_gru_hidden, sent_gru_hidden, n_classes)

    # word_attention_vectors: (T, B, 2*word_gru_hidden); state: init_hidden() -> zeros
    x = jax.random.normal(kx, (T, B, 2 * word_gru_hidden), jnp.float32)
    h0 = jnp.zeros((2, B, sent_gru_hidden), jnp.float32)

    logp_r, state_r, attn_r = reference_forward(x, h0, params)

    # f32 path (default; recommended for v5e).  Exact softmax divide -> tight tol.
    logp, state, attn = attention_sent_rnn(x, h0, params)
    jax.block_until_ready((logp, state, attn))
    assert jnp.allclose(state, state_r, atol=2e-4, rtol=2e-4)
    assert jnp.allclose(attn, attn_r, atol=2e-4, rtol=2e-4)
    assert jnp.allclose(logp, logp_r, atol=2e-4, rtol=2e-4)

    # bf16 MXU-input path (v6e/v7x recommendation); accumulation stays f32.
    logp_b, state_b, attn_b = attention_sent_rnn(x, h0, params, use_bf16=True)
    jax.block_until_ready((logp_b, state_b, attn_b))
    assert jnp.allclose(state_b, state_r, atol=5e-2, rtol=5e-2)
    assert jnp.allclose(attn_b, attn_r, atol=5e-2, rtol=5e-2)
    assert jnp.allclose(logp_b, logp_r, atol=5e-2, rtol=5e-2)

    print("KERNEL_OK")
</pallas_src>

<mosaic_0001>
module attributes {stable_mosaic.version = 11 : i64} {
  func.func @attention_sent_rnn_kernel(%arg0: i32, %arg1: memref<64x32xf32, #tpu.memory_space<vmem>>, %arg2: memref<2x8x32xf32, #tpu.memory_space<vmem>>, %arg3: memref<32x192xf32, #tpu.memory_space<vmem>>, %arg4: memref<1x192xf32, #tpu.memory_space<vmem>>, %arg5: memref<64x192xf32, #tpu.memory_space<vmem>>, %arg6: memref<1x64xf32, #tpu.memory_space<vmem>>, %arg7: memref<64x64xf32, #tpu.memory_space<vmem>>, %arg8: memref<1x64xf32, #tpu.memory_space<vmem>>, %arg9: memref<1x64xf32, #tpu.memory_space<vmem>>, %arg10: memref<64x5xf32, #tpu.memory_space<vmem>>, %arg11: memref<1x5xf32, #tpu.memory_space<vmem>>, %arg12: memref<8x64xf32, #tpu.memory_space<vmem>>, %arg13: memref<64x8xf32, #tpu.memory_space<vmem>>, %arg14: memref<8x64xf32, #tpu.memory_space<vmem>>, %arg15: memref<8x128xf32, #tpu.memory_space<vmem>>, %arg16: memref<64x192xf32, #tpu.memory_space<vmem>>, %arg17: memref<64x64xf32, #tpu.memory_space<vmem>>) attributes {dimension_semantics = [#tpu.dimension_semantics<parallel>], iteration_bounds = array<i64: 1>, scalar_prefetch = 0 : i64, scratch_operands = 2 : i64, tpu.core_type = #tpu.core_type<tc>, window_params = [{transform_indices = @transform_0, window_bounds = array<i64: 64, 32>}, {transform_indices = @transform_1, window_bounds = array<i64: 2, 8, 32>}, {pipeline_mode = #tpu.pipeline_mode<synchronous>, transform_indices = @transform_2, window_bounds = array<i64: 32, 192>}, {pipeline_mode = #tpu.pipeline_mode<synchronous>, transform_indices = @transform_3, window_bounds = array<i64: 1, 192>}, {pipeline_mode = #tpu.pipeline_mode<synchronous>, transform_indices = @transform_4, window_bounds = array<i64: 64, 192>}, {pipeline_mode = #tpu.pipeline_mode<synchronous>, transform_indices = @transform_5, window_bounds = array<i64: 1, 64>}, {pipeline_mode = #tpu.pipeline_mode<synchronous>, transform_indices = @transform_6, window_bounds = array<i64: 64, 64>}, {pipeline_mode = #tpu.pipeline_mode<synchronous>, transform_indices = @transform_7, window_bounds = array<i64: 1, 64>}, {pipeline_mode = #tpu.pipeline_mode<synchronous>, transform_indices = @transform_8, window_bounds = array<i64: 1, 64>}, {pipeline_mode = #tpu.pipeline_mode<synchronous>, transform_indices = @transform_9, window_bounds = array<i64: 64, 5>}, {pipeline_mode = #tpu.pipeline_mode<synchronous>, transform_indices = @transform_10, window_bounds = array<i64: 1, 5>}, {pipeline_mode = #tpu.pipeline_mode<synchronous>, transform_indices = @transform_11, window_bounds = array<i64: 8, 64>}, {pipeline_mode = #tpu.pipeline_mode<synchronous>, transform_indices = @transform_12, window_bounds = array<i64: 64, 8>}, {pipeline_mode = #tpu.pipeline_mode<synchronous>, transform_indices = @transform_13, window_bounds = array<i64: 8, 64>}, {transform_indices = @transform_14, window_bounds = array<i64: 8, 128>}]} {
    %c0 = arith.constant 0 : index
    %c0_0 = arith.constant 0 : index
    %0 = vector.load %arg1[%c0, %c0_0] : memref<64x32xf32, #tpu.memory_space<vmem>>, vector<64x32xf32>
    %c0_1 = arith.constant 0 : index
    %c0_2 = arith.constant 0 : index
    %1 = vector.load %arg3[%c0_1, %c0_2] : memref<32x192xf32, #tpu.memory_space<vmem>>, vector<32x192xf32>
    %cst = arith.constant dense<0.000000e+00> : vector<64x192xf32>
    %2 = tpu.matmul %0, %1, %cst {dimension_numbers = #tpu.dot_dimension_numbers<[1], [0], [0], [1], [0, 0, 1, 1], [], []>} : vector<64x32xf32>, vector<32x192xf32>, vector<64x192xf32> -> vector<64x192xf32>
    %c0_3 = arith.constant 0 : index
    %c0_4 = arith.constant 0 : index
    %3 = vector.load %arg4[%c0_3, %c0_4] : memref<1x192xf32, #tpu.memory_space<vmem>>, vector<1x192xf32>
    %4 = vector.broadcast %3 : vector<1x192xf32> to vector<64x192xf32>
    %5 = arith.addf %2, %4 : vector<64x192xf32>
    %c0_5 = arith.constant 0 : index
    %c0_6 = arith.constant 0 : index
    %6 = vector.load %arg16[%c0_5, %c0_6] : memref<64x192xf32, #tpu.memory_space<vmem>>, vector<64x192xf32>
    tpu.vector_store %arg16[%c0_5, %c0_6], %5 {strides = array<i32>} : memref<64x192xf32, #tpu.memory_space<vmem>>, vector<64x192xf32>,
    %c0_7 = arith.constant 0 : index
    %c0_8 = arith.constant 0 : index
    %7 = vector.load %arg5[%c0_7, %c0_8] : memref<64x192xf32, #tpu.memory_space<vmem>>, vector<64x192xf32>
    %c0_9 = arith.constant 0 : index
    %c0_10 = arith.constant 0 : index
    %8 = vector.load %arg6[%c0_9, %c0_10] : memref<1x64xf32, #tpu.memory_space<vmem>>, vector<1x32xf32>
    %c0_11 = arith.constant 0 : index
    %c32 = arith.constant 32 : index
    %9 = vector.load %arg6[%c0_11, %c32] : memref<1x64xf32, #tpu.memory_space<vmem>>, vector<1x32xf32>
    %c0_12 = arith.constant 0 : index
    %c0_13 = arith.constant 0 : index
    %c0_14 = arith.constant 0 : index
    %10 = vector.load %arg2[%c0_12, %c0_13, %c0_14] : memref<2x8x32xf32, #tpu.memory_space<vmem>>, vector<1x8x32xf32>
    %11 = vector.shape_cast %10 : vector<1x8x32xf32> to vector<8x32xf32>
    %c1 = arith.constant 1 : index
    %c0_15 = arith.constant 0 : index
    %c0_16 = arith.constant 0 : index
    %12 = vector.load %arg2[%c1, %c0_15, %c0_16] : memref<2x8x32xf32, #tpu.memory_space<vmem>>, vector<1x8x32xf32>
    %13 = vector.shape_cast %12 : vector<1x8x32xf32> to vector<8x32xf32>
    %14 = tpu.concatenate %11, %13 in 1 : vector<8x32xf32>, vector<8x32xf32> -> vector<8x64xf32>
    %c0_17 = arith.constant 0 : index
    %c0_18 = arith.constant 0 : index
    %15 = vector.load %arg16[%c0_17, %c0_18] : memref<64x192xf32, #tpu.memory_space<vmem>>, vector<8x96xf32>
    %c56 = arith.constant 56 : index
    %c96 = arith.constant 96 : index
    %16 = vector.load %arg16[%c56, %c96] : memref<64x192xf32, #tpu.memory_space<vmem>>, vector<8x96xf32>
    %cst_19 = arith.constant dense<0.000000e+00> : vector<8x192xf32>
    %17 = tpu.matmul %14, %7, %cst_19 {dimension_numbers = #tpu.dot_dimension_numbers<[1], [0], [0], [1], [0, 0, 1, 1], [], []>} : vector<8x64xf32>, vector<64x192xf32>, vector<8x192xf32> -> vector<8x192xf32>
    %18 = vector.extract_strided_slice %15 {offsets = [0, 0], sizes = [8, 64], strides = [1, 1]} : vector<8x96xf32> to vector<8x64xf32>
    %19 = vector.extract_strided_slice %17 {offsets = [0, 0], sizes = [8, 64], strides = [1, 1]} : vector<8x192xf32> to vector<8x64xf32>
    %20 = arith.addf %18, %19 : vector<8x64xf32>
    %21 = arith.negf %20 : vector<8x64xf32>
    %22 = math.exp %21 : vector<8x64xf32>
    %cst_20 = arith.constant 1.000000e+00 : f32
    %23 = vector.broadcast %cst_20 : f32 to vector<8x64xf32>
    %24 = arith.addf %23, %22 : vector<8x64xf32>
    %25 = arith.divf %23, %24 : vector<8x64xf32>
    %26 = vector.extract_strided_slice %16 {offsets = [0, 0], sizes = [8, 64], strides = [1, 1]} : vector<8x96xf32> to vector<8x64xf32>
    %27 = vector.extract_strided_slice %17 {offsets = [0, 96], sizes = [8, 64], strides = [1, 1]} : vector<8x192xf32> to vector<8x64xf32>
    %28 = arith.addf %26, %27 : vector<8x64xf32>
    %29 = arith.negf %28 : vector<8x64xf32>
    %30 = math.exp %29 : vector<8x64xf32>
    %cst_21 = arith.constant 1.000000e+00 : f32
    %31 = vector.broadcast %cst_21 : f32 to vector<8x64xf32>
    %32 = arith.addf %31, %30 : vector<8x64xf32>
    %33 = arith.divf %31, %32 : vector<8x64xf32>
    %34 = vector.extract_strided_slice %15 {offsets = [0, 64], sizes = [8, 32], strides = [1, 1]} : vector<8x96xf32> to vector<8x32xf32>
    %35 = vector.extract_strided_slice %25 {offsets = [0, 0], sizes = [8, 32], strides = [1, 1]} : vector<8x64xf32> to vector<8x32xf32>
    %36 = vector.extract_strided_slice %17 {offsets = [0, 64], sizes = [8, 32], strides = [1, 1]} : vector<8x192xf32> to vector<8x32xf32>
    %37 = vector.broadcast %8 : vector<1x32xf32> to vector<8x32xf32>
    %38 = arith.addf %36, %37 : vector<8x32xf32>
    %39 = arith.mulf %35, %38 : vector<8x32xf32>
    %40 = arith.addf %34, %39 : vector<8x32xf32>
    %41 = math.tanh %40 : vector<8x32xf32>
    %42 = vector.extract_strided_slice %16 {offsets = [0, 64], sizes = [8, 32], strides = [1, 1]} : vector<8x96xf32> to vector<8x32xf32>
    %43 = vector.extract_strided_slice %33 {offsets = [0, 0], sizes = [8, 32], strides = [1, 1]} : vector<8x64xf32> to vector<8x32xf32>
    %44 = vector.extract_strided_slice %17 {offsets = [0, 160], sizes = [8, 32], strides = [1, 1]} : vector<8x192xf32> to vector<8x32xf32>
    %45 = vector.broadcast %9 : vector<1x32xf32> to vector<8x32xf32>
    %46 = arith.addf %44, %45 : vector<8x32xf32>
    %47 = arith.mulf %43, %46 : vector<8x32xf32>
    %48 = arith.addf %42, %47 : vector<8x32xf32>
    %49 = math.tanh %48 : vector<8x32xf32>
    %50 = vector.extract_strided_slice %25 {offsets = [0, 32], sizes = [8, 32], strides = [1, 1]} : vector<8x64xf32> to vector<8x32xf32>
    %cst_22 = arith.constant 1.000000e+00 : f32
    %51 = vector.broadcast %cst_22 : f32 to vector<8x32xf32>
    %52 = arith.subf %51, %50 : vector<8x32xf32>
    %53 = arith.mulf %52, %41 : vector<8x32xf32>
    %54 = vector.extract_strided_slice %25 {offsets = [0, 32], sizes = [8, 32], strides = [1, 1]} : vector<8x64xf32> to vector<8x32xf32>
    %55 = vector.extract_strided_slice %14 {offsets = [0, 0], sizes = [8, 32], strides = [1, 1]} : vector<8x64xf32> to vector<8x32xf32>
    %56 = arith.mulf %54, %55 : vector<8x32xf32>
    %57 = arith.addf %53, %56 : vector<8x32xf32>
    %58 = vector.extract_strided_slice %33 {offsets = [0, 32], sizes = [8, 32], strides = [1, 1]} : vector<8x64xf32> to vector<8x32xf32>
    %cst_23 = arith.constant 1.000000e+00 : f32
    %59 = vector.broadcast %cst_23 : f32 to vector<8x32xf32>
    %60 = arith.subf %59, %58 : vector<8x32xf32>
    %61 = arith.mulf %60, %49 : vector<8x32xf32>
    %62 = vector.extract_strided_slice %33 {offsets = [0, 32], sizes = [8, 32], strides = [1, 1]} : vector<8x64xf32> to vector<8x32xf32>
    %63 = vector.extract_strided_slice %14 {offsets = [0, 32], sizes = [8, 32], strides = [1, 1]} : vector<8x64xf32> to vector<8x32xf32>
    %64 = arith.mulf %62, %63 : vector<8x32xf32>
    %65 = arith.addf %61, %64 : vector<8x32xf32>
    %66 = tpu.concatenate %57, %65 in 1 : vector<8x32xf32>, vector<8x32xf32> -> vector<8x64xf32>
    %c0_24 = arith.constant 0 : index
    %c0_25 = arith.constant 0 : index
    %67 = vector.load %arg17[%c0_24, %c0_25] : memref<64x64xf32, #tpu.memory_space<vmem>>, vector<8x32xf32>
    tpu.vector_store %arg17[%c0_24, %c0_25], %57 {strides = array<i32>} : memref<64x64xf32, #tpu.memory_space<vmem>>, vector<8x32xf32>,
    %c56_26 = arith.constant 56 : index
    %c32_27 = arith.constant 32 : index
    %68 = vector.load %arg17[%c56_26, %c32_27] : memref<64x64xf32, #tpu.memory_space<vmem>>, vector<8x32xf32>
    tpu.vector_store %arg17[%c56_26, %c32_27], %65 {strides = array<i32>} : memref<64x64xf32, #tpu.memory_space<vmem>>, vector<8x32xf32>,
    %c8 = arith.constant 8 : index
    %c0_28 = arith.constant 0 : index
    %69 = vector.load %arg16[%c8, %c0_28] : memref<64x192xf32, #tpu.memory_space<vmem>>, vector<8x96xf32>
    %c48 = arith.constant 48 : index
    %c96_29 = arith.constant 96 : index
    %70 = vector.load %arg16[%c48, %c96_29] : memref<64x192xf32, #tpu.memory_space<vmem>>, vector<8x96xf32>
    %cst_30 = arith.constant dense<0.000000e+00> : vector<8x192xf32>
    %71 = tpu.matmul %66, %7, %cst_30 {dimension_numbers = #tpu.dot_dimension_numbers<[1], [0], [0], [1], [0, 0, 1, 1], [], []>} : vector<8x64xf32>, vector<64x192xf32>, vector<8x192xf32> -> vector<8x192xf32>
    %72 = vector.extract_strided_slice %69 {offsets = [0, 0], sizes = [8, 64], strides = [1, 1]} : vector<8x96xf32> to vector<8x64xf32>
    %73 = vector.extract_strided_slice %71 {offsets = [0, 0], sizes = [8, 64], strides = [1, 1]} : vector<8x192xf32> to vector<8x64xf32>
    %74 = arith.addf %72, %73 : vector<8x64xf32>
    %75 = arith.negf %74 : vector<8x64xf32>
    %76 = math.exp %75 : vector<8x64xf32>
    %cst_31 = arith.constant 1.000000e+00 : f32
    %77 = vector.broadcast %cst_31 : f32 to vector<8x64xf32>
    %78 = arith.addf %77, %76 : vector<8x64xf32>
    %79 = arith.divf %77, %78 : vector<8x64xf32>
    %80 = vector.extract_strided_slice %70 {offsets = [0, 0], sizes = [8, 64], strides = [1, 1]} : vector<8x96xf32> to vector<8x64xf32>
    %81 = vector.extract_strided_slice %71 {offsets = [0, 96], sizes = [8, 64], strides = [1, 1]} : vector<8x192xf32> to vector<8x64xf32>
    %82 = arith.addf %80, %81 : vector<8x64xf32>
    %83 = arith.negf %82 : vector<8x64xf32>
    %84 = math.exp %83 : vector<8x64xf32>
    %cst_32 = arith.constant 1.000000e+00 : f32
    %85 = vector.broadcast %cst_32 : f32 to vector<8x64xf32>
    %86 = arith.addf %85, %84 : vector<8x64xf32>
    %87 = arith.divf %85, %86 : vector<8x64xf32>
    %88 = vector.extract_strided_slice %69 {offsets = [0, 64], sizes = [8, 32], strides = [1, 1]} : vector<8x96xf32> to vector<8x32xf32>
    %89 = vector.extract_strided_slice %79 {offsets = [0, 0], sizes = [8, 32], strides = [1, 1]} : vector<8x64xf32> to vector<8x32xf32>
    %90 = vector.extract_strided_slice %71 {offsets = [0, 64], sizes = [8, 32], strides = [1, 1]} : vector<8x192xf32> to vector<8x32xf32>
    %91 = vector.broadcast %8 : vector<1x32xf32> to vector<8x32xf32>
    %92 = arith.addf %90, %91 : vector<8x32xf32>
    %93 = arith.mulf %89, %92 : vector<8x32xf32>
    %94 = arith.addf %88, %93 : vector<8x32xf32>
    %95 = math.tanh %94 : vector<8x32xf32>
    %96 = vector.extract_strided_slice %70 {offsets = [0, 64], sizes = [8, 32], strides = [1, 1]} : vector<8x96xf32> to vector<8x32xf32>
    %97 = vector.extract_strided_slice %87 {offsets = [0, 0], sizes = [8, 32], strides = [1, 1]} : vector<8x64xf32> to vector<8x32xf32>
    %98 = vector.extract_strided_slice %71 {offsets = [0, 160], sizes = [8, 32], strides = [1, 1]} : vector<8x192xf32> to vector<8x32xf32>
    %99 = vector.broadcast %9 : vector<1x32xf32> to vector<8x32xf32>
    %100 = arith.addf %98, %99 : vector<8x32xf32>
    %101 = arith.mulf %97, %100 : vector<8x32xf32>
    %102 = arith.addf %96, %101 : vector<8x32xf32>
    %103 = math.tanh %102 : vector<8x32xf32>
    %104 = vector.extract_strided_slice %79 {offsets = [0, 32], sizes = [8, 32], strides = [1, 1]} : vector<8x64xf32> to vector<8x32xf32>
    %cst_33 = arith.constant 1.000000e+00 : f32
    %105 = vector.broadcast %cst_33 : f32 to vector<8x32xf32>
    %106 = arith.subf %105, %104 : vector<8x32xf32>
    %107 = arith.mulf %106, %95 : vector<8x32xf32>
    %108 = vector.extract_strided_slice %79 {offsets = [0, 32], sizes = [8, 32], strides = [1, 1]} : vector<8x64xf32> to vector<8x32xf32>
    %109 = vector.extract_strided_slice %66 {offsets = [0, 0], sizes = [8, 32], strides = [1, 1]} : vector<8x64xf32> to vector<8x32xf32>
    %110 = arith.mulf %108, %109 : vector<8x32xf32>
    %111 = arith.addf %107, %110 : vector<8x32xf32>
    %112 = vector.extract_strided_slice %87 {offsets = [0, 32], sizes = [8, 32], strides = [1, 1]} : vector<8x64xf32> to vector<8x32xf32>
    %cst_34 = arith.constant 1.000000e+00 : f32
    %113 = vector.broadcast %cst_34 : f32 to vector<8x32xf32>
    %114 = arith.subf %113, %112 : vector<8x32xf32>
    %115 = arith.mulf %114, %103 : vector<8x32xf32>
    %116 = vector.extract_strided_slice %87 {offsets = [0, 32], sizes = [8, 32], strides = [1, 1]} : vector<8x64xf32> to vector<8x32xf32>
    %117 = vector.extract_strided_slice %66 {offsets = [0, 32], sizes = [8, 32], strides = [1, 1]} : vector<8x64xf32> to vector<8x32xf32>
    %118 = arith.mulf %116, %117 : vector<8x32xf32>
    %119 = arith.addf %115, %118 : vector<8x32xf32>
    %120 = tpu.concatenate %111, %119 in 1 : vector<8x32xf32>, vector<8x32xf32> -> vector<8x64xf32>
    %c8_35 = arith.constant 8 : index
    %c0_36 = arith.constant 0 : index
    %121 = vector.load %arg17[%c8_35, %c0_36] : memref<64x64xf32, #tpu.memory_space<vmem>>, vector<8x32xf32>
    tpu.vector_store %arg17[%c8_35, %c0_36], %111 {strides = array<i32>} : memref<64x64xf32, #tpu.memory_space<vmem>>, vector<8x32xf32>,
    %c48_37 = arith.constant 48 : index
    %c32_38 = arith.constant 32 : index
    %122 = vector.load %arg17[%c48_37, %c32_38] : memref<64x64xf32, #tpu.memory_space<vmem>>, vector<8x32xf32>
    tpu.vector_store %arg17[%c48_37, %c32_38], %119 {strides = array<i32>} : memref<64x64xf32, #tpu.memory_space<vmem>>, vector<8x32xf32>,
    %c16 = arith.constant 16 : index
    %c0_39 = arith.constant 0 : index
    %123 = vector.load %arg16[%c16, %c0_39] : memref<64x192xf32, #tpu.memory_space<vmem>>, vector<8x96xf32>
    %c40 = arith.constant 40 : index
    %c96_40 = arith.constant 96 : index
    %124 = vector.load %arg16[%c40, %c96_40] : memref<64x192xf32, #tpu.memory_space<vmem>>, vector<8x96xf32>
    %cst_41 = arith.constant dense<0.000000e+00> : vector<8x192xf32>
    %125 = tpu.matmul %120, %7, %cst_41 {dimension_numbers = #tpu.dot_dimension_numbers<[1], [0], [0], [1], [0, 0, 1, 1], [], []>} : vector<8x64xf32>, vector<64x192xf32>, vector<8x192xf32> -> vector<8x192xf32>
    %126 = vector.extract_strided_slice %123 {offsets = [0, 0], sizes = [8, 64], strides = [1, 1]} : vector<8x96xf32> to vector<8x64xf32>
    %127 = vector.extract_strided_slice %125 {offsets = [0, 0], sizes = [8, 64], strides = [1, 1]} : vector<8x192xf32> to vector<8x64xf32>
    %128 = arith.addf %126, %127 : vector<8x64xf32>
    %129 = arith.negf %128 : vector<8x64xf32>
    %130 = math.exp %129 : vector<8x64xf32>
    %cst_42 = arith.constant 1.000000e+00 : f32
    %131 = vector.broadcast %cst_42 : f32 to vector<8x64xf32>
    %132 = arith.addf %131, %130 : vector<8x64xf32>
    %133 = arith.divf %131, %132 : vector<8x64xf32>
    %134 = vector.extract_strided_slice %124 {offsets = [0, 0], sizes = [8, 64], strides = [1, 1]} : vector<8x96xf32> to vector<8x64xf32>
    %135 = vector.extract_strided_slice %125 {offsets = [0, 96], sizes = [8, 64], strides = [1, 1]} : vector<8x192xf32> to vector<8x64xf32>
    %136 = arith.addf %134, %135 : vector<8x64xf32>
    %137 = arith.negf %136 : vector<8x64xf32>
    %138 = math.exp %137 : vector<8x64xf32>
    %cst_43 = arith.constant 1.000000e+00 : f32
    %139 = vector.broadcast %cst_43 : f32 to vector<8x64xf32>
    %140 = arith.addf %139, %138 : vector<8x64xf32>
    %141 = arith.divf %139, %140 : vector<8x64xf32>
    %142 = vector.extract_strided_slice %123 {offsets = [0, 64], sizes = [8, 32], strides = [1, 1]} : vector<8x96xf32> to vector<8x32xf32>
    %143 = vector.extract_strided_slice %133 {offsets = [0, 0], sizes = [8, 32], strides = [1, 1]} : vector<8x64xf32> to vector<8x32xf32>
    %144 = vector.extract_strided_slice %125 {offsets = [0, 64], sizes = [8, 32], strides = [1, 1]} : vector<8x192xf32> to vector<8x32xf32>
    %145 = vector.broadcast %8 : vector<1x32xf32> to vector<8x32xf32>
    %146 = arith.addf %144, %145 : vector<8x32xf32>
    %147 = arith.mulf %143, %146 : vector<8x32xf32>
    %148 = arith.addf %142, %147 : vector<8x32xf32>
    %149 = math.tanh %148 : vector<8x32xf32>
    %150 = vector.extract_strided_slice %124 {offsets = [0, 64], sizes = [8, 32], strides = [1, 1]} : vector<8x96xf32> to vector<8x32xf32>
    %151 = vector.extract_strided_slice %141 {offsets = [0, 0], sizes = [8, 32], strides = [1, 1]} : vector<8x64xf32> to vector<8x32xf32>
    %152 = vector.extract_strided_slice %125 {offsets = [0, 160], sizes = [8, 32], strides = [1, 1]} : vector<8x192xf32> to vector<8x32xf32>
    %153 = vector.broadcast %9 : vector<1x32xf32> to vector<8x32xf32>
    %154 = arith.addf %152, %153 : vector<8x32xf32>
    %155 = arith.mulf %151, %154 : vector<8x32xf32>
    %156 = arith.addf %150, %155 : vector<8x32xf32>
    %157 = math.tanh %156 : vector<8x32xf32>
    %158 = vector.extract_strided_slice %133 {offsets = [0, 32], sizes = [8, 32], strides = [1, 1]} : vector<8x64xf32> to vector<8x32xf32>
    %cst_44 = arith.constant 1.000000e+00 : f32
    %159 = vector.broadcast %cst_44 : f32 to vector<8x32xf32>
    %160 = arith.subf %159, %158 : vector<8x32xf32>
    %161 = arith.mulf %160, %149 : vector<8x32xf32>
    %162 = vector.extract_strided_slice %133 {offsets = [0, 32], sizes = [8, 32], strides = [1, 1]} : vector<8x64xf32> to vector<8x32xf32>
    %163 = vector.extract_strided_slice %120 {offsets = [0, 0], sizes = [8, 32], strides = [1, 1]} : vector<8x64xf32> to vector<8x32xf32>
    %164 = arith.mulf %162, %163 : vector<8x32xf32>
    %165 = arith.addf %161, %164 : vector<8x32xf32>
    %166 = vector.extract_strided_slice %141 {offsets = [0, 32], sizes = [8, 32], strides = [1, 1]} : vector<8x64xf32> to vector<8x32xf32>
    %cst_45 = arith.constant 1.000000e+00 : f32
    %167 = vector.broadcast %cst_45 : f32 to vector<8x32xf32>
    %168 = arith.subf %167, %166 : vector<8x32xf32>
    %169 = arith.mulf %168, %157 : vector<8x32xf32>
    %170 = vector.extract_strided_slice %141 {offsets = [0, 32], sizes = [8, 32], strides = [1, 1]} : vector<8x64xf32> to vector<8x32xf32>
    %171 = vector.extract_strided_slice %120 {offsets = [0, 32], sizes = [8, 32], strides = [1, 1]} : vector<8x64xf32> to vector<8x32xf32>
    %172 = arith.mulf %170, %171 : vector<8x32xf32>
    %173 = arith.addf %169, %172 : vector<8x32xf32>
    %174 = tpu.concatenate %165, %173 in 1 : vector<8x32xf32>, vector<8x32xf32> -> vector<8x64xf32>
    %c16_46 = arith.constant 16 : index
    %c0_47 = arith.constant 0 : index
    %175 = vector.load %arg17[%c16_46, %c0_47] : memref<64x64xf32, #tpu.memory_space<vmem>>, vector<8x32xf32>
    tpu.vector_store %arg17[%c16_46, %c0_47], %165 {strides = array<i32>} : memref<64x64xf32, #tpu.memory_space<vmem>>, vector<8x32xf32>,
    %c40_48 = arith.constant 40 : index
    %c32_49 = arith.constant 32 : index
    %176 = vector.load %arg17[%c40_48, %c32_49] : memref<64x64xf32, #tpu.memory_space<vmem>>, vector<8x32xf32>
    tpu.vector_store %arg17[%c40_48, %c32_49], %173 {strides = array<i32>} : memref<64x64xf32, #tpu.memory_space<vmem>>, vector<8x32xf32>,
    %c24 = arith.constant 24 : index
    %c0_50 = arith.constant 0 : index
    %177 = vector.load %arg16[%c24, %c0_50] : memref<64x192xf32, #tpu.memory_space<vmem>>, vector<8x96xf32>
    %c32_51 = arith.constant 32 : index
    %c96_52 = arith.constant 96 : index
    %178 = vector.load %arg16[%c32_51, %c96_52] : memref<64x192xf32, #tpu.memory_space<vmem>>, vector<8x96xf32>
    %cst_53 = arith.constant dense<0.000000e+00> : vector<8x192xf32>
    %179 = tpu.matmul %174, %7, %cst_53 {dimension_numbers = #tpu.dot_dimension_numbers<[1], [0], [0], [1], [0, 0, 1, 1], [], []>} : vector<8x64xf32>, vector<64x192xf32>, vector<8x192xf32> -> vector<8x192xf32>
    %180 = vector.extract_strided_slice %177 {offsets = [0, 0], sizes = [8, 64], strides = [1, 1]} : vector<8x96xf32> to vector<8x64xf32>
    %181 = vector.extract_strided_slice %179 {offsets = [0, 0], sizes = [8, 64], strides = [1, 1]} : vector<8x192xf32> to vector<8x64xf32>
    %182 = arith.addf %180, %181 : vector<8x64xf32>
    %183 = arith.negf %182 : vector<8x64xf32>
    %184 = math.exp %183 : vector<8x64xf32>
    %cst_54 = arith.constant 1.000000e+00 : f32
    %185 = vector.broadcast %cst_54 : f32 to vector<8x64xf32>
    %186 = arith.addf %185, %184 : vector<8x64xf32>
    %187 = arith.divf %185, %186 : vector<8x64xf32>
    %188 = vector.extract_strided_slice %178 {offsets = [0, 0], sizes = [8, 64], strides = [1, 1]} : vector<8x96xf32> to vector<8x64xf32>
    %189 = vector.extract_strided_slice %179 {offsets = [0, 96], sizes = [8, 64], strides = [1, 1]} : vector<8x192xf32> to vector<8x64xf32>
    %190 = arith.addf %188, %189 : vector<8x64xf32>
    %191 = arith.negf %190 : vector<8x64xf32>
    %192 = math.exp %191 : vector<8x64xf32>
    %cst_55 = arith.constant 1.000000e+00 : f32
    %193 = vector.broadcast %cst_55 : f32 to vector<8x64xf32>
    %194 = arith.addf %193, %192 : vector<8x64xf32>
    %195 = arith.divf %193, %194 : vector<8x64xf32>
    %196 = vector.extract_strided_slice %177 {offsets = [0, 64], sizes = [8, 32], strides = [1, 1]} : vector<8x96xf32> to vector<8x32xf32>
    %197 = vector.extract_strided_slice %187 {offsets = [0, 0], sizes = [8, 32], strides = [1, 1]} : vector<8x64xf32> to vector<8x32xf32>
    %198 = vector.extract_strided_slice %179 {offsets = [0, 64], sizes = [8, 32], strides = [1, 1]} : vector<8x192xf32> to vector<8x32xf32>
    %199 = vector.broadcast %8 : vector<1x32xf32> to vector<8x32xf32>
    %200 = arith.addf %198, %199 : vector<8x32xf32>
    %201 = arith.mulf %197, %200 : vector<8x32xf32>
    %202 = arith.addf %196, %201 : vector<8x32xf32>
    %203 = math.tanh %202 : vector<8x32xf32>
    %204 = vector.extract_strided_slice %178 {offsets = [0, 64], sizes = [8, 32], strides = [1, 1]} : vector<8x96xf32> to vector<8x32xf32>
    %205 = vector.extract_strided_slice %195 {offsets = [0, 0], sizes = [8, 32], strides = [1, 1]} : vector<8x64xf32> to vector<8x32xf32>
    %206 = vector.extract_strided_slice %179 {offsets = [0, 160], sizes = [8, 32], strides = [1, 1]} : vector<8x192xf32> to vector<8x32xf32>
    %207 = vector.broadcast %9 : vector<1x32xf32> to vector<8x32xf32>
    %208 = arith.addf %206, %207 : vector<8x32xf32>
    %209 = arith.mulf %205, %208 : vector<8x32xf32>
    %210 = arith.addf %204, %209 : vector<8x32xf32>
    %211 = math.tanh %210 : vector<8x32xf32>
    %212 = vector.extract_strided_slice %187 {offsets = [0, 32], sizes = [8, 32], strides = [1, 1]} : vector<8x64xf32> to vector<8x32xf32>
    %cst_56 = arith.constant 1.000000e+00 : f32
    %213 = vector.broadcast %cst_56 : f32 to vector<8x32xf32>
    %214 = arith.subf %213, %212 : vector<8x32xf32>
    %215 = arith.mulf %214, %203 : vector<8x32xf32>
    %216 = vector.extract_strided_slice %187 {offsets = [0, 32], sizes = [8, 32], strides = [1, 1]} : vector<8x64xf32> to vector<8x32xf32>
    %217 = vector.extract_strided_slice %174 {offsets = [0, 0], sizes = [8, 32], strides = [1, 1]} : vector<8x64xf32> to vector<8x32xf32>
    %218 = arith.mulf %216, %217 : vector<8x32xf32>
    %219 = arith.addf %215, %218 : vector<8x32xf32>
    %220 = vector.extract_strided_slice %195 {offsets = [0, 32], sizes = [8, 32], strides = [1, 1]} : vector<8x64xf32> to vector<8x32xf32>
    %cst_57 = arith.constant 1.000000e+00 : f32
    %221 = vector.broadcast %cst_57 : f32 to vector<8x32xf32>
    %222 = arith.subf %221, %220 : vector<8x32xf32>
    %223 = arith.mulf %222, %211 : vector<8x32xf32>
    %224 = vector.extract_strided_slice %195 {offsets = [0, 32], sizes = [8, 32], strides = [1, 1]} : vector<8x64xf32> to vector<8x32xf32>
    %225 = vector.extract_strided_slice %174 {offsets = [0, 32], sizes = [8, 32], strides = [1, 1]} : vector<8x64xf32> to vector<8x32xf32>
    %226 = arith.mulf %224, %225 : vector<8x32xf32>
    %227 = arith.addf %223, %226 : vector<8x32xf32>
    %228 = tpu.concatenate %219, %227 in 1 : vector<8x32xf32>, vector<8x32xf32> -> vector<8x64xf32>
    %c24_58 = arith.constant 24 : index
    %c0_59 = arith.constant 0 : index
    %229 = vector.load %arg17[%c24_58, %c0_59] : memref<64x64xf32, #tpu.memory_space<vmem>>, vector<8x32xf32>
    tpu.vector_store %arg17[%c24_58, %c0_59], %219 {strides = array<i32>} : memref<64x64xf32, #tpu.memory_space<vmem>>, vector<8x32xf32>,
    %c32_60 = arith.constant 32 : index
    %c32_61 = arith.constant 32 : index
    %230 = vector.load %arg17[%c32_60, %c32_61] : memref<64x64xf32, #tpu.memory_space<vmem>>, vector<8x32xf32>
    tpu.vector_store %arg17[%c32_60, %c32_61], %227 {strides = array<i32>} : memref<64x64xf32, #tpu.memory_space<vmem>>, vector<8x32xf32>,
    %c32_62 = arith.constant 32 : index
    %c0_63 = arith.constant 0 : index
    %231 = vector.load %arg16[%c32_62, %c0_63] : memref<64x192xf32, #tpu.memory_space<vmem>>, vector<8x96xf32>
    %c24_64 = arith.constant 24 : index
    %c96_65 = arith.constant 96 : index
    %232 = vector.load %arg16[%c24_64, %c96_65] : memref<64x192xf32, #tpu.memory_space<vmem>>, vector<8x96xf32>
    %cst_66 = arith.constant dense<0.000000e+00> : vector<8x192xf32>
    %233 = tpu.matmul %228, %7, %cst_66 {dimension_numbers = #tpu.dot_dimension_numbers<[1], [0], [0], [1], [0, 0, 1, 1], [], []>} : vector<8x64xf32>, vector<64x192xf32>, vector<8x192xf32> -> vector<8x192xf32>
    %234 = vector.extract_strided_slice %231 {offsets = [0, 0], sizes = [8, 64], strides = [1, 1]} : vector<8x96xf32> to vector<8x64xf32>
    %235 = vector.extract_strided_slice %233 {offsets = [0, 0], sizes = [8, 64], strides = [1, 1]} : vector<8x192xf32> to vector<8x64xf32>
    %236 = arith.addf %234, %235 : vector<8x64xf32>
    %237 = arith.negf %236 : vector<8x64xf32>
    %238 = math.exp %237 : vector<8x64xf32>
    %cst_67 = arith.constant 1.000000e+00 : f32
    %239 = vector.broadcast %cst_67 : f32 to vector<8x64xf32>
    %240 = arith.addf %239, %238 : vector<8x64xf32>
    %241 = arith.divf %239, %240 : vector<8x64xf32>
    %242 = vector.extract_strided_slice %232 {offsets = [0, 0], sizes = [8, 64], strides = [1, 1]} : vector<8x96xf32> to vector<8x64xf32>
    %243 = vector.extract_strided_slice %233 {offsets = [0, 96], sizes = [8, 64], strides = [1, 1]} : vector<8x192xf32> to vector<8x64xf32>
    %244 = arith.addf %242, %243 : vector<8x64xf32>
    %245 = arith.negf %244 : vector<8x64xf32>
    %246 = math.exp %245 : vector<8x64xf32>
    %cst_68 = arith.constant 1.000000e+00 : f32
    %247 = vector.broadcast %cst_68 : f32 to vector<8x64xf32>
    %248 = arith.addf %247, %246 : vector<8x64xf32>
    %249 = arith.divf %247, %248 : vector<8x64xf32>
    %250 = vector.extract_strided_slice %231 {offsets = [0, 64], sizes = [8, 32], strides = [1, 1]} : vector<8x96xf32> to vector<8x32xf32>
    %251 = vector.extract_strided_slice %241 {offsets = [0, 0], sizes = [8, 32], strides = [1, 1]} : vector<8x64xf32> to vector<8x32xf32>
    %252 = vector.extract_strided_slice %233 {offsets = [0, 64], sizes = [8, 32], strides = [1, 1]} : vector<8x192xf32> to vector<8x32xf32>
    %253 = vector.broadcast %8 : vector<1x32xf32> to vector<8x32xf32>
    %254 = arith.addf %252, %253 : vector<8x32xf32>
    %255 = arith.mulf %251, %254 : vector<8x32xf32>
    %256 = arith.addf %250, %255 : vector<8x32xf32>
    %257 = math.tanh %256 : vector<8x32xf32>
    %258 = vector.extract_strided_slice %232 {offsets = [0, 64], sizes = [8, 32], strides = [1, 1]} : vector<8x96xf32> to vector<8x32xf32>
    %259 = vector.extract_strided_slice %249 {offsets = [0, 0], sizes = [8, 32], strides = [1, 1]} : vector<8x64xf32> to vector<8x32xf32>
    %260 = vector.extract_strided_slice %233 {offsets = [0, 160], sizes = [8, 32], strides = [1, 1]} : vector<8x192xf32> to vector<8x32xf32>
    %261 = vector.broadcast %9 : vector<1x32xf32> to vector<8x32xf32>
    %262 = arith.addf %260, %261 : vector<8x32xf32>
    %263 = arith.mulf %259, %262 : vector<8x32xf32>
    %264 = arith.addf %258, %263 : vector<8x32xf32>
    %265 = math.tanh %264 : vector<8x32xf32>
    %266 = vector.extract_strided_slice %241 {offsets = [0, 32], sizes = [8, 32], strides = [1, 1]} : vector<8x64xf32> to vector<8x32xf32>
    %cst_69 = arith.constant 1.000000e+00 : f32
    %267 = vector.broadcast %cst_69 : f32 to vector<8x32xf32>
    %268 = arith.subf %267, %266 : vector<8x32xf32>
    %269 = arith.mulf %268, %257 : vector<8x32xf32>
    %270 = vector.extract_strided_slice %241 {offsets = [0, 32], sizes = [8, 32], strides = [1, 1]} : vector<8x64xf32> to vector<8x32xf32>
    %271 = vector.extract_strided_slice %228 {offsets = [0, 0], sizes = [8, 32], strides = [1, 1]} : vector<8x64xf32> to vector<8x32xf32>
    %272 = arith.mulf %270, %271 : vector<8x32xf32>
    %273 = arith.addf %269, %272 : vector<8x32xf32>
    %274 = vector.extract_strided_slice %249 {offsets = [0, 32], sizes = [8, 32], strides = [1, 1]} : vector<8x64xf32> to vector<8x32xf32>
    %cst_70 = arith.constant 1.000000e+00 : f32
    %275 = vector.broadcast %cst_70 : f32 to vector<8x32xf32>
    %276 = arith.subf %275, %274 : vector<8x32xf32>
    %277 = arith.mulf %276, %265 : vector<8x32xf32>
    %278 = vector.extract_strided_slice %249 {offsets = [0, 32], sizes = [8, 32], strides = [1, 1]} : vector<8x64xf32> to vector<8x32xf32>
    %279 = vector.extract_strided_slice %228 {offsets = [0, 32], sizes = [8, 32], strides = [1, 1]} : vector<8x64xf32> to vector<8x32xf32>
    %280 = arith.mulf %278, %279 : vector<8x32xf32>
    %281 = arith.addf %277, %280 : vector<8x32xf32>
    %282 = tpu.concatenate %273, %281 in 1 : vector<8x32xf32>, vector<8x32xf32> -> vector<8x64xf32>
    %c32_71 = arith.constant 32 : index
    %c0_72 = arith.constant 0 : index
    %283 = vector.load %arg17[%c32_71, %c0_72] : memref<64x64xf32, #tpu.memory_space<vmem>>, vector<8x32xf32>
    tpu.vector_store %arg17[%c32_71, %c0_72], %273 {strides = array<i32>} : memref<64x64xf32, #tpu.memory_space<vmem>>, vector<8x32xf32>,
    %c24_73 = arith.constant 24 : index
    %c32_74 = arith.constant 32 : index
    %284 = vector.load %arg17[%c24_73, %c32_74] : memref<64x64xf32, #tpu.memory_space<vmem>>, vector<8x32xf32>
    tpu.vector_store %arg17[%c24_73, %c32_74], %281 {strides = array<i32>} : memref<64x64xf32, #tpu.memory_space<vmem>>, vector<8x32xf32>,
    %c40_75 = arith.constant 40 : index
    %c0_76 = arith.constant 0 : index
    %285 = vector.load %arg16[%c40_75, %c0_76] : memref<64x192xf32, #tpu.memory_space<vmem>>, vector<8x96xf32>
    %c16_77 = arith.constant 16 : index
    %c96_78 = arith.constant 96 : index
    %286 = vector.load %arg16[%c16_77, %c96_78] : memref<64x192xf32, #tpu.memory_space<vmem>>, vector<8x96xf32>
    %cst_79 = arith.constant dense<0.000000e+00> : vector<8x192xf32>
    %287 = tpu.matmul %282, %7, %cst_79 {dimension_numbers = #tpu.dot_dimension_numbers<[1], [0], [0], [1], [0, 0, 1, 1], [], []>} : vector<8x64xf32>, vector<64x192xf32>, vector<8x192xf32> -> vector<8x192xf32>
    %288 = vector.extract_strided_slice %285 {offsets = [0, 0], sizes = [8, 64], strides = [1, 1]} : vector<8x96xf32> to vector<8x64xf32>
    %289 = vector.extract_strided_slice %287 {offsets = [0, 0], sizes = [8, 64], strides = [1, 1]} : vector<8x192xf32> to vector<8x64xf32>
    %290 = arith.addf %288, %289 : vector<8x64xf32>
    %291 = arith.negf %290 : vector<8x64xf32>
    %292 = math.exp %291 : vector<8x64xf32>
    %cst_80 = arith.constant 1.000000e+00 : f32
    %293 = vector.broadcast %cst_80 : f32 to vector<8x64xf32>
    %294 = arith.addf %293, %292 : vector<8x64xf32>
    %295 = arith.divf %293, %294 : vector<8x64xf32>
    %296 = vector.extract_strided_slice %286 {offsets = [0, 0], sizes = [8, 64], strides = [1, 1]} : vector<8x96xf32> to vector<8x64xf32>
    %297 = vector.extract_strided_slice %287 {offsets = [0, 96], sizes = [8, 64], strides = [1, 1]} : vector<8x192xf32> to vector<8x64xf32>
    %298 = arith.addf %296, %297 : vector<8x64xf32>
    %299 = arith.negf %298 : vector<8x64xf32>
    %300 = math.exp %299 : vector<8x64xf32>
    %cst_81 = arith.constant 1.000000e+00 : f32
    %301 = vector.broadcast %cst_81 : f32 to vector<8x64xf32>
    %302 = arith.addf %301, %300 : vector<8x64xf32>
    %303 = arith.divf %301, %302 : vector<8x64xf32>
    %304 = vector.extract_strided_slice %285 {offsets = [0, 64], sizes = [8, 32], strides = [1, 1]} : vector<8x96xf32> to vector<8x32xf32>
    %305 = vector.extract_strided_slice %295 {offsets = [0, 0], sizes = [8, 32], strides = [1, 1]} : vector<8x64xf32> to vector<8x32xf32>
    %306 = vector.extract_strided_slice %287 {offsets = [0, 64], sizes = [8, 32], strides = [1, 1]} : vector<8x192xf32> to vector<8x32xf32>
    %307 = vector.broadcast %8 : vector<1x32xf32> to vector<8x32xf32>
    %308 = arith.addf %306, %307 : vector<8x32xf32>
    %309 = arith.mulf %305, %308 : vector<8x32xf32>
    %310 = arith.addf %304, %309 : vector<8x32xf32>
    %311 = math.tanh %310 : vector<8x32xf32>
    %312 = vector.extract_strided_slice %286 {offsets = [0, 64], sizes = [8, 32], strides = [1, 1]} : vector<8x96xf32> to vector<8x32xf32>
    %313 = vector.extract_strided_slice %303 {offsets = [0, 0], sizes = [8, 32], strides = [1, 1]} : vector<8x64xf32> to vector<8x32xf32>
    %314 = vector.extract_strided_slice %287 {offsets = [0, 160], sizes = [8, 32], strides = [1, 1]} : vector<8x192xf32> to vector<8x32xf32>
    %315 = vector.broadcast %9 : vector<1x32xf32> to vector<8x32xf32>
    %316 = arith.addf %314, %315 : vector<8x32xf32>
    %317 = arith.mulf %313, %316 : vector<8x32xf32>
    %318 = arith.addf %312, %317 : vector<8x32xf32>
    %319 = math.tanh %318 : vector<8x32xf32>
    %320 = vector.extract_strided_slice %295 {offsets = [0, 32], sizes = [8, 32], strides = [1, 1]} : vector<8x64xf32> to vector<8x32xf32>
    %cst_82 = arith.constant 1.000000e+00 : f32
    %321 = vector.broadcast %cst_82 : f32 to vector<8x32xf32>
    %322 = arith.subf %321, %320 : vector<8x32xf32>
    %323 = arith.mulf %322, %311 : vector<8x32xf32>
    %324 = vector.extract_strided_slice %295 {offsets = [0, 32], sizes = [8, 32], strides = [1, 1]} : vector<8x64xf32> to vector<8x32xf32>
    %325 = vector.extract_strided_slice %282 {offsets = [0, 0], sizes = [8, 32], strides = [1, 1]} : vector<8x64xf32> to vector<8x32xf32>
    %326 = arith.mulf %324, %325 : vector<8x32xf32>
    %327 = arith.addf %323, %326 : vector<8x32xf32>
    %328 = vector.extract_strided_slice %303 {offsets = [0, 32], sizes = [8, 32], strides = [1, 1]} : vector<8x64xf32> to vector<8x32xf32>
    %cst_83 = arith.constant 1.000000e+00 : f32
    %329 = vector.broadcast %cst_83 : f32 to vector<8x32xf32>
    %330 = arith.subf %329, %328 : vector<8x32xf32>
    %331 = arith.mulf %330, %319 : vector<8x32xf32>
    %332 = vector.extract_strided_slice %303 {offsets = [0, 32], sizes = [8, 32], strides = [1, 1]} : vector<8x64xf32> to vector<8x32xf32>
    %333 = vector.extract_strided_slice %282 {offsets = [0, 32], sizes = [8, 32], strides = [1, 1]} : vector<8x64xf32> to vector<8x32xf32>
    %334 = arith.mulf %332, %333 : vector<8x32xf32>
    %335 = arith.addf %331, %334 : vector<8x32xf32>
    %336 = tpu.concatenate %327, %335 in 1 : vector<8x32xf32>, vector<8x32xf32> -> vector<8x64xf32>
    %c40_84 = arith.constant 40 : index
    %c0_85 = arith.constant 0 : index
    %337 = vector.load %arg17[%c40_84, %c0_85] : memref<64x64xf32, #tpu.memory_space<vmem>>, vector<8x32xf32>
    tpu.vector_store %arg17[%c40_84, %c0_85], %327 {strides = array<i32>} : memref<64x64xf32, #tpu.memory_space<vmem>>, vector<8x32xf32>,
    %c16_86 = arith.constant 16 : index
    %c32_87 = arith.constant 32 : index
    %338 = vector.load %arg17[%c16_86, %c32_87] : memref<64x64xf32, #tpu.memory_space<vmem>>, vector<8x32xf32>
    tpu.vector_store %arg17[%c16_86, %c32_87], %335 {strides = array<i32>} : memref<64x64xf32, #tpu.memory_space<vmem>>, vector<8x32xf32>,
    %c48_88 = arith.constant 48 : index
    %c0_89 = arith.constant 0 : index
    %339 = vector.load %arg16[%c48_88, %c0_89] : memref<64x192xf32, #tpu.memory_space<vmem>>, vector<8x96xf32>
    %c8_90 = arith.constant 8 : index
    %c96_91 = arith.constant 96 : index
    %340 = vector.load %arg16[%c8_90, %c96_91] : memref<64x192xf32, #tpu.memory_space<vmem>>, vector<8x96xf32>
    %cst_92 = arith.constant dense<0.000000e+00> : vector<8x192xf32>
    %341 = tpu.matmul %336, %7, %cst_92 {dimension_numbers = #tpu.dot_dimension_numbers<[1], [0], [0], [1], [0, 0, 1, 1], [], []>} : vector<8x64xf32>, vector<64x192xf32>, vector<8x192xf32> -> vector<8x192xf32>
    %342 = vector.extract_strided_slice %339 {offsets = [0, 0], sizes = [8, 64], strides = [1, 1]} : vector<8x96xf32> to vector<8x64xf32>
    %343 = vector.extract_strided_slice %341 {offsets = [0, 0], sizes = [8, 64], strides = [1, 1]} : vector<8x192xf32> to vector<8x64xf32>
    %344 = arith.addf %342, %343 : vector<8x64xf32>
    %345 = arith.negf %344 : vector<8x64xf32>
    %346 = math.exp %345 : vector<8x64xf32>
    %cst_93 = arith.constant 1.000000e+00 : f32
    %347 = vector.broadcast %cst_93 : f32 to vector<8x64xf32>
    %348 = arith.addf %347, %346 : vector<8x64xf32>
    %349 = arith.divf %347, %348 : vector<8x64xf32>
    %350 = vector.extract_strided_slice %340 {offsets = [0, 0], sizes = [8, 64], strides = [1, 1]} : vector<8x96xf32> to vector<8x64xf32>
    %351 = vector.extract_strided_slice %341 {offsets = [0, 96], sizes = [8, 64], strides = [1, 1]} : vector<8x192xf32> to vector<8x64xf32>
    %352 = arith.addf %350, %351 : vector<8x64xf32>
    %353 = arith.negf %352 : vector<8x64xf32>
    %354 = math.exp %353 : vector<8x64xf32>
    %cst_94 = arith.constant 1.000000e+00 : f32
    %355 = vector.broadcast %cst_94 : f32 to vector<8x64xf32>
    %356 = arith.addf %355, %354 : vector<8x64xf32>
    %357 = arith.divf %355, %356 : vector<8x64xf32>
    %358 = vector.extract_strided_slice %339 {offsets = [0, 64], sizes = [8, 32], strides = [1, 1]} : vector<8x96xf32> to vector<8x32xf32>
    %359 = vector.extract_strided_slice %349 {offsets = [0, 0], sizes = [8, 32], strides = [1, 1]} : vector<8x64xf32> to vector<8x32xf32>
    %360 = vector.extract_strided_slice %341 {offsets = [0, 64], sizes = [8, 32], strides = [1, 1]} : vector<8x192xf32> to vector<8x32xf32>
    %361 = vector.broadcast %8 : vector<1x32xf32> to vector<8x32xf32>
    %362 = arith.addf %360, %361 : vector<8x32xf32>
    %363 = arith.mulf %359, %362 : vector<8x32xf32>
    %364 = arith.addf %358, %363 : vector<8x32xf32>
    %365 = math.tanh %364 : vector<8x32xf32>
    %366 = vector.extract_strided_slice %340 {offsets = [0, 64], sizes = [8, 32], strides = [1, 1]} : vector<8x96xf32> to vector<8x32xf32>
    %367 = vector.extract_strided_slice %357 {offsets = [0, 0], sizes = [8, 32], strides = [1, 1]} : vector<8x64xf32> to vector<8x32xf32>
    %368 = vector.extract_strided_slice %341 {offsets = [0, 160], sizes = [8, 32], strides = [1, 1]} : vector<8x192xf32> to vector<8x32xf32>
    %369 = vector.broadcast %9 : vector<1x32xf32> to vector<8x32xf32>
    %370 = arith.addf %368, %369 : vector<8x32xf32>
    %371 = arith.mulf %367, %370 : vector<8x32xf32>
    %372 = arith.addf %366, %371 : vector<8x32xf32>
    %373 = math.tanh %372 : vector<8x32xf32>
    %374 = vector.extract_strided_slice %349 {offsets = [0, 32], sizes = [8, 32], strides = [1, 1]} : vector<8x64xf32> to vector<8x32xf32>
    %cst_95 = arith.constant 1.000000e+00 : f32
    %375 = vector.broadcast %cst_95 : f32 to vector<8x32xf32>
    %376 = arith.subf %375, %374 : vector<8x32xf32>
    %377 = arith.mulf %376, %365 : vector<8x32xf32>
    %378 = vector.extract_strided_slice %349 {offsets = [0, 32], sizes = [8, 32], strides = [1, 1]} : vector<8x64xf32> to vector<8x32xf32>
    %379 = vector.extract_strided_slice %336 {offsets = [0, 0], sizes = [8, 32], strides = [1, 1]} : vector<8x64xf32> to vector<8x32xf32>
    %380 = arith.mulf %378, %379 : vector<8x32xf32>
    %381 = arith.addf %377, %380 : vector<8x32xf32>
    %382 = vector.extract_strided_slice %357 {offsets = [0, 32], sizes = [8, 32], strides = [1, 1]} : vector<8x64xf32> to vector<8x32xf32>
    %cst_96 = arith.constant 1.000000e+00 : f32
    %383 = vector.broadcast %cst_96 : f32 to vector<8x32xf32>
    %384 = arith.subf %383, %382 : vector<8x32xf32>
    %385 = arith.mulf %384, %373 : vector<8x32xf32>
    %386 = vector.extract_strided_slice %357 {offsets = [0, 32], sizes = [8, 32], strides = [1, 1]} : vector<8x64xf32> to vector<8x32xf32>
    %387 = vector.extract_strided_slice %336 {offsets = [0, 32], sizes = [8, 32], strides = [1, 1]} : vector<8x64xf32> to vector<8x32xf32>
    %388 = arith.mulf %386, %387 : vector<8x32xf32>
    %389 = arith.addf %385, %388 : vector<8x32xf32>
    %390 = tpu.concatenate %381, %389 in 1 : vector<8x32xf32>, vector<8x32xf32> -> vector<8x64xf32>
    %c48_97 = arith.constant 48 : index
    %c0_98 = arith.constant 0 : index
    %391 = vector.load %arg17[%c48_97, %c0_98] : memref<64x64xf32, #tpu.memory_space<vmem>>, vector<8x32xf32>
    tpu.vector_store %arg17[%c48_97, %c0_98], %381 {strides = array<i32>} : memref<64x64xf32, #tpu.memory_space<vmem>>, vector<8x32xf32>,
    %c8_99 = arith.constant 8 : index
    %c32_100 = arith.constant 32 : index
    %392 = vector.load %arg17[%c8_99, %c32_100] : memref<64x64xf32, #tpu.memory_space<vmem>>, vector<8x32xf32>
    tpu.vector_store %arg17[%c8_99, %c32_100], %389 {strides = array<i32>} : memref<64x64xf32, #tpu.memory_space<vmem>>, vector<8x32xf32>,
    %c56_101 = arith.constant 56 : index
    %c0_102 = arith.constant 0 : index
    %393 = vector.load %arg16[%c56_101, %c0_102] : memref<64x192xf32, #tpu.memory_space<vmem>>, vector<8x96xf32>
    %c0_103 = arith.constant 0 : index
    %c96_104 = arith.constant 96 : index
    %394 = vector.load %arg16[%c0_103, %c96_104] : memref<64x192xf32, #tpu.memory_space<vmem>>, vector<8x96xf32>
    %cst_105 = arith.constant dense<0.000000e+00> : vector<8x192xf32>
    %395 = tpu.matmul %390, %7, %cst_105 {dimension_numbers = #tpu.dot_dimension_numbers<[1], [0], [0], [1], [0, 0, 1, 1], [], []>} : vector<8x64xf32>, vector<64x192xf32>, vector<8x192xf32> -> vector<8x192xf32>
    %396 = vector.extract_strided_slice %393 {offsets = [0, 0], sizes = [8, 64], strides = [1, 1]} : vector<8x96xf32> to vector<8x64xf32>
    %397 = vector.extract_strided_slice %395 {offsets = [0, 0], sizes = [8, 64], strides = [1, 1]} : vector<8x192xf32> to vector<8x64xf32>
    %398 = arith.addf %396, %397 : vector<8x64xf32>
    %399 = arith.negf %398 : vector<8x64xf32>
    %400 = math.exp %399 : vector<8x64xf32>
    %cst_106 = arith.constant 1.000000e+00 : f32
    %401 = vector.broadcast %cst_106 : f32 to vector<8x64xf32>
    %402 = arith.addf %401, %400 : vector<8x64xf32>
    %403 = arith.divf %401, %402 : vector<8x64xf32>
    %404 = vector.extract_strided_slice %394 {offsets = [0, 0], sizes = [8, 64], strides = [1, 1]} : vector<8x96xf32> to vector<8x64xf32>
    %405 = vector.extract_strided_slice %395 {offsets = [0, 96], sizes = [8, 64], strides = [1, 1]} : vector<8x192xf32> to vector<8x64xf32>
    %406 = arith.addf %404, %405 : vector<8x64xf32>
    %407 = arith.negf %406 : vector<8x64xf32>
    %408 = math.exp %407 : vector<8x64xf32>
    %cst_107 = arith.constant 1.000000e+00 : f32
    %409 = vector.broadcast %cst_107 : f32 to vector<8x64xf32>
    %410 = arith.addf %409, %408 : vector<8x64xf32>
    %411 = arith.divf %409, %410 : vector<8x64xf32>
    %412 = vector.extract_strided_slice %393 {offsets = [0, 64], sizes = [8, 32], strides = [1, 1]} : vector<8x96xf32> to vector<8x32xf32>
    %413 = vector.extract_strided_slice %403 {offsets = [0, 0], sizes = [8, 32], strides = [1, 1]} : vector<8x64xf32> to vector<8x32xf32>
    %414 = vector.extract_strided_slice %395 {offsets = [0, 64], sizes = [8, 32], strides = [1, 1]} : vector<8x192xf32> to vector<8x32xf32>
    %415 = vector.broadcast %8 : vector<1x32xf32> to vector<8x32xf32>
    %416 = arith.addf %414, %415 : vector<8x32xf32>
    %417 = arith.mulf %413, %416 : vector<8x32xf32>
    %418 = arith.addf %412, %417 : vector<8x32xf32>
    %419 = math.tanh %418 : vector<8x32xf32>
    %420 = vector.extract_strided_slice %394 {offsets = [0, 64], sizes = [8, 32], strides = [1, 1]} : vector<8x96xf32> to vector<8x32xf32>
    %421 = vector.extract_strided_slice %411 {offsets = [0, 0], sizes = [8, 32], strides = [1, 1]} : vector<8x64xf32> to vector<8x32xf32>
    %422 = vector.extract_strided_slice %395 {offsets = [0, 160], sizes = [8, 32], strides = [1, 1]} : vector<8x192xf32> to vector<8x32xf32>
    %423 = vector.broadcast %9 : vector<1x32xf32> to vector<8x32xf32>
    %424 = arith.addf %422, %423 : vector<8x32xf32>
    %425 = arith.mulf %421, %424 : vector<8x32xf32>
    %426 = arith.addf %420, %425 : vector<8x32xf32>
    %427 = math.tanh %426 : vector<8x32xf32>
    %428 = vector.extract_strided_slice %403 {offsets = [0, 32], sizes = [8, 32], strides = [1, 1]} : vector<8x64xf32> to vector<8x32xf32>
    %cst_108 = arith.constant 1.000000e+00 : f32
    %429 = vector.broadcast %cst_108 : f32 to vector<8x32xf32>
    %430 = arith.subf %429, %428 : vector<8x32xf32>
    %431 = arith.mulf %430, %419 : vector<8x32xf32>
    %432 = vector.extract_strided_slice %403 {offsets = [0, 32], sizes = [8, 32], strides = [1, 1]} : vector<8x64xf32> to vector<8x32xf32>
    %433 = vector.extract_strided_slice %390 {offsets = [0, 0], sizes = [8, 32], strides = [1, 1]} : vector<8x64xf32> to vector<8x32xf32>
    %434 = arith.mulf %432, %433 : vector<8x32xf32>
    %435 = arith.addf %431, %434 : vector<8x32xf32>
    %436 = vector.extract_strided_slice %411 {offsets = [0, 32], sizes = [8, 32], strides = [1, 1]} : vector<8x64xf32> to vector<8x32xf32>
    %cst_109 = arith.constant 1.000000e+00 : f32
    %437 = vector.broadcast %cst_109 : f32 to vector<8x32xf32>
    %438 = arith.subf %437, %436 : vector<8x32xf32>
    %439 = arith.mulf %438, %427 : vector<8x32xf32>
    %440 = vector.extract_strided_slice %411 {offsets = [0, 32], sizes = [8, 32], strides = [1, 1]} : vector<8x64xf32> to vector<8x32xf32>
    %441 = vector.extract_strided_slice %390 {offsets = [0, 32], sizes = [8, 32], strides = [1, 1]} : vector<8x64xf32> to vector<8x32xf32>
    %442 = arith.mulf %440, %441 : vector<8x32xf32>
    %443 = arith.addf %439, %442 : vector<8x32xf32>
    %c56_110 = arith.constant 56 : index
    %c0_111 = arith.constant 0 : index
    %444 = vector.load %arg17[%c56_110, %c0_111] : memref<64x64xf32, #tpu.memory_space<vmem>>, vector<8x32xf32>
    tpu.vector_store %arg17[%c56_110, %c0_111], %435 {strides = array<i32>} : memref<64x64xf32, #tpu.memory_space<vmem>>, vector<8x32xf32>,
    %c0_112 = arith.constant 0 : index
    %c32_113 = arith.constant 32 : index
    %445 = vector.load %arg17[%c0_112, %c32_113] : memref<64x64xf32, #tpu.memory_space<vmem>>, vector<8x32xf32>
    tpu.vector_store %arg17[%c0_112, %c32_113], %443 {strides = array<i32>} : memref<64x64xf32, #tpu.memory_space<vmem>>, vector<8x32xf32>,
    %c0_114 = arith.constant 0 : index
    %c0_115 = arith.constant 0 : index
    %446 = vector.load %arg17[%c0_114, %c0_115] : memref<64x64xf32, #tpu.memory_space<vmem>>, vector<64x64xf32>
    %c0_116 = arith.constant 0 : index
    %c0_117 = arith.constant 0 : index
    %447 = vector.load %arg7[%c0_116, %c0_117] : memref<64x64xf32, #tpu.memory_space<vmem>>, vector<64x64xf32>
    %cst_118 = arith.constant dense<0.000000e+00> : vector<64x64xf32>
    %448 = tpu.matmul %446, %447, %cst_118 {dimension_numbers = #tpu.dot_dimension_numbers<[1], [0], [0], [1], [0, 0, 1, 1], [], []>} : vector<64x64xf32>, vector<64x64xf32>, vector<64x64xf32> -> vector<64x64xf32>
    %c0_119 = arith.constant 0 : index
    %c0_120 = arith.constant 0 : index
    %449 = vector.load %arg8[%c0_119, %c0_120] : memref<1x64xf32, #tpu.memory_space<vmem>>, vector<1x64xf32>
    %450 = vector.broadcast %449 : vector<1x64xf32> to vector<64x64xf32>
    %451 = arith.addf %448, %450 : vector<64x64xf32>
    %452 = math.tanh %451 : vector<64x64xf32>
    %c0_121 = arith.constant 0 : index
    %c0_122 = arith.constant 0 : index
    %453 = vector.load %arg9[%c0_121, %c0_122] : memref<1x64xf32, #tpu.memory_space<vmem>>, vector<1x64xf32>
    %454 = vector.broadcast %453 : vector<1x64xf32> to vector<64x64xf32>
    %455 = arith.mulf %452, %454 : vector<64x64xf32>
    %cst_123 = arith.constant dense<0.000000e+00> : vector<64xf32>
    %456 = vector.multi_reduction <add>, %455, %cst_123 [1] : vector<64x64xf32> to vector<64xf32>
    %457 = vector.shape_cast %456 : vector<64xf32> to vector<64x1xf32>
    %c0_124 = arith.constant 0 : index
    %c0_125 = arith.constant 0 : index
    %458 = vector.load %arg12[%c0_124, %c0_125] : memref<8x64xf32, #tpu.memory_space<vmem>>, vector<8x64xf32>
    %c0_126 = arith.constant 0 : index
    %c0_127 = arith.constant 0 : index
    %459 = vector.load %arg13[%c0_126, %c0_127] : memref<64x8xf32, #tpu.memory_space<vmem>>, vector<64x8xf32>
    %460 = vector.broadcast %457 : vector<64x1xf32> to vector<64x8xf32>
    %461 = arith.mulf %460, %459 : vector<64x8xf32>
    %cst_128 = arith.constant dense<0.000000e+00> : vector<8x8xf32>
    %462 = tpu.matmul %458, %461, %cst_128 {dimension_numbers = #tpu.dot_dimension_numbers<[1], [0], [0], [1], [0, 0, 1, 1], [], []>} : vector<8x64xf32>, vector<64x8xf32>, vector<8x8xf32> -> vector<8x8xf32>
    %cst_129 = arith.constant dense<0xFF800000> : vector<8xf32>
    %463 = vector.multi_reduction <maximumf>, %462, %cst_129 [1] : vector<8x8xf32> to vector<8xf32>
    %464 = vector.shape_cast %463 : vector<8xf32> to vector<8x1xf32>
    %465 = vector.broadcast %464 : vector<8x1xf32> to vector<8x8xf32>
    %466 = arith.subf %462, %465 : vector<8x8xf32>
    %467 = math.exp %466 : vector<8x8xf32>
    %cst_130 = arith.constant dense<0.000000e+00> : vector<8xf32>
    %468 = vector.multi_reduction <add>, %467, %cst_130 [1] : vector<8x8xf32> to vector<8xf32>
    %469 = vector.shape_cast %468 : vector<8xf32> to vector<8x1xf32>
    %470 = vector.broadcast %469 : vector<8x1xf32> to vector<8x8xf32>
    %471 = arith.divf %467, %470 : vector<8x8xf32>
    %c0_131 = arith.constant 0 : index
    %c0_132 = arith.constant 0 : index
    %472 = vector.load %arg12[%c0_131, %c0_132] : memref<8x64xf32, #tpu.memory_space<vmem>>, vector<8x64xf32>
    %c0_133 = arith.constant 0 : index
    %c0_134 = arith.constant 0 : index
    %473 = vector.load %arg14[%c0_133, %c0_134] : memref<8x64xf32, #tpu.memory_space<vmem>>, vector<8x64xf32>
    %cst_135 = arith.constant dense<0.000000e+00> : vector<8x64xf32>
    %474 = tpu.matmul %471, %473, %cst_135 {dimension_numbers = #tpu.dot_dimension_numbers<[1], [0], [0], [1], [0, 0, 1, 1], [], []>} : vector<8x8xf32>, vector<8x64xf32>, vector<8x64xf32> -> vector<8x64xf32>
    %475 = arith.mulf %472, %474 : vector<8x64xf32>
    %cst_136 = arith.constant dense<0.000000e+00> : vector<8x64xf32>
    %476 = tpu.matmul %475, %446, %cst_136 {dimension_numbers = #tpu.dot_dimension_numbers<[1], [0], [0], [1], [0, 0, 1, 1], [], []>} : vector<8x64xf32>, vector<64x64xf32>, vector<8x64xf32> -> vector<8x64xf32>
    %c0_137 = arith.constant 0 : index
    %c0_138 = arith.constant 0 : index
    %477 = vector.load %arg10[%c0_137, %c0_138] : memref<64x5xf32, #tpu.memory_space<vmem>>, vector<64x5xf32>
    %cst_139 = arith.constant dense<0.000000e+00> : vector<8x5xf32>
    %478 = tpu.matmul %476, %477, %cst_139 {dimension_numbers = #tpu.dot_dimension_numbers<[1], [0], [0], [1], [0, 0, 1, 1], [], []>} : vector<8x64xf32>, vector<64x5xf32>, vector<8x5xf32> -> vector<8x5xf32>
    %c0_140 = arith.constant 0 : index
    %c0_141 = arith.constant 0 : index
    %479 = vector.load %arg11[%c0_140, %c0_141] : memref<1x5xf32, #tpu.memory_space<vmem>>, vector<1x5xf32>
    %480 = vector.broadcast %479 : vector<1x5xf32> to vector<8x5xf32>
    %481 = arith.addf %478, %480 : vector<8x5xf32>
    %cst_142 = arith.constant dense<0xFF800000> : vector<8xf32>
    %482 = vector.multi_reduction <maximumf>, %481, %cst_142 [1] : vector<8x5xf32> to vector<8xf32>
    %483 = vector.shape_cast %482 : vector<8xf32> to vector<8x1xf32>
    %484 = vector.broadcast %483 : vector<8x1xf32> to vector<8x5xf32>
    %485 = arith.subf %481, %484 : vector<8x5xf32>
    %486 = math.exp %485 : vector<8x5xf32>
    %cst_143 = arith.constant dense<0.000000e+00> : vector<8xf32>
    %487 = vector.multi_reduction <add>, %486, %cst_143 [1] : vector<8x5xf32> to vector<8xf32>
    %488 = vector.shape_cast %487 : vector<8xf32> to vector<8x1xf32>
    %489 = math.log %488 : vector<8x1xf32>
    %490 = arith.addf %483, %489 : vector<8x1xf32>
    %491 = vector.broadcast %490 : vector<8x1xf32> to vector<8x5xf32>
    %492 = arith.subf %481, %491 : vector<8x5xf32>
    %cst_144 = arith.constant 0.000000e+00 : f32
    %493 = vector.broadcast %cst_144 : f32 to vector<8x51xf32>
    %494 = tpu.concatenate %492, %471, %435, %443, %493 in 1 : vector<8x5xf32>, vector<8x8xf32>, vector<8x32xf32>, vector<8x32xf32>, vector<8x51xf32> -> vector<8x128xf32>
    %c0_145 = arith.constant 0 : index
    %c0_146 = arith.constant 0 : index
    %495 = vector.load %arg15[%c0_145, %c0_146] : memref<8x128xf32, #tpu.memory_space<vmem>>, vector<8x128xf32>
    tpu.vector_store %arg15[%c0_145, %c0_146], %494 {strides = array<i32>} : memref<8x128xf32, #tpu.memory_space<vmem>>, vector<8x128xf32>,
    return
  }
  func.func @transform_0(%arg0: i32) -> (i32, i32) {
    %c0_i32 = arith.constant 0 : i32
    %c0_i32_0 = arith.constant 0 : i32
    return %arg0, %c0_i32 : i32, i32
  }
  func.func @transform_1(%arg0: i32) -> (i32, i32, i32) {
    %c0_i32 = arith.constant 0 : i32
    %c0_i32_0 = arith.constant 0 : i32
    %c0_i32_1 = arith.constant 0 : i32
    return %c0_i32, %arg0, %c0_i32_0 : i32, i32, i32
  }
  func.func @transform_2(%arg0: i32) -> (i32, i32) {
    %c0_i32 = arith.constant 0 : i32
    %c0_i32_0 = arith.constant 0 : i32
    %c0_i32_1 = arith.constant 0 : i32
    return %c0_i32, %c0_i32_0 : i32, i32
  }
  func.func @transform_3(%arg0: i32) -> (i32, i32) {
    %c0_i32 = arith.constant 0 : i32
    %c0_i32_0 = arith.constant 0 : i32
    %c0_i32_1 = arith.constant 0 : i32
    return %c0_i32, %c0_i32_0 : i32, i32
  }
  func.func @transform_4(%arg0: i32) -> (i32, i32) {
    %c0_i32 = arith.constant 0 : i32
    %c0_i32_0 = arith.constant 0 : i32
    %c0_i32_1 = arith.constant 0 : i32
    return %c0_i32, %c0_i32_0 : i32, i32
  }
  func.func @transform_5(%arg0: i32) -> (i32, i32) {
    %c0_i32 = arith.constant 0 : i32
    %c0_i32_0 = arith.constant 0 : i32
    %c0_i32_1 = arith.constant 0 : i32
    return %c0_i32, %c0_i32_0 : i32, i32
  }
  func.func @transform_6(%arg0: i32) -> (i32, i32) {
    %c0_i32 = arith.constant 0 : i32
    %c0_i32_0 = arith.constant 0 : i32
    %c0_i32_1 = arith.constant 0 : i32
    return %c0_i32, %c0_i32_0 : i32, i32
  }
  func.func @transform_7(%arg0: i32) -> (i32, i32) {
    %c0_i32 = arith.constant 0 : i32
    %c0_i32_0 = arith.constant 0 : i32
    %c0_i32_1 = arith.constant 0 : i32
    return %c0_i32, %c0_i32_0 : i32, i32
  }
  func.func @transform_8(%arg0: i32) -> (i32, i32) {
    %c0_i32 = arith.constant 0 : i32
    %c0_i32_0 = arith.constant 0 : i32
    %c0_i32_1 = arith.constant 0 : i32
    return %c0_i32, %c0_i32_0 : i32, i32
  }
  func.func @transform_9(%arg0: i32) -> (i32, i32) {
    %c0_i32 = arith.constant 0 : i32
    %c0_i32_0 = arith.constant 0 : i32
    %c0_i32_1 = arith.constant 0 : i32
    return %c0_i32, %c0_i32_0 : i32, i32
  }
  func.func @transform_10(%arg0: i32) -> (i32, i32) {
    %c0_i32 = arith.constant 0 : i32
    %c0_i32_0 = arith.constant 0 : i32
    %c0_i32_1 = arith.constant 0 : i32
    return %c0_i32, %c0_i32_0 : i32, i32
  }
  func.func @transform_11(%arg0: i32) -> (i32, i32) {
    %c0_i32 = arith.constant 0 : i32
    %c0_i32_0 = arith.constant 0 : i32
    %c0_i32_1 = arith.constant 0 : i32
    return %c0_i32, %c0_i32_0 : i32, i32
  }
  func.func @transform_12(%arg0: i32) -> (i32, i32) {
    %c0_i32 = arith.constant 0 : i32
    %c0_i32_0 = arith.constant 0 : i32
    %c0_i32_1 = arith.constant 0 : i32
    return %c0_i32, %c0_i32_0 : i32, i32
  }
  func.func @transform_13(%arg0: i32) -> (i32, i32) {
    %c0_i32 = arith.constant 0 : i32
    %c0_i32_0 = arith.constant 0 : i32
    %c0_i32_1 = arith.constant 0 : i32
    return %c0_i32, %c0_i32_0 : i32, i32
  }
  func.func @transform_14(%arg0: i32) -> (i32, i32) {
    %c0_i32 = arith.constant 0 : i32
    %c0_i32_0 = arith.constant 0 : i32
    return %arg0, %c0_i32 : i32, i32
  }
}

</mosaic_0001>

<bundles_post_ra>
// kernel: tpu_custom_call.1
= control target key start
LH: loop header
LB: loop body
LE: loop exit
PB: predicated region body
PF: predicated region fallthrough
CT: control target
= control target key end

     0   :  { %19 = vsyncpa [#allocation5], 0  ;;  %s2982_s0 = inlined_call_operand.vmem [shape: f32[64,32], index: 0, kind: input, shape index: {}]   ;;  %s2983_s1 = inlined_call_operand.vmem [shape: f32[2,8,32], index: 1, kind: input, shape index: {}]   ;;  %s2984_s2 = inlined_call_operand.vmem [shape: f32[32,192], index: 2, kind: input, shape index: {}]   ;;  %s2985_s3 = inlined_call_operand.vmem [shape: f32[1,192], index: 3, kind: input, shape index: {}]   ;;  %s2986_s4 = inlined_call_operand.vmem [shape: f32[64,192], index: 4, kind: input, shape index: {}]   ;;  %s2987_s5 = inlined_call_operand.hbm [shape: f32[1,64], index: 5, kind: input, shape index: {}]   ;;  %s2988_s6 = inlined_call_operand.hbm [shape: f32[64,64], index: 6, kind: input, shape index: {}]   ;;  %s2989_s7 = inlined_call_operand.vmem [shape: f32[1,64], index: 7, kind: input, shape index: {}]   ;;  %s2990_s8 = inlined_call_operand.vmem [shape: f32[1,64], index: 8, kind: input, shape index: {}]   ;;  %s2991_s9 = inlined_call_operand.vmem [shape: f32[64,5], index: 9, kind: input, shape index: {}]   ;;  %s2992_s10 = inlined_call_operand.vmem [shape: f32[1,5], index: 10, kind: input, shape index: {}]   ;;  %s2993_s11 = inlined_call_operand.vmem [shape: f32[8,64], index: 11, kind: input, shape index: {}]   ;;  %s2994_s12 = inlined_call_operand.vmem [shape: f32[64,8], index: 12, kind: input, shape index: {}]   ;;  %s2995_s13 = inlined_call_operand.vmem [shape: f32[8,64], index: 13, kind: input, shape index: {}]   ;;  %s2996_s14 = inlined_call_operand.hbm [shape: f32[8,128], index: 14, kind: output, shape index: {}]  }
   0x1   :  { %20 = vsyncpa [#allocation8], 0 }
   0x2   :  { %21 = vsyncpa [#allocation6], 0  ;;  %s37_s15 = sshll.u32 %s2987_s5, 4  ;;  %s2217_s16 = smov [#allocation4]   ;;  %s38_s15 = int_to_ptr.hbm [resolvable:$true] %s37_s15 }
   0x3   :  { %s39_s17 = sshll.u32 %s2217_s16, 4  ;;  %s47_s20 = sshll.u32 %s2988_s6, 4  ;;  %s40_s17 = int_to_ptr.vmem [resolvable:$true] %s39_s17  ;;  %s48_s20 = int_to_ptr.hbm [resolvable:$true] %s47_s20 }
   0x4   :  { %42 = dma.hbm_to_vmem [thread:$0]  %s38_s15, 16, %s40_s17, [#allocation5]  }
   0x5   :  { %s2218_s21 = smov [#allocation7]   ;;  %s2219_s23 = smov 128  }
   0x6   :  { %s49_s22 = sshll.u32 %s2218_s21, 4  ;;  %s2220_s24 = smov 8   ;;  %s50_s22 = int_to_ptr.vmem [resolvable:$true] %s49_s22 }
   0x7   :  { %55 = dma.hbm_to_vmem [thread:$0]  %s48_s20, 1024, %s50_s22, [#allocation8], %s2219_s23, %s2219_s23, %s2220_s24  }
   0x8   :  { %2211 = dma.done.wait [#allocation5], 16  }
   0x9   :  { %2212 = vsyncadd [#allocation5], 4294967280 }
   0xa   :  { %2213 = dma.done.wait [#allocation8], 1024  }
   0xb   :  { %2214 = vsyncadd [#allocation8], 4294966272  ;;  %v1901_v0 = vld [vmem:[%s2983_s1 + $0x8] sm:$0xff]  ;;  %v93_v1 = vld [vmem:[%s2984_s2 + $0x38] sm:$0xff]  ;;  %s2221_s29 = smov 32   ;;  %vm100_vm0 = vcmask 261120  }
   0xc   :  { %v91_v2 = vld [vmem:[%s2984_s2 + $0x28] sm:$0xff]  ;;  %245 = vrot.lane.b32.xlu0 %v1901_v0, %s2221_s29  ;;  %178 = vmatpush.msra.mxu1 %v93_v1  ;;  %v89_v3 = vld [vmem:[%s2984_s2 + $0x18] sm:$0xff]  ;;  %v92_v4 = vld [vmem:[%s2984_s2 + $0x30] sm:$0xff]  ;;  %s2222_s19 = smov 64   ;;  %vm208_vm1 = vcmask 523264   ;;  %vm417_vm14 = vcmask 523520  }
   0xd   :  { %1954 = vmatpush.msra.mxu2 %v92_v4  ;;  %v90_v5 = vld [vmem:[%s2984_s2 + $0x20] sm:$0xff]  ;;  %v87_v6 = vld [vmem:[%s2984_s2 + $0x8] sm:$0xff]  ;;  %v88_v8 = vld [vmem:[%s2984_s2 + $0x10] sm:$0xff]  ;;  %1955 = vmatpush.msra.mxu3 %v92_v4  ;;  %s2225_s26 = smov 109   ;;  %s1874_s30 = sshll.u32 %s2996_s14, 4  ;;  %s1875_s30 = int_to_ptr.hbm [resolvable:$true] %s1874_s30 }
   0xe   :  { %179 = vmatpush.msra.mxu1 %v91_v2  ;;  %v78_v7 = vld [vmem:[%s2982_s0] sm:$0xff]  ;;  %137 = vmatpush.msra.mxu0 %v92_v4  ;;  %v2344_v10 = vld [vmem:[%s2986_s4 + $0x70] sm:$0xff]  ;;  %v79_v14 = vld [vmem:[%s2982_s0 + $0x8] sm:$0xff] }
   0xf   :  { %1956 = vmatpush.msra.mxu2 %v90_v5  ;;  %v86_v9 = vld [vmem:[%s2984_s2] sm:$0xff]  ;;  %1957 = vmatpush.msra.mxu3 %v90_v5  ;;  %v80_v11 = vld [vmem:[%s2982_s0 + $0x10] sm:$0xff]  ;;  %v81_v18 = vld [vmem:[%s2982_s0 + $0x18] sm:$0xff] }
  0x10   :  { %180 = vmatpush.msra.mxu1 %v89_v3  ;;  %138 = vmatpush.msra.mxu0 %v90_v5  ;;  %v2353_v12 = vld [vmem:[%s2986_s4 + $0x60] sm:$0xff]  ;;  %v2359_v13 = vld [vmem:[%s2986_s4 + $0x50] sm:$0xff]  ;;  %v2394_v19 = vld [vmem:[%s2986_s4 + $0x78] sm:$0xff] }
  0x11   :  { %1958 = vmatpush.msra.mxu2 %v88_v8  ;;  %1959 = vmatpush.msra.mxu3 %v88_v8  ;;  %v2373_v15 = vld [vmem:[%s2986_s4 + $0x40] sm:$0xff]  ;;  %v2378_v16 = vld [vmem:[%s2982_s0 + $0x30] sm:$0xff]  ;;  %v2399_v20 = vld [vmem:[%s2986_s4 + $0x68] sm:$0xff] }
  0x12   :  { %181 = vmatpush.msra.mxu1 %v87_v6  ;;  %139 = vmatpush.msra.mxu0 %v88_v8  ;;  %v2383_v17 = vld [vmem:[%s2986_s4 + $0x30] sm:$0xff]  ;;  %v2414_v21 = vld [vmem:[%s2986_s4 + $0x20] sm:$0xff]  ;;  %v2419_v22 = vld [vmem:[%s2986_s4 + $0x58] sm:$0xff] }
  0x13   :  { %1893 = vmatmul.msk.f32.vlgmr.msra.gmra.mxu1 %vm100_vm0, %v78_v7  ;;  %1960 = vmatpush.msra.mxu2 %v86_v9  ;;  %v85_v23 = vld [vmem:[%s2982_s0 + $0x38] sm:$0xff]  ;;  %v82_v24 = vld [vmem:[%s2982_s0 + $0x20] sm:$0xff]  ;;  %v2432_v25 = vld [vmem:[%s2986_s4 + $0x48] sm:$0xff] }
  0x14   :  { %1887 = vmatmul.msk.f32.vlgmr.msra.gmra.mxu2 %vm100_vm0, %v80_v11  ;;  %1961 = vmatpush.msra.mxu3 %v86_v9  ;;  %v2437_v26 = vld [vmem:[%s2986_s4 + $0x10] sm:$0xff]  ;;  %v2444_v27 = vld [vmem:[%s2986_s4 + $0x38] sm:$0xff]  ;;  %v2451_v28 = vld [vmem:[%s2986_s4 + $0x28] sm:$0xff] }
  0x15   :  { %263 = vmatpush.msrb.mxu2 %v2344_v10  ;;  %140 = vmatpush.msra.mxu0 %v86_v9  ;;  %v2463_v29 = vld [vmem:[%s2986_s4] sm:$0xff]  ;;  %v2468_v30 = vld [vmem:[%s2986_s4 + $0x18] sm:$0xff]  ;;  %v83_v31 = vld [vmem:[%s2982_s0 + $0x28] sm:$0xff] }
  0x16   :  { %1885 = vmatmul.msk.f32.vlgmr.msra.gmra.mxu0 %vm100_vm0, %v78_v7  ;;  %1891 = vmatmul.msk.f32.vlgmr.msra.gmra.mxu3 %vm100_vm0, %v2378_v16  ;;  %v2505_v32 = vld [vmem:[%s2986_s4 + $0x8] sm:$0xff]  ;;  %v2509_v33 = vld [vmem:[#allocation4] ss:$0 sm:$0xff] }
  0x17   :  { %264 = vmatpush.msrb.mxu2 %v2353_v12  ;;  %922 = vmatpush.msrb.mxu0 %v2344_v10  ;;  %v241_v34 = vld [vmem:[%s2983_s1] sm:$0xff] }
  0x18   :  { %283 = vmatpush.msrb.mxu3 %v2394_v19  ;;  %942 = vmatpush.msrb.mxu1 %v2394_v19  ;;  %v94_v37 = vld [vmem:[%s2985_s3] sm:$0x3]  ;;  %s2223_s3 = smov 96  }
  0x19   :  { %265 = vmatpush.msrb.mxu2 %v2359_v13  ;;  %923 = vmatpush.msrb.mxu0 %v2353_v12  ;;  %v97_v38 = vperm.slane %v94_v37, 1  ;;  %v2559_v41 = vperm.slane %v94_v37, 0 }
  0x1a   :  { %284 = vmatpush.msrb.mxu3 %v2399_v20  ;;  %943 = vmatpush.msrb.mxu1 %v2399_v20 }
  0x1b   :  { %1894 = vmatmul.msk.f32.gmra.mxu1 %vm100_vm0, %v79_v14  ;;  %266 = vmatpush.msrb.mxu2 %v2373_v15 }
  0x1c   :  { %1888 = vmatmul.msk.f32.gmra.mxu2 %vm100_vm0, %v81_v18  ;;  %924 = vmatpush.msrb.mxu0 %v2359_v13 }
  0x1d   :  { %267 = vmatpush.msrb.mxu2 %v2383_v17  ;;  %285 = vmatpush.msrb.mxu3 %v2419_v22 }
  0x1e   :  { %1886 = vmatmul.msk.f32.gmra.mxu0 %vm100_vm0, %v79_v14  ;;  %1892 = vmatmul.msk.f32.gmra.mxu3 %vm100_vm0, %v85_v23 }
  0x1f   :  { %925 = vmatpush.msrb.mxu0 %v2373_v15  ;;  %268 = vmatpush.msrb.mxu2 %v2414_v21 }
  0x20   :  { %286 = vmatpush.msrb.mxu3 %v2432_v25  ;;  %944 = vmatpush.msrb.mxu1 %v2419_v22 }
  0x21   :  { %269 = vmatpush.msrb.mxu2 %v2437_v26  ;;  %926 = vmatpush.msrb.mxu0 %v2383_v17 }
  0x22   :  { %287 = vmatpush.msrb.mxu3 %v2444_v27  ;;  %945 = vmatpush.msrb.mxu1 %v2432_v25 }
  0x23   :  { %1895 = vmatmul.msk.f32.gmra.mxu1 %vm100_vm0, %v80_v11  ;;  %927 = vmatpush.msrb.mxu0 %v2414_v21 }
  0x24   :  { %1889 = vmatmul.msk.f32.gmra.mxu2 %vm100_vm0, %v82_v24  ;;  %288 = vmatpush.msrb.mxu3 %v2451_v28 }
  0x25   :  { %928 = vmatpush.msrb.mxu0 %v2437_v26  ;;  %270 = vmatpush.msrb.mxu2 %v2463_v29 }
  0x26   :  { %289 = vmatpush.msrb.mxu3 %v2468_v30  ;;  %946 = vmatpush.msrb.mxu1 %v2444_v27 }
  0x27   :  { %433 = vmatpush.msra.mxu2 %v2344_v10  ;;  %929 = vmatpush.msrb.mxu0 %v2463_v29 }
  0x28   :  { %947 = vmatpush.msrb.mxu1 %v2451_v28  ;;  %290 = vmatpush.msrb.mxu3 %v2505_v32 }
  0x29   :  { %1248 = vmatpush.msra.mxu0 %v2344_v10  ;;  %434 = vmatpush.msra.mxu2 %v2353_v12 }
  0x2a   :  { %948 = vmatpush.msrb.mxu1 %v2468_v30  ;;  %453 = vmatpush.msra.mxu3 %v2394_v19 }
  0x2b   :  { %1896 = vmatmul.msk.f32.gmra.mxu1 %vm100_vm0, %v81_v18  ;;  %1249 = vmatpush.msra.mxu0 %v2353_v12 }
  0x2c   :  { %1890 = vmatmul.msk.f32.gmra.mxu2 %vm100_vm0, %v83_v31  ;;  %949 = vmatpush.msrb.mxu1 %v2505_v32 }
  0x2d   :  { %435 = vmatpush.msra.mxu2 %v2359_v13  ;;  %1250 = vmatpush.msra.mxu0 %v2359_v13 }
  0x2e   :  { %1268 = vmatpush.msra.mxu1 %v2394_v19  ;;  %357 = vrot.lane.b32.xlu0 %v2509_v33, %s2222_s19 }
  0x2f   :  { %436 = vmatpush.msra.mxu2 %v2373_v15  ;;  %1251 = vmatpush.msra.mxu0 %v2373_v15 }
  0x30   :  { %454 = vmatpush.msra.mxu3 %v2399_v20  ;;  %1269 = vmatpush.msra.mxu1 %v2399_v20 }
  0x31   :  { %437 = vmatpush.msra.mxu2 %v2383_v17  ;;  %1252 = vmatpush.msra.mxu0 %v2383_v17 }
  0x32   :  { %455 = vmatpush.msra.mxu3 %v2419_v22  ;;  %1270 = vmatpush.msra.mxu1 %v2419_v22 }
  0x33   :  { %1897 = vmatmul.msk.f32.gmra.mxu1 %vm100_vm0, %v82_v24  ;;  %438 = vmatpush.msra.mxu2 %v2414_v21 }
  0x34   :  { %1253 = vmatpush.msra.mxu0 %v2414_v21  ;;  %456 = vmatpush.msra.mxu3 %v2432_v25 }
  0x35   :  { %439 = vmatpush.msra.mxu2 %v2437_v26  ;;  %1271 = vmatpush.msra.mxu1 %v2432_v25 }
  0x36   :  { %1254 = vmatpush.msra.mxu0 %v2437_v26  ;;  %457 = vmatpush.msra.mxu3 %v2444_v27 }
  0x37   :  { %440 = vmatpush.msra.mxu2 %v2463_v29  ;;  %1272 = vmatpush.msra.mxu1 %v2444_v27 }
  0x38   :  { %1255 = vmatpush.msra.mxu0 %v2463_v29  ;;  %458 = vmatpush.msra.mxu3 %v2451_v28 }
  0x39   :  { %1273 = vmatpush.msra.mxu1 %v2451_v28 }
  0x3a   :  { %459 = vmatpush.msra.mxu3 %v2468_v30 }
  0x3b   :  { %1898 = vmatmul.msk.f32.gmra.mxu1 %vm100_vm0, %v83_v31 }
  0x3c   :  { %1274 = vmatpush.msra.mxu1 %v2468_v30  ;;  %460 = vmatpush.msra.mxu3 %v2505_v32 }
  0x3e   :  { %1275 = vmatpush.msra.mxu1 %v2505_v32 }
  0x43   :  { %1899 = vmatmul.msk.f32.gmra.mxu1 %vm100_vm0, %v2378_v16 }
  0x4b   :  { %1900 = vmatmul.msk.f32.gmra.mxu1 %vm100_vm0, %v85_v23 }
  0x7e   :  { %v246_v35 = vpop.permute.xlu0 %245 }
  0x7f   :  { %v2533_v36 = vsel %vm100_vm0, %v241_v34, %v246_v35 }
  0x80   :  { %1902 = vmatmul.msk.f32.vlgmr.msrb.gmra.mxu2 %vm208_vm1, %v2533_v36  ;;  %1903 = vmatmul.msk.f32.vlgmr.msrb.gmra.mxu3 %vm208_vm1, %v2533_v36 }
  0x81   :  { %596 = vmatpush.msrb.mxu2 %v2344_v10  ;;  %616 = vmatpush.msrb.mxu3 %v2394_v19 }
  0x83   :  { %597 = vmatpush.msrb.mxu2 %v2353_v12  ;;  %617 = vmatpush.msrb.mxu3 %v2399_v20 }
  0x85   :  { %598 = vmatpush.msrb.mxu2 %v2359_v13  ;;  %618 = vmatpush.msrb.mxu3 %v2419_v22 }
  0x87   :  { %599 = vmatpush.msrb.mxu2 %v2373_v15  ;;  %619 = vmatpush.msrb.mxu3 %v2432_v25 }
  0x89   :  { %600 = vmatpush.msrb.mxu2 %v2383_v17  ;;  %620 = vmatpush.msrb.mxu3 %v2444_v27 }
  0x8b   :  { %601 = vmatpush.msrb.mxu2 %v2414_v21  ;;  %621 = vmatpush.msrb.mxu3 %v2451_v28 }
  0x8d   :  { %602 = vmatpush.msrb.mxu2 %v2437_v26  ;;  %622 = vmatpush.msrb.mxu3 %v2468_v30 }
  0x8f   :  { %603 = vmatpush.msrb.mxu2 %v2463_v29  ;;  %623 = vmatpush.msrb.mxu3 %v2505_v32 }
  0x90   :  { %v183_v39 = vpop.f32.mrf.mxu1 }
  0x91   :  { %v184_v40 = vadd.f32 %v183_v39, %v97_v38 }
  0x93   :  { %209 = vst.msk [vmem:[#allocation2 + $0x8] sm:$0xff] %vm208_vm1, %v184_v40  ;;  %v142_v52 = vpop.f32.mrf.mxu0 }
  0x94   :  { %v2576_v53 = vadd.f32 %v142_v52, %v2559_v41 }
  0x96   :  { %207 = vst [vmem:[#allocation2] sm:$0xff] %v2576_v53 }
  0x97   :  { %v148_v43 = vpop.f32.mrf.mxu2 }
  0x98   :  { %v186_v42 = vpop.f32.mrf.mxu1  ;;  %v2562_v45 = vadd.f32 %v148_v43, %v2559_v41 }
  0x99   :  { %v187_v44 = vadd.f32 %v186_v42, %v97_v38  ;;  %v160_v46 = vpop.f32.mrf.mxu3 }
  0x9a   :  { %212 = vst [vmem:[#allocation2 + $0x20] sm:$0xff] %v2562_v45  ;;  %v2567_v49 = vadd.f32 %v160_v46, %v2559_v41 }
  0x9b   :  { %211 = vst.msk [vmem:[#allocation2 + $0x18] sm:$0xff] %vm208_vm1, %v187_v44 }
  0x9c   :  { %220 = vst [vmem:[#allocation2 + $0x60] sm:$0xff] %v2567_v49 }
  0x9f   :  { %v151_v48 = vpop.f32.mrf.mxu2 }
  0xa0   :  { %v189_v47 = vpop.f32.mrf.mxu1  ;;  %v2570_v51 = vadd.f32 %v151_v48, %v2559_v41  ;;  %v2593_v6 = vpop.permute.xlu0 %357 }
  0xa1   :  { %v190_v50 = vadd.f32 %v189_v47, %v97_v38  ;;  %v163_v58 = vpop.f32.mrf.mxu3 }
  0xa2   :  { %214 = vst [vmem:[#allocation2 + $0x30] sm:$0xff] %v2570_v51  ;;  %v164_v59 = vadd.f32 %v163_v58, %v2559_v41 }
  0xa3   :  { %213 = vst.msk [vmem:[#allocation2 + $0x28] sm:$0xff] %vm208_vm1, %v190_v50 }
  0xa4   :  { %222 = vst [vmem:[#allocation2 + $0x70] sm:$0xff] %v164_v59 }
  0xa7   :  { %v154_v55 = vpop.f32.mrf.mxu2 }
  0xa8   :  { %v192_v54 = vpop.f32.mrf.mxu1  ;;  %v2580_v57 = vadd.f32 %v154_v55, %v2559_v41 }
  0xa9   :  { %v193_v56 = vadd.f32 %v192_v54, %v97_v38 }
  0xaa   :  { %216 = vst [vmem:[#allocation2 + $0x40] sm:$0xff] %v2580_v57 }
  0xab   :  { %215 = vst.msk [vmem:[#allocation2 + $0x38] sm:$0xff] %vm208_vm1, %v193_v56 }
  0xaf   :  { %v157_v61 = vpop.f32.mrf.mxu2 }
  0xb0   :  { %v195_v60 = vpop.f32.mrf.mxu1  ;;  %v2586_v63 = vadd.f32 %v157_v61, %v2559_v41 }
  0xb1   :  { %v196_v62 = vadd.f32 %v195_v60, %v97_v38 }
  0xb2   :  { %218 = vst [vmem:[#allocation2 + $0x50] sm:$0xff] %v2586_v63 }
  0xb3   :  { %217 = vst.msk [vmem:[#allocation2 + $0x48] sm:$0xff] %vm208_vm1, %v196_v62 }
  0xb8   :  { %v198_v0 = vpop.f32.mrf.mxu1 }
  0xb9   :  { %v199_v1 = vadd.f32 %v198_v0, %v97_v38 }
  0xbb   :  { %219 = vst.msk [vmem:[#allocation2 + $0x58] sm:$0xff] %vm208_vm1, %v199_v1 }
  0xc0   :  { %v201_v2 = vpop.f32.mrf.mxu1 }
  0xc1   :  { %v202_v3 = vadd.f32 %v201_v2, %v97_v38 }
  0xc3   :  { %221 = vst.msk [vmem:[#allocation2 + $0x68] sm:$0xff] %vm208_vm1, %v202_v3 }
  0xc8   :  { %v204_v4 = vpop.f32.mrf.mxu1 }
  0xc9   :  { %v205_v5 = vadd.f32 %v204_v4, %v97_v38 }
  0xcb   :  { %223 = vst.msk [vmem:[#allocation2 + $0x78] sm:$0xff] %vm208_vm1, %v205_v5 }
 0x103   :  { %v272_v7 = vpop.f32.mrf.mxu2  ;;  %v2597_v9 = vpop.f32.mrf.mxu3 }
 0x104   :  { %v360_v8 = vadd.f32 %v2593_v6, %v272_v7  ;;  %v373_v11 = vadd.f32 %v2509_v33, %v2597_v9  ;;  %v295_v14 = vadd.f32 %v272_v7, %v2576_v53  ;;  %v315_v18 = vadd.f32 %v272_v7, %v164_v59  ;;  %v251_v7 = vld [vmem:[#allocation2 + $0x78] sm:$0xff] }
 0x106   :  { %362 = vrot.lane.b32.xlu1 %v360_v8, %s2222_s19  ;;  %v1904_v16 = vmul.f32 -1.442695, %v295_v14  ;;  %v1905_v23 = vmul.f32 -1.442695, %v315_v18  ;;  %v316_v18 = vadd.f32 %v2597_v9, %v251_v7 }
 0x108   :  { %1977 = vpow2.f32 %v1904_v16 }
 0x109   :  { %1979 = vpow2.f32 %v1905_v23  ;;  %v1906_v23 = vmul.f32 -1.442695, %v316_v18 }
 0x10e   :  { %375 = vrot.lane.b32.xlu1 %v373_v11, %s2222_s19  ;;  %v1978_v24 = vpop.eup %1977 }
 0x10f   :  { %v299_v31 = vadd.f32 1.0, %v1978_v24  ;;  %v1980_v34 = vpop.eup %1979 }
 0x110   :  { %v323_v35 = vadd.f32 1.0, %v1980_v34 }
 0x111   :  { %1981 = vrcp.f32 %v299_v31  ;;  %v311_v47 = vand.u32 2147483648, %v299_v31  ;;  %vm305_vm3 = vweird.f32 %v299_v31  ;;  %v309_v48 = vand.u32 2147483647, %v299_v31 }
 0x112   :  { %1983 = vrcp.f32 %v323_v35  ;;  %v336_v60 = vand.u32 2147483648, %v323_v35  ;;  %vm330_vm7 = vweird.f32 %v323_v35  ;;  %v334_v61 = vand.u32 2147483647, %v323_v35 }
 0x113   :  { %v312_v54 = vor.u32 1.1754944e-38, %v311_v47  ;;  %vm310_vm5 = vcmp.eq.f32.partialorder %v309_v48, 8.507059e+37 }
 0x114   :  { %v337_v0 = vor.u32 1.1754944e-38, %v336_v60  ;;  %vm335_vm9 = vcmp.eq.f32.partialorder %v334_v61, 8.507059e+37  ;;  %v145_v61 = vpop.f32.mrf.mxu0 }
 0x116   :  { %391 = vrot.lane.b32.xlu1 %v2533_v36, %s2221_s29 }
 0x117   :  { %v1982_v37 = vpop.eup %1981 }
 0x118   :  { %v301_v38 = vmul.f32 %v1982_v37, %v299_v31  ;;  %v1984_v40 = vpop.eup %1983  ;;  %vm306_vm2 = vweird.f32 %v1982_v37 }
 0x119   :  { %v326_v43 = vmul.f32 %v1984_v40, %v323_v35  ;;  %vm307_vm4 = vmor %vm305_vm3, %vm306_vm2  ;;  %vm331_vm6 = vweird.f32 %v1984_v40 }
 0x11a   :  { %v302_v39 = vsub.f32 1.0, %v301_v38  ;;  %vm332_vm8 = vmor %vm330_vm7, %vm331_vm6 }
 0x11b   :  { %v327_v46 = vsub.f32 1.0, %v326_v43 }
 0x11c   :  { %v303_v42 = vmul.f32 %v1982_v37, %v302_v39 }
 0x11d   :  { %v328_v52 = vmul.f32 %v1984_v40, %v327_v46 }
 0x11e   :  { %v304_v44 = vadd.f32 %v1982_v37, %v303_v42 }
 0x11f   :  { %v329_v59 = vadd.f32 %v1984_v40, %v328_v52 }
 0x120   :  { %v308_v50 = vsel %vm307_vm4, %v1982_v37, %v304_v44 }
 0x121   :  { %v313_v56 = vsel %vm310_vm5, %v312_v54, %v308_v50  ;;  %v333_v62 = vsel %vm332_vm8, %v1984_v40, %v329_v59 }
 0x122   :  { %v338_v2 = vsel %vm335_vm9, %v337_v0, %v333_v62  ;;  %v2616_v62 = vadd.f32 %v145_v61, %v2559_v41 }
 0x124   :  { %210 = vst [vmem:[#allocation2 + $0x10] sm:$0xff] %v2616_v62 }
 0x178   :  { %v363_v55 = vpop.permute.xlu1 %362 }
 0x179   :  { %v365_v58 = vmul.f32 %v363_v55, %v313_v56 }
 0x17b   :  { %367 = vrot.lane.b32.xlu2 %v365_v58, %s2222_s19 }
 0x180   :  { %v376_v1 = vpop.permute.xlu1 %375 }
 0x181   :  { %v378_v3 = vmul.f32 %v376_v1, %v338_v2 }
 0x183   :  { %380 = vrot.lane.b32.xlu2 %v378_v3, %s2222_s19 }
 0x188   :  { %v392_v39 = vpop.permute.xlu1 %391 }
 0x189   :  { %v394_v44 = vmul.f32 %v392_v39, %v313_v56 }
 0x1d5   :  { %v368_v4 = vpop.permute.xlu2 %367 }
 0x1d6   :  { %v370_v5 = vadd.f32 %v368_v4, %v2576_v53 }
 0x1d8   :  { %1985 = vtanh.f32 %v370_v5 }
 0x1dd   :  { %v381_v8 = vpop.permute.xlu2 %380 }
 0x1de   :  { %v1986_v11 = vpop.eup %1985  ;;  %v383_v14 = vadd.f32 %v381_v8, %v251_v7 }
 0x1df   :  { %387 = vrot.lane.b32.xlu0 %v1986_v11, %s2223_s3 }
 0x1e0   :  { %1987 = vtanh.f32 %v383_v14 }
 0x1e1   :  { %1989 = vpow2.f32 %v1906_v23 }
 0x1e6   :  { %v1988_v16 = vpop.eup %1987 }
 0x1e7   :  { %402 = vrot.lane.b32.xlu0 %v2533_v36, %s2223_s3  ;;  %398 = vrot.lane.b32.xlu2 %v1988_v16, %s2223_s3  ;;  %v1990_v53 = vpop.eup %1989  ;;  %v385_v36 = vsub.f32 1.0, %v313_v56 }
 0x1e8   :  { %v324_v24 = vadd.f32 1.0, %v1990_v53 }
 0x1ea   :  { %1991 = vrcp.f32 %v324_v24  ;;  %v351_v40 = vand.u32 2147483648, %v324_v24  ;;  %vm345_vm11 = vweird.f32 %v324_v24  ;;  %v349_v42 = vand.u32 2147483647, %v324_v24 }
 0x1ec   :  { %v352_v47 = vor.u32 1.1754944e-38, %v351_v40  ;;  %vm350_vm13 = vcmp.eq.f32.partialorder %v349_v42, 8.507059e+37 }
 0x1f0   :  { %v1992_v31 = vpop.eup %1991 }
 0x1f1   :  { %v341_v34 = vmul.f32 %v1992_v31, %v324_v24  ;;  %vm346_vm10 = vweird.f32 %v1992_v31 }
 0x1f2   :  { %vm347_vm12 = vmor %vm345_vm11, %vm346_vm10 }
 0x1f3   :  { %v342_v35 = vsub.f32 1.0, %v341_v34 }
 0x1f5   :  { %v343_v37 = vmul.f32 %v1992_v31, %v342_v35 }
 0x1f7   :  { %v344_v38 = vadd.f32 %v1992_v31, %v343_v37 }
 0x1f9   :  { %v348_v9 = vsel %vm347_vm12, %v1992_v31, %v344_v38 }
 0x1fa   :  { %v353_v50 = vsel %vm350_vm13, %v352_v47, %v348_v9 }
 0x1fb   :  { %v396_v54 = vsub.f32 1.0, %v353_v50 }
 0x241   :  { %v399_v52 = vpop.permute.xlu2 %398 }
 0x242   :  { %v401_v58 = vmul.f32 %v399_v52, %v396_v54 }
 0x251   :  { %v388_v43 = vpop.permute.xlu0 %387 }
 0x252   :  { %v390_v46 = vmul.f32 %v388_v43, %v385_v36 }
 0x254   :  { %v395_v48 = vadd.f32 %v394_v44, %v390_v46 }
 0x256   :  { %408 = vrot.lane.b32.xlu1 %v395_v48, %s2223_s3 }
 0x259   :  { %v403_v55 = vpop.permute.xlu0 %402 }
 0x25a   :  { %v405_v59 = vmul.f32 %v403_v55, %v353_v50 }
 0x25c   :  { %v406_v60 = vadd.f32 %v405_v59, %v401_v58 }
 0x25e   :  { %412 = vrot.lane.b32.xlu2 %v406_v60, %s2221_s29 }
 0x2b8   :  { %v413_v56 = vpop.permute.xlu2 %412 }
 0x2b9   :  { %418 = vst.msk [vmem:[#allocation3 + $0x38] sm:$0xff] %vm417_vm14, %v413_v56 }
 0x2c8   :  { %v409_v0 = vpop.permute.xlu1 %408 }
 0x2c9   :  { %v2621_v1 = vsel %vm100_vm0, %v409_v0, %v413_v56  ;;  %416 = vst.msk [vmem:[#allocation3] sm:$0xff] %vm100_vm0, %v409_v0  ;;  %v421_v0 = vld [vmem:[#allocation2 + $0x68] sm:$0xff] }
 0x2ca   :  { %1907 = vmatmul.msk.f32.vlgmr.msra.gmra.mxu2 %vm208_vm1, %v2621_v1  ;;  %1908 = vmatmul.msk.f32.vlgmr.msra.gmra.mxu3 %vm208_vm1, %v2621_v1 }
 0x2cb   :  { %759 = vmatpush.msra.mxu2 %v2344_v10  ;;  %779 = vmatpush.msra.mxu3 %v2394_v19 }
 0x2cd   :  { %760 = vmatpush.msra.mxu2 %v2353_v12  ;;  %780 = vmatpush.msra.mxu3 %v2399_v20 }
 0x2cf   :  { %761 = vmatpush.msra.mxu2 %v2359_v13  ;;  %781 = vmatpush.msra.mxu3 %v2419_v22 }
 0x2d1   :  { %762 = vmatpush.msra.mxu2 %v2373_v15  ;;  %782 = vmatpush.msra.mxu3 %v2432_v25 }
 0x2d3   :  { %763 = vmatpush.msra.mxu2 %v2383_v17  ;;  %783 = vmatpush.msra.mxu3 %v2444_v27 }
 0x2d5   :  { %764 = vmatpush.msra.mxu2 %v2414_v21  ;;  %784 = vmatpush.msra.mxu3 %v2451_v28 }
 0x2d7   :  { %765 = vmatpush.msra.mxu2 %v2437_v26  ;;  %785 = vmatpush.msra.mxu3 %v2468_v30 }
 0x2d9   :  { %766 = vmatpush.msra.mxu2 %v2463_v29  ;;  %786 = vmatpush.msra.mxu3 %v2505_v32 }
 0x34d   :  { %v442_v41 = vpop.f32.mrf.mxu2  ;;  %v2644_v2 = vpop.f32.mrf.mxu3 }
 0x34e   :  { %v525_v3 = vadd.f32 %v442_v41, %v2593_v6  ;;  %v537_v4 = vadd.f32 %v2509_v33, %v2644_v2  ;;  %v465_v5 = vadd.f32 %v442_v41, %v2616_v62  ;;  %v485_v7 = vadd.f32 %v442_v41, %v2567_v49 }
 0x350   :  { %539 = vrot.lane.b32.xlu1 %v537_v4, %s2222_s19  ;;  %527 = vrot.lane.b32.xlu0 %v525_v3, %s2222_s19  ;;  %v1909_v8 = vmul.f32 -1.442695, %v465_v5  ;;  %v1910_v11 = vmul.f32 -1.442695, %v485_v7  ;;  %v486_v5 = vadd.f32 %v2644_v2, %v421_v0 }
 0x352   :  { %1993 = vpow2.f32 %v1909_v8  ;;  %v1911_v7 = vmul.f32 -1.442695, %v486_v5 }
 0x353   :  { %1995 = vpow2.f32 %v1910_v11 }
 0x358   :  { %v1994_v14 = vpop.eup %1993 }
 0x359   :  { %v1996_v16 = vpop.eup %1995  ;;  %v469_v18 = vadd.f32 1.0, %v1994_v14 }
 0x35a   :  { %v493_v23 = vadd.f32 1.0, %v1996_v16 }
 0x35b   :  { %1997 = vrcp.f32 %v469_v18  ;;  %vm475_vm3 = vweird.f32 %v469_v18  ;;  %v481_v36 = vand.u32 2147483648, %v469_v18  ;;  %v479_v44 = vand.u32 2147483647, %v469_v18 }
 0x35c   :  { %1999 = vrcp.f32 %v493_v23  ;;  %v506_v42 = vand.u32 2147483648, %v493_v23  ;;  %vm500_vm4 = vweird.f32 %v493_v23  ;;  %v504_v43 = vand.u32 2147483647, %v493_v23 }
 0x35d   :  { %v482_v48 = vor.u32 1.1754944e-38, %v481_v36  ;;  %vm480_vm8 = vcmp.eq.f32.partialorder %v479_v44, 8.507059e+37 }
 0x35e   :  { %v507_v47 = vor.u32 1.1754944e-38, %v506_v42  ;;  %vm505_vm7 = vcmp.eq.f32.partialorder %v504_v43, 8.507059e+37 }
 0x361   :  { %v1998_v53 = vpop.eup %1997 }
 0x362   :  { %v2000_v24 = vpop.eup %1999  ;;  %v471_v34 = vmul.f32 %v1998_v53, %v469_v18  ;;  %vm476_vm15 = vweird.f32 %v1998_v53 }
 0x363   :  { %v496_v31 = vmul.f32 %v2000_v24, %v493_v23  ;;  %vm501_vm2 = vweird.f32 %v2000_v24  ;;  %vm477_vm5 = vmor %vm475_vm3, %vm476_vm15 }
 0x364   :  { %v472_v37 = vsub.f32 1.0, %v471_v34  ;;  %vm502_vm6 = vmor %vm500_vm4, %vm501_vm2 }
 0x365   :  { %v497_v35 = vsub.f32 1.0, %v496_v31 }
 0x366   :  { %v473_v39 = vmul.f32 %v1998_v53, %v472_v37 }
 0x367   :  { %v498_v38 = vmul.f32 %v2000_v24, %v497_v35 }
 0x368   :  { %v474_v40 = vadd.f32 %v1998_v53, %v473_v39 }
 0x369   :  { %v499_v49 = vadd.f32 %v2000_v24, %v498_v38 }
 0x36a   :  { %v478_v46 = vsel %vm477_vm5, %v1998_v53, %v474_v40 }
 0x36b   :  { %v503_v9 = vsel %vm502_vm6, %v2000_v24, %v499_v49  ;;  %v483_v55 = vsel %vm480_vm8, %v482_v48, %v478_v46 }
 0x36c   :  { %v508_v52 = vsel %vm505_vm7, %v507_v47, %v503_v9  ;;  %v549_v16 = vsub.f32 1.0, %v483_v55 }
 0x3c2   :  { %v540_v50 = vpop.permute.xlu1 %539  ;;  %v528_v54 = vpop.permute.xlu0 %527 }
 0x3c3   :  { %v542_v58 = vmul.f32 %v540_v50, %v508_v52  ;;  %v530_v59 = vmul.f32 %v528_v54, %v483_v55 }
 0x3c5   :  { %544 = vrot.lane.b32.xlu0 %v542_v58, %s2222_s19  ;;  %532 = vrot.lane.b32.xlu2 %v530_v59, %s2222_s19 }
 0x3cd   :  { %555 = vrot.lane.b32.xlu2 %v2621_v1, %s2221_s29 }
 0x41f   :  { %v533_v60 = vpop.permute.xlu2 %532 }
 0x420   :  { %v535_v61 = vadd.f32 %v533_v60, %v2616_v62 }
 0x422   :  { %2001 = vtanh.f32 %v535_v61 }
 0x427   :  { %v556_v14 = vpop.permute.xlu2 %555 }
 0x428   :  { %v2002_v56 = vpop.eup %2001  ;;  %v558_v23 = vmul.f32 %v556_v14, %v483_v55 }
 0x429   :  { %551 = vrot.lane.b32.xlu1 %v2002_v56, %s2223_s3 }
 0x431   :  { %566 = vrot.lane.b32.xlu1 %v2621_v1, %s2223_s3 }
 0x437   :  { %v545_v41 = vpop.permute.xlu0 %544 }
 0x438   :  { %v547_v3 = vadd.f32 %v545_v41, %v421_v0 }
 0x43a   :  { %2003 = vtanh.f32 %v547_v3 }
 0x43b   :  { %2005 = vpow2.f32 %v1911_v7 }
 0x440   :  { %v2004_v4 = vpop.eup %2003 }
 0x441   :  { %562 = vrot.lane.b32.xlu0 %v2004_v4, %s2223_s3  ;;  %v2006_v8 = vpop.eup %2005 }
 0x442   :  { %v494_v62 = vadd.f32 1.0, %v2006_v8 }
 0x444   :  { %2007 = vrcp.f32 %v494_v62  ;;  %v521_v2 = vand.u32 2147483648, %v494_v62  ;;  %vm515_vm10 = vweird.f32 %v494_v62  ;;  %v519_v37 = vand.u32 2147483647, %v494_v62 }
 0x446   :  { %v522_v39 = vor.u32 1.1754944e-38, %v521_v2  ;;  %vm520_vm12 = vcmp.eq.f32.partialorder %v519_v37, 8.507059e+37  ;;  %v584_v2 = vld [vmem:[#allocation2 + $0x58] sm:$0xff] }
 0x44a   :  { %v2008_v11 = vpop.eup %2007 }
 0x44b   :  { %v511_v53 = vmul.f32 %v2008_v11, %v494_v62  ;;  %vm516_vm9 = vweird.f32 %v2008_v11 }
 0x44c   :  { %vm517_vm11 = vmor %vm515_vm10, %vm516_vm9 }
 0x44d   :  { %v512_v31 = vsub.f32 1.0, %v511_v53 }
 0x44f   :  { %v513_v34 = vmul.f32 %v2008_v11, %v512_v31 }
 0x451   :  { %v514_v35 = vadd.f32 %v2008_v11, %v513_v34 }
 0x453   :  { %v518_v38 = vsel %vm517_vm11, %v2008_v11, %v514_v35 }
 0x454   :  { %v523_v49 = vsel %vm520_vm12, %v522_v39, %v518_v38 }
 0x455   :  { %v560_v42 = vsub.f32 1.0, %v523_v49 }
 0x49b   :  { %v552_v18 = vpop.permute.xlu1 %551 }
 0x49c   :  { %v554_v1 = vmul.f32 %v552_v18, %v549_v16 }
 0x49e   :  { %v559_v24 = vadd.f32 %v558_v23, %v554_v1 }
 0x4a0   :  { %572 = vrot.lane.b32.xlu2 %v559_v24, %s2223_s3 }
 0x4a3   :  { %v567_v40 = vpop.permute.xlu1 %566 }
 0x4a4   :  { %v569_v43 = vmul.f32 %v567_v40, %v523_v49 }
 0x4b3   :  { %v563_v36 = vpop.permute.xlu0 %562 }
 0x4b4   :  { %v565_v44 = vmul.f32 %v563_v36, %v560_v42 }
 0x4b6   :  { %v570_v9 = vadd.f32 %v569_v43, %v565_v44 }
 0x4b8   :  { %576 = vrot.lane.b32.xlu0 %v570_v9, %s2221_s29 }
 0x4fa   :  { %v573_v46 = vpop.permute.xlu2 %572 }
 0x4fb   :  { %580 = vst.msk [vmem:[#allocation3 + $0x8] sm:$0xff] %vm100_vm0, %v573_v46 }
 0x52a   :  { %v577_v47 = vpop.permute.xlu0 %576 }
 0x52b   :  { %v2667_v48 = vsel %vm100_vm0, %v573_v46, %v577_v47  ;;  %581 = vst.msk [vmem:[#allocation3 + $0x30] sm:$0xff] %vm417_vm14, %v577_v47 }
 0x52c   :  { %1912 = vmatmul.msk.f32.vlgmr.msrb.gmra.mxu2 %vm208_vm1, %v2667_v48  ;;  %1913 = vmatmul.msk.f32.vlgmr.msrb.gmra.mxu3 %vm208_vm1, %v2667_v48 }
 0x52d   :  { %1085 = vmatpush.msrb.mxu2 %v2344_v10  ;;  %1105 = vmatpush.msrb.mxu3 %v2394_v19 }
 0x52f   :  { %1086 = vmatpush.msrb.mxu2 %v2353_v12  ;;  %1106 = vmatpush.msrb.mxu3 %v2399_v20 }
 0x531   :  { %1087 = vmatpush.msrb.mxu2 %v2359_v13  ;;  %1107 = vmatpush.msrb.mxu3 %v2419_v22 }
 0x533   :  { %1088 = vmatpush.msrb.mxu2 %v2373_v15  ;;  %1108 = vmatpush.msrb.mxu3 %v2432_v25 }
 0x535   :  { %1089 = vmatpush.msrb.mxu2 %v2383_v17  ;;  %1109 = vmatpush.msrb.mxu3 %v2444_v27 }
 0x537   :  { %1090 = vmatpush.msrb.mxu2 %v2414_v21  ;;  %1110 = vmatpush.msrb.mxu3 %v2451_v28 }
 0x539   :  { %1091 = vmatpush.msrb.mxu2 %v2437_v26  ;;  %1111 = vmatpush.msrb.mxu3 %v2468_v30 }
 0x53b   :  { %1092 = vmatpush.msrb.mxu2 %v2463_v29  ;;  %1112 = vmatpush.msrb.mxu3 %v2505_v32 }
 0x5af   :  { %v605_v10 = vpop.f32.mrf.mxu2  ;;  %v2690_v12 = vpop.f32.mrf.mxu3 }
 0x5b0   :  { %v688_v13 = vadd.f32 %v605_v10, %v2593_v6  ;;  %v700_v15 = vadd.f32 %v2509_v33, %v2690_v12  ;;  %v648_v17 = vadd.f32 %v605_v10, %v2586_v63  ;;  %v628_v52 = vadd.f32 %v605_v10, %v2562_v45 }
 0x5b1   :  { %v649_v36 = vadd.f32 %v2690_v12, %v584_v2 }
 0x5b2   :  { %702 = vrot.lane.b32.xlu2 %v700_v15, %s2222_s19  ;;  %690 = vrot.lane.b32.xlu1 %v688_v13, %s2222_s19  ;;  %v1915_v19 = vmul.f32 -1.442695, %v648_v17  ;;  %v1914_v55 = vmul.f32 -1.442695, %v628_v52 }
 0x5b3   :  { %v1916_v43 = vmul.f32 -1.442695, %v649_v36 }
 0x5b4   :  { %2009 = vpow2.f32 %v1915_v19 }
 0x5ba   :  { %v2010_v20 = vpop.eup %2009 }
 0x5bb   :  { %v656_v50 = vadd.f32 1.0, %v2010_v20 }
 0x5bd   :  { %2011 = vrcp.f32 %v656_v50  ;;  %v669_v41 = vand.u32 2147483648, %v656_v50  ;;  %vm663_vm15 = vweird.f32 %v656_v50  ;;  %v667_v63 = vand.u32 2147483647, %v656_v50 }
 0x5be   :  { %2013 = vpow2.f32 %v1914_v55 }
 0x5bf   :  { %v670_v4 = vor.u32 1.1754944e-38, %v669_v41  ;;  %vm668_vm3 = vcmp.eq.f32.partialorder %v667_v63, 8.507059e+37 }
 0x5c3   :  { %v2012_v54 = vpop.eup %2011 }
 0x5c4   :  { %v659_v58 = vmul.f32 %v2012_v54, %v656_v50  ;;  %v2014_v60 = vpop.eup %2013  ;;  %vm664_vm13 = vweird.f32 %v2012_v54 }
 0x5c5   :  { %v632_v56 = vadd.f32 1.0, %v2014_v60  ;;  %vm665_vm2 = vmor %vm663_vm15, %vm664_vm13 }
 0x5c6   :  { %v660_v59 = vsub.f32 1.0, %v659_v58 }
 0x5c7   :  { %2015 = vrcp.f32 %v632_v56  ;;  %v644_v23 = vand.u32 2147483648, %v632_v56  ;;  %vm638_vm5 = vweird.f32 %v632_v56  ;;  %v642_v1 = vand.u32 2147483647, %v632_v56 }
 0x5c8   :  { %v661_v61 = vmul.f32 %v2012_v54, %v660_v59 }
 0x5c9   :  { %v645_v24 = vor.u32 1.1754944e-38, %v644_v23  ;;  %vm643_vm7 = vcmp.eq.f32.partialorder %v642_v1, 8.507059e+37 }
 0x5ca   :  { %v662_v0 = vadd.f32 %v2012_v54, %v661_v61 }
 0x5cc   :  { %v666_v3 = vsel %vm665_vm2, %v2012_v54, %v662_v0 }
 0x5cd   :  { %v671_v7 = vsel %vm668_vm3, %v670_v4, %v666_v3  ;;  %v2016_v62 = vpop.eup %2015 }
 0x5ce   :  { %v634_v11 = vmul.f32 %v2016_v62, %v632_v56  ;;  %vm639_vm4 = vweird.f32 %v2016_v62 }
 0x5cf   :  { %vm640_vm6 = vmor %vm638_vm5, %vm639_vm4 }
 0x5d0   :  { %v635_v14 = vsub.f32 1.0, %v634_v11  ;;  %v2133_v11 = vld [vmem:[%s2986_s4 + $0x50] sm:$0xff] }
 0x5d2   :  { %v636_v16 = vmul.f32 %v2016_v62, %v635_v14  ;;  %v2134_v14 = vld [vmem:[%s2986_s4 + $0x40] sm:$0xff] }
 0x5d4   :  { %v637_v18 = vadd.f32 %v2016_v62, %v636_v16  ;;  %v2135_v16 = vld [vmem:[%s2986_s4 + $0x30] sm:$0xff] }
 0x5d6   :  { %v641_v53 = vsel %vm640_vm6, %v2016_v62, %v637_v18  ;;  %v2132_v62 = vld [vmem:[%s2986_s4 + $0x68] sm:$0xff] }
 0x5d7   :  { %v646_v34 = vsel %vm643_vm7, %v645_v24, %v641_v53 }
 0x5d8   :  { %v712_v20 = vsub.f32 1.0, %v646_v34 }
 0x60c   :  { %v703_v5 = vpop.permute.xlu2 %702 }
 0x60d   :  { %v705_v8 = vmul.f32 %v703_v5, %v671_v7  ;;  %v2129_v5 = vld [vmem:[%s2986_s4 + $0x70] sm:$0xff]  ;;  %v2130_v7 = vld [vmem:[%s2986_s4 + $0x78] sm:$0xff] }
 0x60f   :  { %707 = vrot.lane.b32.xlu1 %v705_v8, %s2222_s19  ;;  %v2131_v8 = vld [vmem:[%s2986_s4 + $0x60] sm:$0xff] }
 0x624   :  { %v691_v31 = vpop.permute.xlu1 %690 }
 0x625   :  { %v693_v35 = vmul.f32 %v691_v31, %v646_v34 }
 0x627   :  { %695 = vrot.lane.b32.xlu0 %v693_v35, %s2222_s19 }
 0x62f   :  { %718 = vrot.lane.b32.xlu0 %v2667_v48, %s2221_s29 }
 0x681   :  { %v708_v37 = vpop.permute.xlu1 %707 }
 0x682   :  { %v710_v38 = vadd.f32 %v708_v37, %v584_v2 }
 0x684   :  { %2017 = vtanh.f32 %v710_v38 }
 0x68a   :  { %v2018_v39 = vpop.eup %2017 }
 0x68b   :  { %725 = vrot.lane.b32.xlu1 %v2018_v39, %s2223_s3 }
 0x699   :  { %v696_v49 = vpop.permute.xlu0 %695 }
 0x69a   :  { %v698_v40 = vadd.f32 %v696_v49, %v2562_v45 }
 0x69c   :  { %2019 = vtanh.f32 %v698_v40 }
 0x69d   :  { %2021 = vpow2.f32 %v1916_v43 }
 0x6a1   :  { %v719_v45 = vpop.permute.xlu0 %718 }
 0x6a2   :  { %v2020_v42 = vpop.eup %2019  ;;  %v721_v50 = vmul.f32 %v719_v45, %v646_v34 }
 0x6a3   :  { %714 = vrot.lane.b32.xlu2 %v2020_v42, %s2223_s3  ;;  %v2022_v44 = vpop.eup %2021 }
 0x6a4   :  { %v657_v9 = vadd.f32 1.0, %v2022_v44 }
 0x6a6   :  { %2023 = vrcp.f32 %v657_v9  ;;  %v684_v17 = vand.u32 2147483648, %v657_v9  ;;  %vm678_vm9 = vweird.f32 %v657_v9  ;;  %v682_v19 = vand.u32 2147483647, %v657_v9 }
 0x6a8   :  { %v685_v54 = vor.u32 1.1754944e-38, %v684_v17  ;;  %vm683_vm11 = vcmp.eq.f32.partialorder %v682_v19, 8.507059e+37  ;;  %v747_v19 = vld [vmem:[#allocation2 + $0x48] sm:$0xff] }
 0x6ab   :  { %729 = vrot.lane.b32.xlu2 %v2667_v48, %s2223_s3 }
 0x6ac   :  { %v2024_v46 = vpop.eup %2023 }
 0x6ad   :  { %v674_v47 = vmul.f32 %v2024_v46, %v657_v9  ;;  %vm679_vm8 = vweird.f32 %v2024_v46 }
 0x6ae   :  { %vm680_vm10 = vmor %vm678_vm9, %vm679_vm8 }
 0x6af   :  { %v675_v10 = vsub.f32 1.0, %v674_v47 }
 0x6b1   :  { %v676_v13 = vmul.f32 %v2024_v46, %v675_v10 }
 0x6b3   :  { %v677_v15 = vadd.f32 %v2024_v46, %v676_v13 }
 0x6b5   :  { %v681_v12 = vsel %vm680_vm10, %v2024_v46, %v677_v15 }
 0x6b6   :  { %v686_v58 = vsel %vm683_vm11, %v685_v54, %v681_v12 }
 0x6b7   :  { %v723_v60 = vsub.f32 1.0, %v686_v58 }
 0x6fd   :  { %v715_v48 = vpop.permute.xlu2 %714  ;;  %v726_v59 = vpop.permute.xlu1 %725 }
 0x6fe   :  { %v717_v52 = vmul.f32 %v715_v48, %v712_v20  ;;  %v728_v56 = vmul.f32 %v726_v59, %v723_v60 }
 0x700   :  { %v722_v55 = vadd.f32 %v721_v50, %v717_v52 }
 0x702   :  { %735 = vrot.lane.b32.xlu0 %v722_v55, %s2223_s3 }
 0x705   :  { %v730_v61 = vpop.permute.xlu2 %729 }
 0x706   :  { %v732_v0 = vmul.f32 %v730_v61, %v686_v58 }
 0x708   :  { %v733_v41 = vadd.f32 %v732_v0, %v728_v56 }
 0x70a   :  { %739 = vrot.lane.b32.xlu1 %v733_v41, %s2221_s29 }
 0x774   :  { %v736_v63 = vpop.permute.xlu0 %735 }
 0x775   :  { %743 = vst.msk [vmem:[#allocation3 + $0x10] sm:$0xff] %vm100_vm0, %v736_v63 }
 0x77c   :  { %v740_v3 = vpop.permute.xlu1 %739 }
 0x77d   :  { %v2713_v4 = vsel %vm100_vm0, %v736_v63, %v740_v3  ;;  %744 = vst.msk [vmem:[#allocation3 + $0x28] sm:$0xff] %vm417_vm14, %v740_v3 }
 0x77e   :  { %1917 = vmatmul.msk.f32.vlgmr.msra.gmra.mxu2 %vm208_vm1, %v2713_v4  ;;  %1918 = vmatmul.msk.f32.vlgmr.msra.gmra.mxu3 %vm208_vm1, %v2713_v4 }
 0x77f   :  { %1411 = vmatpush.msra.mxu2 %v2129_v5  ;;  %1431 = vmatpush.msra.mxu3 %v2130_v7 }
 0x781   :  { %1412 = vmatpush.msra.mxu2 %v2131_v8  ;;  %1432 = vmatpush.msra.mxu3 %v2132_v62 }
 0x783   :  { %1413 = vmatpush.msra.mxu2 %v2133_v11  ;;  %1433 = vmatpush.msra.mxu3 %v2419_v22 }
 0x785   :  { %1414 = vmatpush.msra.mxu2 %v2134_v14  ;;  %1434 = vmatpush.msra.mxu3 %v2432_v25 }
 0x787   :  { %1415 = vmatpush.msra.mxu2 %v2135_v16  ;;  %1435 = vmatpush.msra.mxu3 %v2444_v27 }
 0x789   :  { %1416 = vmatpush.msra.mxu2 %v2414_v21  ;;  %1436 = vmatpush.msra.mxu3 %v2451_v28 }
 0x78b   :  { %1417 = vmatpush.msra.mxu2 %v2437_v26  ;;  %1437 = vmatpush.msra.mxu3 %v2468_v30 }
 0x78d   :  { %1418 = vmatpush.msra.mxu2 %v2463_v29  ;;  %1438 = vmatpush.msra.mxu3 %v2505_v32 }
 0x801   :  { %v768_v22 = vpop.f32.mrf.mxu2  ;;  %v2750_v25 = vpop.f32.mrf.mxu3 }
 0x802   :  { %v851_v18 = vadd.f32 %v768_v22, %v2593_v6  ;;  %v863_v27 = vadd.f32 %v2509_v33, %v2750_v25  ;;  %v791_v21 = vadd.f32 %v768_v22, %v2570_v51  ;;  %v811_v30 = vadd.f32 %v768_v22, %v2580_v57 }
 0x803   :  { %v812_v55 = vadd.f32 %v2750_v25, %v747_v19 }
 0x804   :  { %865 = vrot.lane.b32.xlu0 %v863_v27, %s2222_s19  ;;  %853 = vrot.lane.b32.xlu2 %v851_v18, %s2222_s19  ;;  %v1919_v26 = vmul.f32 -1.442695, %v791_v21  ;;  %v1920_v23 = vmul.f32 -1.442695, %v811_v30 }
 0x805   :  { %v1921_v58 = vmul.f32 -1.442695, %v812_v55 }
 0x806   :  { %2025 = vpow2.f32 %v1919_v26 }
 0x80c   :  { %v2026_v28 = vpop.eup %2025 }
 0x80d   :  { %v795_v29 = vadd.f32 1.0, %v2026_v28 }
 0x80f   :  { %2027 = vrcp.f32 %v795_v29  ;;  %v807_v35 = vand.u32 2147483648, %v795_v29  ;;  %vm801_vm13 = vweird.f32 %v795_v29  ;;  %v805_v2 = vand.u32 2147483647, %v795_v29 }
 0x810   :  { %2029 = vpow2.f32 %v1920_v23 }
 0x811   :  { %v808_v38 = vor.u32 1.1754944e-38, %v807_v35  ;;  %vm806_vm2 = vcmp.eq.f32.partialorder %v805_v2, 8.507059e+37 }
 0x815   :  { %v2028_v32 = vpop.eup %2027 }
 0x816   :  { %v797_v1 = vmul.f32 %v2028_v32, %v795_v29  ;;  %v2030_v24 = vpop.eup %2029  ;;  %vm802_vm12 = vweird.f32 %v2028_v32 }
 0x817   :  { %v819_v31 = vadd.f32 1.0, %v2030_v24  ;;  %vm803_vm15 = vmor %vm801_vm13, %vm802_vm12  ;;  %v2783_v24 = vld [vmem:[#allocation4] ss:$0 sm:$0xff] }
 0x818   :  { %v798_v53 = vsub.f32 1.0, %v797_v1 }
 0x819   :  { %2031 = vrcp.f32 %v819_v31  ;;  %v832_v46 = vand.u32 2147483648, %v819_v31  ;;  %vm826_vm4 = vweird.f32 %v819_v31  ;;  %v830_v47 = vand.u32 2147483647, %v819_v31 }
 0x81a   :  { %v799_v33 = vmul.f32 %v2028_v32, %v798_v53 }
 0x81b   :  { %v833_v13 = vor.u32 1.1754944e-38, %v832_v46  ;;  %vm831_vm6 = vcmp.eq.f32.partialorder %v830_v47, 8.507059e+37 }
 0x81c   :  { %v800_v34 = vadd.f32 %v2028_v32, %v799_v33 }
 0x81e   :  { %v804_v37 = vsel %vm803_vm15, %v2028_v32, %v800_v34  ;;  %v2137_v34 = vld [vmem:[#allocation2 + $0x30] sm:$0xff] }
 0x81f   :  { %v809_v49 = vsel %vm806_vm2, %v808_v38, %v804_v37  ;;  %v2032_v42 = vpop.eup %2031 }
 0x820   :  { %v822_v36 = vmul.f32 %v2032_v42, %v819_v31  ;;  %vm827_vm3 = vweird.f32 %v2032_v42  ;;  %v875_v7 = vsub.f32 1.0, %v809_v49 }
 0x821   :  { %vm828_vm5 = vmor %vm826_vm4, %vm827_vm3 }
 0x822   :  { %v823_v43 = vsub.f32 1.0, %v822_v36 }
 0x824   :  { %v824_v44 = vmul.f32 %v2032_v42, %v823_v43 }
 0x826   :  { %v825_v9 = vadd.f32 %v2032_v42, %v824_v44 }
 0x828   :  { %v829_v10 = vsel %vm828_vm5, %v2032_v42, %v825_v9 }
 0x829   :  { %v834_v45 = vsel %vm831_vm6, %v833_v13, %v829_v10 }
 0x85e   :  { %v854_v39 = vpop.permute.xlu2 %853 }
 0x85f   :  { %v856_v40 = vmul.f32 %v854_v39, %v809_v49 }
 0x861   :  { %858 = vrot.lane.b32.xlu1 %v856_v40, %s2222_s19 }
 0x869   :  { %881 = vrot.lane.b32.xlu1 %v2713_v4, %s2221_s29 }
 0x876   :  { %v866_v15 = vpop.permute.xlu0 %865 }
 0x877   :  { %v868_v17 = vmul.f32 %v866_v15, %v834_v45 }
 0x879   :  { %870 = vrot.lane.b32.xlu2 %v868_v17, %s2222_s19 }
 0x8d3   :  { %v871_v20 = vpop.permute.xlu2 %870  ;;  %v859_v48 = vpop.permute.xlu1 %858 }
 0x8d4   :  { %v873_v50 = vadd.f32 %v871_v20, %v747_v19  ;;  %v861_v12 = vadd.f32 %v859_v48, %v2570_v51 }
 0x8d6   :  { %2033 = vtanh.f32 %v873_v50 }
 0x8d7   :  { %2035 = vtanh.f32 %v861_v12 }
 0x8d8   :  { %2037 = vpow2.f32 %v1921_v58 }
 0x8db   :  { %v882_v63 = vpop.permute.xlu1 %881 }
 0x8dc   :  { %v2034_v52 = vpop.eup %2033  ;;  %v884_v8 = vmul.f32 %v882_v63, %v809_v49 }
 0x8dd   :  { %v2036_v54 = vpop.eup %2035  ;;  %888 = vrot.lane.b32.xlu2 %v2034_v52, %s2223_s3 }
 0x8de   :  { %877 = vrot.lane.b32.xlu0 %v2036_v54, %s2223_s3  ;;  %v2038_v59 = vpop.eup %2037 }
 0x8df   :  { %v820_v60 = vadd.f32 1.0, %v2038_v59 }
 0x8e1   :  { %2039 = vrcp.f32 %v820_v60  ;;  %v847_v3 = vand.u32 2147483648, %v820_v60  ;;  %vm841_vm8 = vweird.f32 %v820_v60  ;;  %v845_v5 = vand.u32 2147483647, %v820_v60 }
 0x8e3   :  { %v848_v14 = vor.u32 1.1754944e-38, %v847_v3  ;;  %vm846_vm10 = vcmp.eq.f32.partialorder %v845_v5, 8.507059e+37 }
 0x8e6   :  { %892 = vrot.lane.b32.xlu0 %v2713_v4, %s2223_s3 }
 0x8e7   :  { %v2040_v61 = vpop.eup %2039 }
 0x8e8   :  { %v837_v51 = vmul.f32 %v2040_v61, %v820_v60  ;;  %vm842_vm7 = vweird.f32 %v2040_v61 }
 0x8e9   :  { %vm843_vm9 = vmor %vm841_vm8, %vm842_vm7 }
 0x8ea   :  { %v838_v56 = vsub.f32 1.0, %v837_v51  ;;  %v2138_v51 = vld [vmem:[#allocation2 + $0x40] sm:$0xff] }
 0x8ec   :  { %v839_v0 = vmul.f32 %v2040_v61, %v838_v56 }
 0x8ee   :  { %v840_v41 = vadd.f32 %v2040_v61, %v839_v0 }
 0x8f0   :  { %v844_v62 = vsel %vm843_vm9, %v2040_v61, %v840_v41  ;;  %v910_v41 = vld [vmem:[#allocation2 + $0x38] sm:$0xff] }
 0x8f1   :  { %v849_v22 = vsel %vm846_vm10, %v848_v14, %v844_v62 }
 0x8f2   :  { %v886_v18 = vsub.f32 1.0, %v849_v22 }
 0x937   :  { %v889_v25 = vpop.permute.xlu2 %888 }
 0x938   :  { %v891_v21 = vmul.f32 %v889_v25, %v886_v18 }
 0x950   :  { %v878_v4 = vpop.permute.xlu0 %877 }
 0x951   :  { %v880_v11 = vmul.f32 %v878_v4, %v875_v7 }
 0x953   :  { %v885_v16 = vadd.f32 %v884_v8, %v880_v11 }
 0x955   :  { %898 = vrot.lane.b32.xlu1 %v885_v16, %s2223_s3 }
 0x958   :  { %v893_v27 = vpop.permute.xlu0 %892 }
 0x959   :  { %v895_v26 = vmul.f32 %v893_v27, %v849_v22 }
 0x95b   :  { %v896_v28 = vadd.f32 %v895_v26, %v891_v21 }
 0x95d   :  { %902 = vrot.lane.b32.xlu2 %v896_v28, %s2221_s29 }
 0x9b7   :  { %v903_v29 = vpop.permute.xlu2 %902 }
 0x9b8   :  { %907 = vst.msk [vmem:[#allocation3 + $0x20] sm:$0xff] %vm417_vm14, %v903_v29 }
 0x9c7   :  { %v899_v30 = vpop.permute.xlu1 %898 }
 0x9c8   :  { %v2773_v32 = vsel %vm100_vm0, %v899_v30, %v903_v29  ;;  %906 = vst.msk [vmem:[#allocation3 + $0x18] sm:$0xff] %vm100_vm0, %v899_v30 }
 0x9c9   :  { %1922 = vmatmul.msk.f32.vlgmr.msrb.gmra.mxu0 %vm208_vm1, %v2773_v32  ;;  %1923 = vmatmul.msk.f32.vlgmr.msrb.gmra.mxu1 %vm208_vm1, %v2773_v32 }
 0xa46   :  { %v931_v23 = vpop.f32.mrf.mxu0  ;;  %v2780_v1 = vpop.f32.mrf.mxu1 }
 0xa47   :  { %v1014_v53 = vadd.f32 %v931_v23, %v2593_v6  ;;  %v1026_v33 = vadd.f32 %v2783_v24, %v2780_v1  ;;  %v954_v31 = vadd.f32 %v931_v23, %v2580_v57  ;;  %v974_v35 = vadd.f32 %v2137_v34, %v931_v23 }
 0xa48   :  { %v975_v7 = vadd.f32 %v2780_v1, %v910_v41 }
 0xa49   :  { %1028 = vrot.lane.b32.xlu1 %v1026_v33, %s2222_s19  ;;  %1016 = vrot.lane.b32.xlu0 %v1014_v53, %s2222_s19  ;;  %v1924_v2 = vmul.f32 -1.442695, %v954_v31  ;;  %v1925_v37 = vmul.f32 -1.442695, %v974_v35 }
 0xa4a   :  { %v1926_v4 = vmul.f32 -1.442695, %v975_v7 }
 0xa4b   :  { %2041 = vpow2.f32 %v1924_v2 }
 0xa4c   :  { %2043 = vpow2.f32 %v1925_v37 }
 0xa51   :  { %v2042_v38 = vpop.eup %2041 }
 0xa52   :  { %v2044_v39 = vpop.eup %2043  ;;  %v958_v49 = vadd.f32 1.0, %v2042_v38 }
 0xa53   :  { %v982_v40 = vadd.f32 1.0, %v2044_v39 }
 0xa54   :  { %2045 = vrcp.f32 %v958_v49  ;;  %vm964_vm13 = vweird.f32 %v958_v49  ;;  %v970_v45 = vand.u32 2147483648, %v958_v49  ;;  %v968_v19 = vand.u32 2147483647, %v958_v49 }
 0xa55   :  { %2047 = vrcp.f32 %v982_v40  ;;  %v995_v15 = vand.u32 2147483648, %v982_v40  ;;  %vm989_vm15 = vweird.f32 %v982_v40  ;;  %v993_v17 = vand.u32 2147483647, %v982_v40 }
 0xa56   :  { %v971_v12 = vor.u32 1.1754944e-38, %v970_v45  ;;  %vm969_vm5 = vcmp.eq.f32.partialorder %v968_v19, 8.507059e+37 }
 0xa57   :  { %v996_v50 = vor.u32 1.1754944e-38, %v995_v15  ;;  %vm994_vm4 = vcmp.eq.f32.partialorder %v993_v17, 8.507059e+37 }
 0xa5a   :  { %v2046_v42 = vpop.eup %2045 }
 0xa5b   :  { %v2048_v36 = vpop.eup %2047  ;;  %v960_v44 = vmul.f32 %v2046_v42, %v958_v49  ;;  %vm965_vm11 = vweird.f32 %v2046_v42 }
 0xa5c   :  { %v985_v43 = vmul.f32 %v2048_v36, %v982_v40  ;;  %vm990_vm12 = vweird.f32 %v2048_v36  ;;  %vm966_vm2 = vmor %vm964_vm13, %vm965_vm11 }
 0xa5d   :  { %v961_v46 = vsub.f32 1.0, %v960_v44  ;;  %vm991_vm3 = vmor %vm989_vm15, %vm990_vm12  ;;  %v1072_v44 = vld [vmem:[#allocation2 + $0x20] sm:$0xff] }
 0xa5e   :  { %v986_v9 = vsub.f32 1.0, %v985_v43 }
 0xa5f   :  { %v962_v57 = vmul.f32 %v2046_v42, %v961_v46 }
 0xa60   :  { %v987_v47 = vmul.f32 %v2048_v36, %v986_v9 }
 0xa61   :  { %v963_v13 = vadd.f32 %v2046_v42, %v962_v57 }
 0xa62   :  { %v988_v10 = vadd.f32 %v2048_v36, %v987_v47 }
 0xa63   :  { %v967_v48 = vsel %vm966_vm2, %v2046_v42, %v963_v13 }
 0xa64   :  { %v992_v20 = vsel %vm991_vm3, %v2048_v36, %v988_v10  ;;  %v972_v58 = vsel %vm969_vm5, %v971_v12, %v967_v48  ;;  %v1071_v10 = vld [vmem:[#allocation2 + $0x50] sm:$0xff] }
 0xa65   :  { %v997_v54 = vsel %vm994_vm4, %v996_v50, %v992_v20  ;;  %v1038_v16 = vsub.f32 1.0, %v972_v58 }
 0xabb   :  { %v1029_v52 = vpop.permute.xlu1 %1028  ;;  %v1017_v55 = vpop.permute.xlu0 %1016 }
 0xabc   :  { %v1031_v59 = vmul.f32 %v1029_v52, %v997_v54  ;;  %v1019_v60 = vmul.f32 %v1017_v55, %v972_v58 }
 0xabe   :  { %1033 = vrot.lane.b32.xlu0 %v1031_v59, %s2222_s19  ;;  %1021 = vrot.lane.b32.xlu2 %v1019_v60, %s2222_s19 }
 0xac6   :  { %1044 = vrot.lane.b32.xlu2 %v2773_v32, %s2221_s29 }
 0xb18   :  { %v1022_v61 = vpop.permute.xlu2 %1021 }
 0xb19   :  { %v1024_v56 = vadd.f32 %v2138_v51, %v1022_v61 }
 0xb1b   :  { %2049 = vtanh.f32 %v1024_v56 }
 0xb20   :  { %v1045_v14 = vpop.permute.xlu2 %1044 }
 0xb21   :  { %v2050_v0 = vpop.eup %2049  ;;  %v1047_v25 = vmul.f32 %v1045_v14, %v972_v58  ;;  %v1073_v14 = vld [vmem:[#allocation2 + $0x28] sm:$0xff] }
 0xb22   :  { %1040 = vrot.lane.b32.xlu1 %v2050_v0, %s2223_s3 }
 0xb2a   :  { %1055 = vrot.lane.b32.xlu1 %v2773_v32, %s2223_s3 }
 0xb30   :  { %v1034_v63 = vpop.permute.xlu0 %1033 }
 0xb31   :  { %v1036_v3 = vadd.f32 %v1034_v63, %v910_v41 }
 0xb33   :  { %2051 = vtanh.f32 %v1036_v3 }
 0xb34   :  { %2053 = vpow2.f32 %v1926_v4 }
 0xb39   :  { %v2052_v5 = vpop.eup %2051 }
 0xb3a   :  { %1051 = vrot.lane.b32.xlu0 %v2052_v5, %s2223_s3  ;;  %v2054_v8 = vpop.eup %2053 }
 0xb3b   :  { %v983_v62 = vadd.f32 1.0, %v2054_v8 }
 0xb3d   :  { %2055 = vrcp.f32 %v983_v62  ;;  %v1010_v30 = vand.u32 2147483648, %v983_v62  ;;  %vm1004_vm7 = vweird.f32 %v983_v62  ;;  %v1008_v32 = vand.u32 2147483647, %v983_v62 }
 0xb3f   :  { %v1011_v1 = vor.u32 1.1754944e-38, %v1010_v30  ;;  %vm1009_vm9 = vcmp.eq.f32.partialorder %v1008_v32, 8.507059e+37 }
 0xb43   :  { %v2056_v11 = vpop.eup %2055 }
 0xb44   :  { %v1000_v27 = vmul.f32 %v2056_v11, %v983_v62  ;;  %vm1005_vm6 = vweird.f32 %v2056_v11 }
 0xb45   :  { %vm1006_vm8 = vmor %vm1004_vm7, %vm1005_vm6 }
 0xb46   :  { %v1001_v26 = vsub.f32 1.0, %v1000_v27 }
 0xb48   :  { %v1002_v28 = vmul.f32 %v2056_v11, %v1001_v26 }
 0xb4a   :  { %v1003_v29 = vadd.f32 %v2056_v11, %v1002_v28 }
 0xb4c   :  { %v1007_v23 = vsel %vm1006_vm8, %v2056_v11, %v1003_v29 }
 0xb4d   :  { %v1012_v53 = vsel %vm1009_vm9, %v1011_v1, %v1007_v23 }
 0xb4e   :  { %v1049_v31 = vsub.f32 1.0, %v1012_v53 }
 0xb94   :  { %v1041_v22 = vpop.permute.xlu1 %1040 }
 0xb95   :  { %v1043_v18 = vmul.f32 %v1041_v22, %v1038_v16 }
 0xb97   :  { %v1048_v21 = vadd.f32 %v1047_v25, %v1043_v18 }
 0xb99   :  { %1061 = vrot.lane.b32.xlu2 %v1048_v21, %s2223_s3 }
 0xb9c   :  { %v1056_v33 = vpop.permute.xlu1 %1055 }
 0xb9d   :  { %v1058_v35 = vmul.f32 %v1056_v33, %v1012_v53 }
 0xbac   :  { %v1052_v34 = vpop.permute.xlu0 %1051 }
 0xbad   :  { %v1054_v2 = vmul.f32 %v1052_v34, %v1049_v31 }
 0xbaf   :  { %v1059_v37 = vadd.f32 %v1058_v35, %v1054_v2 }
 0xbb1   :  { %1065 = vrot.lane.b32.xlu0 %v1059_v37, %s2221_s29 }
 0xbf3   :  { %v1062_v38 = vpop.permute.xlu2 %1061 }
 0xbf4   :  { %1069 = vst.msk [vmem:[#allocation3 + $0x20] sm:$0xff] %vm100_vm0, %v1062_v38 }
 0xc23   :  { %v1066_v39 = vpop.permute.xlu0 %1065 }
 0xc24   :  { %v2803_v49 = vsel %vm100_vm0, %v1062_v38, %v1066_v39  ;;  %1070 = vst.msk [vmem:[#allocation3 + $0x18] sm:$0xff] %vm417_vm14, %v1066_v39 }
 0xc25   :  { %1927 = vmatmul.msk.f32.vlgmr.msrb.gmra.mxu2 %vm208_vm1, %v2803_v49  ;;  %1928 = vmatmul.msk.f32.vlgmr.msrb.gmra.mxu3 %vm208_vm1, %v2803_v49 }
 0xca8   :  { %v1094_v40 = vpop.f32.mrf.mxu2  ;;  %v2810_v42 = vpop.f32.mrf.mxu3 }
 0xca9   :  { %v1177_v36 = vadd.f32 %v1094_v40, %v2593_v6  ;;  %v1189_v43 = vadd.f32 %v2783_v24, %v2810_v42  ;;  %v1137_v9 = vadd.f32 %v1094_v40, %v1072_v44  ;;  %v1117_v13 = vadd.f32 %v1094_v40, %v1071_v10 }
 0xcaa   :  { %v1138_v26 = vadd.f32 %v2810_v42, %v1073_v14 }
 0xcab   :  { %1191 = vrot.lane.b32.xlu2 %v1189_v43, %s2222_s19  ;;  %1179 = vrot.lane.b32.xlu1 %v1177_v36, %s2222_s19  ;;  %v1930_v46 = vmul.f32 -1.442695, %v1137_v9  ;;  %v1929_v45 = vmul.f32 -1.442695, %v1117_v13 }
 0xcac   :  { %v1931_v28 = vmul.f32 -1.442695, %v1138_v26 }
 0xcad   :  { %2057 = vpow2.f32 %v1930_v46 }
 0xcb3   :  { %v2058_v47 = vpop.eup %2057 }
 0xcb4   :  { %v1145_v57 = vadd.f32 1.0, %v2058_v47 }
 0xcb6   :  { %2059 = vrcp.f32 %v1145_v57  ;;  %v1158_v52 = vand.u32 2147483648, %v1145_v57  ;;  %vm1152_vm11 = vweird.f32 %v1145_v57  ;;  %v1156_v54 = vand.u32 2147483647, %v1145_v57 }
 0xcb7   :  { %2061 = vpow2.f32 %v1929_v45 }
 0xcb8   :  { %v1159_v58 = vor.u32 1.1754944e-38, %v1158_v52  ;;  %vm1157_vm13 = vcmp.eq.f32.partialorder %v1156_v54, 8.507059e+37 }
 0xcbc   :  { %v2060_v15 = vpop.eup %2059 }
 0xcbd   :  { %v1148_v17 = vmul.f32 %v2060_v15, %v1145_v57  ;;  %v2062_v20 = vpop.eup %2061  ;;  %vm1153_vm10 = vweird.f32 %v2060_v15 }
 0xcbe   :  { %v1121_v50 = vadd.f32 1.0, %v2062_v20  ;;  %vm1154_vm12 = vmor %vm1152_vm11, %vm1153_vm10 }
 0xcbf   :  { %v1149_v19 = vsub.f32 1.0, %v1148_v17 }
 0xcc0   :  { %2063 = vrcp.f32 %v1121_v50  ;;  %v1133_v3 = vand.u32 2147483648, %v1121_v50  ;;  %vm1127_vm2 = vweird.f32 %v1121_v50  ;;  %v1131_v5 = vand.u32 2147483647, %v1121_v50 }
 0xcc1   :  { %v1150_v48 = vmul.f32 %v2060_v15, %v1149_v19 }
 0xcc2   :  { %v1134_v4 = vor.u32 1.1754944e-38, %v1133_v3  ;;  %vm1132_vm4 = vcmp.eq.f32.partialorder %v1131_v5, 8.507059e+37 }
 0xcc3   :  { %v1151_v12 = vadd.f32 %v2060_v15, %v1150_v48  ;;  %v1234_v48 = vld [vmem:[#allocation2 + $0x60] sm:$0xff] }
 0xcc5   :  { %v1155_v55 = vsel %vm1154_vm12, %v2060_v15, %v1151_v12 }
 0xcc6   :  { %v1160_v60 = vsel %vm1157_vm13, %v1159_v58, %v1155_v55  ;;  %v2064_v51 = vpop.eup %2063  ;;  %v1235_v55 = vld [vmem:[#allocation2 + $0x10] sm:$0xff] }
 0xcc7   :  { %v1123_v56 = vmul.f32 %v2064_v51, %v1121_v50  ;;  %vm1128_vm15 = vweird.f32 %v2064_v51 }
 0xcc8   :  { %vm1129_vm3 = vmor %vm1127_vm2, %vm1128_vm15 }
 0xcc9   :  { %v1124_v0 = vsub.f32 1.0, %v1123_v56 }
 0xccb   :  { %v1125_v41 = vmul.f32 %v2064_v51, %v1124_v0 }
 0xccd   :  { %v1126_v63 = vadd.f32 %v2064_v51, %v1125_v41 }
 0xccf   :  { %v1130_v7 = vsel %vm1129_vm3, %v2064_v51, %v1126_v63 }
 0xcd0   :  { %v1135_v62 = vsel %vm1132_vm4, %v1134_v4, %v1130_v7 }
 0xcd1   :  { %v1201_v2 = vsub.f32 1.0, %v1135_v62 }
 0xd05   :  { %v1192_v59 = vpop.permute.xlu2 %1191 }
 0xd06   :  { %v1194_v61 = vmul.f32 %v1192_v59, %v1160_v60 }
 0xd08   :  { %1196 = vrot.lane.b32.xlu1 %v1194_v61, %s2222_s19 }
 0xd1d   :  { %v1180_v8 = vpop.permute.xlu1 %1179 }
 0xd1e   :  { %v1182_v11 = vmul.f32 %v1180_v8, %v1135_v62 }
 0xd20   :  { %1184 = vrot.lane.b32.xlu0 %v1182_v11, %s2222_s19 }
 0xd28   :  { %1207 = vrot.lane.b32.xlu0 %v2803_v49, %s2221_s29 }
 0xd7a   :  { %v1197_v16 = vpop.permute.xlu1 %1196 }
 0xd7b   :  { %v1199_v22 = vadd.f32 %v1197_v16, %v1073_v14 }
 0xd7d   :  { %2065 = vtanh.f32 %v1199_v22 }
 0xd83   :  { %v2066_v25 = vpop.eup %2065 }
 0xd84   :  { %1214 = vrot.lane.b32.xlu1 %v2066_v25, %s2223_s3 }
 0xd92   :  { %v1185_v18 = vpop.permute.xlu0 %1184 }
 0xd93   :  { %v1187_v27 = vadd.f32 %v1185_v18, %v1071_v10 }
 0xd95   :  { %2067 = vtanh.f32 %v1187_v27 }
 0xd96   :  { %2069 = vpow2.f32 %v1931_v28 }
 0xd9a   :  { %v1208_v31 = vpop.permute.xlu0 %1207 }
 0xd9b   :  { %v2068_v21 = vpop.eup %2067  ;;  %v1210_v38 = vmul.f32 %v1208_v31, %v1135_v62 }
 0xd9c   :  { %1203 = vrot.lane.b32.xlu2 %v2068_v21, %s2223_s3  ;;  %v2070_v29 = vpop.eup %2069 }
 0xd9d   :  { %v1146_v30 = vadd.f32 1.0, %v2070_v29 }
 0xd9f   :  { %2071 = vrcp.f32 %v1146_v30  ;;  %v1173_v34 = vand.u32 2147483648, %v1146_v30  ;;  %vm1167_vm6 = vweird.f32 %v1146_v30  ;;  %v1171_v35 = vand.u32 2147483647, %v1146_v30 }
 0xda1   :  { %v1174_v40 = vor.u32 1.1754944e-38, %v1173_v34  ;;  %vm1172_vm8 = vcmp.eq.f32.partialorder %v1171_v35, 8.507059e+37 }
 0xda4   :  { %1218 = vrot.lane.b32.xlu2 %v2803_v49, %s2223_s3 }
 0xda5   :  { %v2072_v32 = vpop.eup %2071 }
 0xda6   :  { %v1163_v23 = vmul.f32 %v2072_v32, %v1146_v30  ;;  %vm1168_vm5 = vweird.f32 %v2072_v32 }
 0xda7   :  { %vm1169_vm7 = vmor %vm1167_vm6, %vm1168_vm5 }
 0xda8   :  { %v1164_v1 = vsub.f32 1.0, %v1163_v23  ;;  %v1236_v23 = vld [vmem:[#allocation2 + $0x18] sm:$0xff] }
 0xdaa   :  { %v1165_v53 = vmul.f32 %v2072_v32, %v1164_v1 }
 0xdac   :  { %v1166_v33 = vadd.f32 %v2072_v32, %v1165_v53 }
 0xdae   :  { %v1170_v39 = vsel %vm1169_vm7, %v2072_v32, %v1166_v33 }
 0xdaf   :  { %v1175_v36 = vsel %vm1172_vm8, %v1174_v40, %v1170_v39 }
 0xdb0   :  { %v1212_v44 = vsub.f32 1.0, %v1175_v36 }
 0xdf6   :  { %v1204_v37 = vpop.permute.xlu2 %1203  ;;  %v1215_v43 = vpop.permute.xlu1 %1214 }
 0xdf7   :  { %v1206_v49 = vmul.f32 %v1204_v37, %v1201_v2  ;;  %v1217_v46 = vmul.f32 %v1215_v43, %v1212_v44 }
 0xdf9   :  { %v1211_v42 = vadd.f32 %v1210_v38, %v1206_v49 }
 0xdfb   :  { %1224 = vrot.lane.b32.xlu0 %v1211_v42, %s2223_s3 }
 0xdfe   :  { %v1219_v9 = vpop.permute.xlu2 %1218 }
 0xdff   :  { %v1221_v47 = vmul.f32 %v1219_v9, %v1175_v36 }
 0xe01   :  { %v1222_v57 = vadd.f32 %v1221_v47, %v1217_v46 }
 0xe03   :  { %1228 = vrot.lane.b32.xlu1 %v1222_v57, %s2221_s29 }
 0xe6d   :  { %v1225_v10 = vpop.permute.xlu0 %1224 }
 0xe6e   :  { %1232 = vst.msk [vmem:[#allocation3 + $0x28] sm:$0xff] %vm100_vm0, %v1225_v10 }
 0xe75   :  { %v1229_v13 = vpop.permute.xlu1 %1228 }
 0xe76   :  { %v2830_v15 = vsel %vm100_vm0, %v1225_v10, %v1229_v13  ;;  %1233 = vst.msk [vmem:[#allocation3 + $0x10] sm:$0xff] %vm417_vm14, %v1229_v13 }
 0xe77   :  { %1932 = vmatmul.msk.f32.vlgmr.msra.gmra.mxu0 %vm208_vm1, %v2830_v15  ;;  %1933 = vmatmul.msk.f32.vlgmr.msra.gmra.mxu1 %vm208_vm1, %v2830_v15 }
 0xef4   :  { %v1257_v45 = vpop.f32.mrf.mxu0  ;;  %v2837_v17 = vpop.f32.mrf.mxu1 }
 0xef5   :  { %v1340_v19 = vadd.f32 %v1257_v45, %v2593_v6  ;;  %v1352_v20 = vadd.f32 %v2783_v24, %v2837_v17  ;;  %v1280_v50 = vadd.f32 %v1257_v45, %v1234_v48  ;;  %v1300_v58 = vadd.f32 %v1257_v45, %v1235_v55 }
 0xef6   :  { %v1301_v2 = vadd.f32 %v2837_v17, %v1236_v23 }
 0xef7   :  { %1354 = vrot.lane.b32.xlu0 %v1352_v20, %s2222_s19  ;;  %1342 = vrot.lane.b32.xlu2 %v1340_v19, %s2222_s19  ;;  %v1934_v12 = vmul.f32 -1.442695, %v1280_v50  ;;  %v1935_v60 = vmul.f32 -1.442695, %v1300_v58 }
 0xef8   :  { %v1936_v37 = vmul.f32 -1.442695, %v1301_v2 }
 0xef9   :  { %2073 = vpow2.f32 %v1934_v12 }
 0xeff   :  { %v2074_v52 = vpop.eup %2073 }
 0xf00   :  { %v1284_v54 = vadd.f32 1.0, %v2074_v52 }
 0xf02   :  { %2075 = vrcp.f32 %v1284_v54  ;;  %v1296_v3 = vand.u32 2147483648, %v1284_v54  ;;  %vm1290_vm10 = vweird.f32 %v1284_v54  ;;  %v1294_v5 = vand.u32 2147483647, %v1284_v54 }
 0xf03   :  { %2077 = vpow2.f32 %v1935_v60 }
 0xf04   :  { %v1297_v4 = vor.u32 1.1754944e-38, %v1296_v3  ;;  %vm1295_vm12 = vcmp.eq.f32.partialorder %v1294_v5, 8.507059e+37 }
 0xf08   :  { %v2076_v59 = vpop.eup %2075 }
 0xf09   :  { %v1286_v61 = vmul.f32 %v2076_v59, %v1284_v54  ;;  %v2078_v56 = vpop.eup %2077  ;;  %vm1291_vm9 = vweird.f32 %v2076_v59 }
 0xf0a   :  { %v1308_v41 = vadd.f32 1.0, %v2078_v56  ;;  %vm1292_vm11 = vmor %vm1290_vm10, %vm1291_vm9 }
 0xf0b   :  { %v1287_v51 = vsub.f32 1.0, %v1286_v61 }
 0xf0c   :  { %2079 = vrcp.f32 %v1308_v41  ;;  %v1321_v27 = vand.u32 2147483648, %v1308_v41  ;;  %vm1315_vm15 = vweird.f32 %v1308_v41  ;;  %v1319_v21 = vand.u32 2147483647, %v1308_v41 }
 0xf0d   :  { %v1288_v0 = vmul.f32 %v2076_v59, %v1287_v51 }
 0xf0e   :  { %v1322_v28 = vor.u32 1.1754944e-38, %v1321_v27  ;;  %vm1320_vm3 = vcmp.eq.f32.partialorder %v1319_v21, 8.507059e+37 }
 0xf0f   :  { %v1289_v63 = vadd.f32 %v2076_v59, %v1288_v0  ;;  %v1397_v0 = vld [vmem:[#allocation2 + $0x70] sm:$0xff] }
 0xf11   :  { %v1293_v7 = vsel %vm1292_vm11, %v2076_v59, %v1289_v63 }
 0xf12   :  { %v1298_v62 = vsel %vm1295_vm12, %v1297_v4, %v1293_v7  ;;  %v2080_v14 = vpop.eup %2079  ;;  %v1398_v7 = vld [vmem:[#allocation2] sm:$0xff] }
 0xf13   :  { %v1311_v16 = vmul.f32 %v2080_v14, %v1308_v41  ;;  %vm1316_vm13 = vweird.f32 %v2080_v14  ;;  %v1364_v47 = vsub.f32 1.0, %v1298_v62 }
 0xf14   :  { %vm1317_vm2 = vmor %vm1315_vm15, %vm1316_vm13 }
 0xf15   :  { %v1312_v22 = vsub.f32 1.0, %v1311_v16 }
 0xf17   :  { %v1313_v25 = vmul.f32 %v2080_v14, %v1312_v22 }
 0xf19   :  { %v1314_v18 = vadd.f32 %v2080_v14, %v1313_v25 }
 0xf1b   :  { %v1318_v26 = vsel %vm1317_vm2, %v2080_v14, %v1314_v18 }
 0xf1c   :  { %v1323_v30 = vsel %vm1320_vm3, %v1322_v28, %v1318_v26 }
 0xf51   :  { %v1343_v8 = vpop.permute.xlu2 %1342 }
 0xf52   :  { %v1345_v11 = vmul.f32 %v1343_v8, %v1298_v62 }
 0xf54   :  { %1347 = vrot.lane.b32.xlu1 %v1345_v11, %s2222_s19 }
 0xf5c   :  { %1370 = vrot.lane.b32.xlu1 %v2830_v15, %s2221_s29 }
 0xf69   :  { %v1355_v29 = vpop.permute.xlu0 %1354 }
 0xf6a   :  { %v1357_v32 = vmul.f32 %v1355_v29, %v1323_v30 }
 0xf6c   :  { %1359 = vrot.lane.b32.xlu2 %v1357_v32, %s2222_s19 }
 0xfc6   :  { %v1360_v1 = vpop.permute.xlu2 %1359  ;;  %v1348_v53 = vpop.permute.xlu1 %1347 }
 0xfc7   :  { %v1362_v33 = vadd.f32 %v1360_v1, %v1236_v23  ;;  %v1350_v31 = vadd.f32 %v1348_v53, %v1234_v48 }
 0xfc9   :  { %2081 = vtanh.f32 %v1362_v33 }
 0xfca   :  { %2083 = vtanh.f32 %v1350_v31 }
 0xfcb   :  { %2085 = vpow2.f32 %v1936_v37 }
 0xfce   :  { %v1371_v44 = vpop.permute.xlu1 %1370 }
 0xfcf   :  { %v2082_v34 = vpop.eup %2081  ;;  %v1373_v10 = vmul.f32 %v1371_v44, %v1298_v62 }
 0xfd0   :  { %v2084_v35 = vpop.eup %2083  ;;  %1377 = vrot.lane.b32.xlu2 %v2082_v34, %s2223_s3 }
 0xfd1   :  { %1366 = vrot.lane.b32.xlu0 %v2084_v35, %s2223_s3  ;;  %v2086_v38 = vpop.eup %2085 }
 0xfd2   :  { %v1309_v39 = vadd.f32 1.0, %v2086_v38 }
 0xfd4   :  { %2087 = vrcp.f32 %v1309_v39  ;;  %v1336_v9 = vand.u32 2147483648, %v1309_v39  ;;  %vm1330_vm5 = vweird.f32 %v1309_v39  ;;  %v1334_v46 = vand.u32 2147483647, %v1309_v39 }
 0xfd6   :  { %v1337_v45 = vor.u32 1.1754944e-38, %v1336_v9  ;;  %vm1335_vm7 = vcmp.eq.f32.partialorder %v1334_v46, 8.507059e+37 }
 0xfd9   :  { %1381 = vrot.lane.b32.xlu0 %v2830_v15, %s2223_s3 }
 0xfda   :  { %v2088_v49 = vpop.eup %2087 }
 0xfdb   :  { %v1326_v40 = vmul.f32 %v2088_v49, %v1309_v39  ;;  %vm1331_vm4 = vweird.f32 %v2088_v49 }
 0xfdc   :  { %vm1332_vm6 = vmor %vm1330_vm5, %vm1331_vm4 }
 0xfdd   :  { %v1327_v42 = vsub.f32 1.0, %v1326_v40 }
 0xfdf   :  { %v1328_v36 = vmul.f32 %v2088_v49, %v1327_v42  ;;  %v1399_v42 = vld [vmem:[#allocation2 + $0x8] sm:$0xff] }
 0xfe1   :  { %v1329_v43 = vadd.f32 %v2088_v49, %v1328_v36 }
 0xfe3   :  { %v1333_v13 = vsel %vm1332_vm6, %v2088_v49, %v1329_v43 }
 0xfe4   :  { %v1338_v19 = vsel %vm1335_vm7, %v1337_v45, %v1333_v13  ;;  %v1574_v45 = vld [vmem:[#allocation7 + $0x38] sm:$0xff] }
 0xfe5   :  { %v1375_v48 = vsub.f32 1.0, %v1338_v19  ;;  %1611 = vmatpush.msrb.mxu0 %v1574_v45 }
0x102a   :  { %v1378_v20 = vpop.permute.xlu2 %1377 }
0x102b   :  { %v1380_v12 = vmul.f32 %v1378_v20, %v1375_v48  ;;  %v1571_v48 = vld [vmem:[#allocation7 + $0x20] sm:$0xff] }
0x1043   :  { %v1367_v57 = vpop.permute.xlu0 %1366 }
0x1044   :  { %v1369_v15 = vmul.f32 %v1367_v57, %v1364_v47 }
0x1046   :  { %v1374_v17 = vadd.f32 %v1373_v10, %v1369_v15 }
0x1048   :  { %1387 = vrot.lane.b32.xlu1 %v1374_v17, %s2223_s3  ;;  %v1573_v17 = vld [vmem:[#allocation7 + $0x30] sm:$0xff] }
0x1049   :  { %1612 = vmatpush.msrb.mxu0 %v1573_v17 }
0x104b   :  { %v1382_v50 = vpop.permute.xlu0 %1381 }
0x104c   :  { %v1384_v52 = vmul.f32 %v1382_v50, %v1338_v19  ;;  %v1572_v19 = vld [vmem:[#allocation7 + $0x28] sm:$0xff] }
0x104d   :  { %1613 = vmatpush.msrb.mxu0 %v1572_v19 }
0x104e   :  { %v1385_v54 = vadd.f32 %v1384_v52, %v1380_v12 }
0x104f   :  { %1614 = vmatpush.msrb.mxu0 %v1571_v48 }
0x1050   :  { %1391 = vrot.lane.b32.xlu2 %v1385_v54, %s2221_s29 }
0x10aa   :  { %v1392_v55 = vpop.permute.xlu2 %1391 }
0x10ab   :  { %1396 = vst.msk [vmem:[#allocation3 + $0x8] sm:$0xff] %vm417_vm14, %v1392_v55 }
0x10ba   :  { %v1388_v58 = vpop.permute.xlu1 %1387 }
0x10bb   :  { %v1394_v59 = vsel %vm100_vm0, %v1388_v58, %v1392_v55  ;;  %1395 = vst.msk [vmem:[#allocation3 + $0x30] sm:$0xff] %vm100_vm0, %v1388_v58 }
0x10bc   :  { %1937 = vmatmul.msk.f32.vlgmr.msra.gmra.mxu2 %vm208_vm1, %v1394_v59  ;;  %1938 = vmatmul.msk.f32.vlgmr.msra.gmra.mxu3 %vm208_vm1, %v1394_v59 }
0x113f   :  { %v1420_v60 = vpop.f32.mrf.mxu2  ;;  %v2860_v61 = vpop.f32.mrf.mxu3 }
0x1140   :  { %v1503_v51 = vadd.f32 %v1420_v60, %v2593_v6  ;;  %v1515_v56 = vadd.f32 %v2783_v24, %v2860_v61  ;;  %v1443_v41 = vadd.f32 %v1420_v60, %v1397_v0  ;;  %v1463_v4 = vadd.f32 %v1420_v60, %v1398_v7 }
0x1141   :  { %v1464_v9 = vadd.f32 %v2860_v61, %v1399_v42 }
0x1142   :  { %1517 = vrot.lane.b32.xlu0 %v1515_v56, %s2222_s19  ;;  %1505 = vrot.lane.b32.xlu2 %v1503_v51, %s2222_s19  ;;  %v1939_v63 = vmul.f32 -1.442695, %v1443_v41  ;;  %v1940_v62 = vmul.f32 -1.442695, %v1463_v4 }
0x1143   :  { %v1941_v46 = vmul.f32 -1.442695, %v1464_v9 }
0x1144   :  { %2089 = vpow2.f32 %v1939_v63 }
0x114a   :  { %v2090_v3 = vpop.eup %2089 }
0x114b   :  { %v1447_v5 = vadd.f32 1.0, %v2090_v3 }
0x114d   :  { %2091 = vrcp.f32 %v1447_v5  ;;  %v1459_v25 = vand.u32 2147483648, %v1447_v5  ;;  %vm1453_vm9 = vweird.f32 %v1447_v5  ;;  %v1457_v18 = vand.u32 2147483647, %v1447_v5 }
0x114e   :  { %2093 = vpow2.f32 %v1940_v62  ;;  %v1569_v62 = vld [vmem:[#allocation7 + $0x10] sm:$0xff] }
0x114f   :  { %v1460_v21 = vor.u32 1.1754944e-38, %v1459_v25  ;;  %vm1458_vm11 = vcmp.eq.f32.partialorder %v1457_v18, 8.507059e+37  ;;  %v1565_v18 = vld [vmem:[#allocation3 + $0x30] sm:$0xff] }
0x1153   :  { %v2092_v8 = vpop.eup %2091 }
0x1154   :  { %v1449_v11 = vmul.f32 %v2092_v8, %v1447_v5  ;;  %v2094_v14 = vpop.eup %2093  ;;  %vm1454_vm8 = vweird.f32 %v2092_v8 }
0x1155   :  { %v1471_v16 = vadd.f32 1.0, %v2094_v14  ;;  %vm1455_vm10 = vmor %vm1453_vm9, %vm1454_vm8 }
0x1156   :  { %v1450_v6 = vsub.f32 1.0, %v1449_v11  ;;  %v1568_v11 = vld [vmem:[#allocation7 + $0x8] sm:$0xff] }
0x1157   :  { %2095 = vrcp.f32 %v1471_v16  ;;  %v1484_v33 = vand.u32 2147483648, %v1471_v16  ;;  %vm1478_vm13 = vweird.f32 %v1471_v16  ;;  %v1482_v31 = vand.u32 2147483647, %v1471_v16 }
0x1158   :  { %v1451_v24 = vmul.f32 %v2092_v8, %v1450_v6  ;;  %v1567_v6 = vld [vmem:[#allocation7] sm:$0xff] }
0x1159   :  { %v1485_v35 = vor.u32 1.1754944e-38, %v1484_v33  ;;  %vm1483_vm2 = vcmp.eq.f32.partialorder %v1482_v31, 8.507059e+37 }
0x115a   :  { %v1452_v22 = vadd.f32 %v2092_v8, %v1451_v24 }
0x115c   :  { %v1456_v27 = vsel %vm1455_vm10, %v2092_v8, %v1452_v22  ;;  %v1570_v8 = vld [vmem:[#allocation7 + $0x18] sm:$0xff]  ;;  %v1560_v22 = vld [vmem:[#allocation3 + $0x8] sm:$0xff]  ;;  %vm1836_vm10 = vcmask 39936  }
0x115d   :  { %v2867_v28 = vsel %vm1458_vm11, %v1460_v21, %v1456_v27  ;;  %v2096_v30 = vpop.eup %2095  ;;  %1615 = vmatpush.msrb.mxu0 %v1570_v8  ;;  %v1564_v27 = vld [vmem:[#allocation3 + $0x28] sm:$0xff]  ;;  %v1563_v21 = vld [vmem:[#allocation3 + $0x20] sm:$0xff]  ;;  %vm1862_vm11 = vcmask 367616  }
0x115e   :  { %v1474_v32 = vmul.f32 %v2096_v30, %v1471_v16  ;;  %vm1479_vm12 = vweird.f32 %v2096_v30  ;;  %v1527_v63 = vsub.f32 1.0, %v2867_v28 }
0x115f   :  { %vm1480_vm15 = vmor %vm1478_vm13, %vm1479_vm12  ;;  %1616 = vmatpush.msrb.mxu0 %v1569_v62  ;;  %v1694_v62 = vld [vmem:[%s2994_s12 + $0x28] sm:$0xff]  ;;  %vm1864_vm12 = vcmask 629760  }
0x1160   :  { %v1475_v23 = vsub.f32 1.0, %v1474_v32 }
0x1161   :  { %1617 = vmatpush.msrb.mxu0 %v1568_v11 }
0x1162   :  { %v1476_v1 = vmul.f32 %v2096_v30, %v1475_v23 }
0x1163   :  { %1618 = vmatpush.msrb.mxu0 %v1567_v6  ;;  %v1693_v6 = vld [vmem:[%s2994_s12 + $0x20] sm:$0xff] }
0x1164   :  { %v1477_v53 = vadd.f32 %v2096_v30, %v1476_v1  ;;  %v1974_v1 = vld [vmem:[%s2989_s7] ss:$0 sm:$0xff] }
0x1166   :  { %v1481_v34 = vsel %vm1480_vm15, %v2096_v30, %v1477_v53 }
0x1167   :  { %v1486_v37 = vsel %vm1483_vm2, %v1485_v35, %v1481_v34  ;;  %v1975_v34 = vld [vmem:[%s2990_s8] ss:$0 sm:$0xff] }
0x119c   :  { %v1506_v26 = vpop.permute.xlu2 %1505 }
0x119d   :  { %v1508_v29 = vmul.f32 %v1506_v26, %v2867_v28  ;;  %v1561_v26 = vld [vmem:[#allocation3 + $0x10] sm:$0xff] }
0x119f   :  { %1510 = vrot.lane.b32.xlu2 %v1508_v29, %s2222_s19 }
0x11a7   :  { %1533 = vrot.lane.b32.xlu2 %v1394_v59, %s2221_s29 }
0x11b4   :  { %v1518_v2 = vpop.permute.xlu0 %1517 }
0x11b5   :  { %v1520_v38 = vmul.f32 %v1518_v2, %v1486_v37 }
0x11b7   :  { %1522 = vrot.lane.b32.xlu1 %v1520_v38, %s2222_s19 }
0x11bf   :  { %1544 = vrot.lane.b32.xlu1 %v1394_v59, %s2223_s3 }
0x11f9   :  { %v1511_v39 = vpop.permute.xlu2 %1510 }
0x11fa   :  { %v1513_v49 = vadd.f32 %v1511_v39, %v1397_v0 }
0x11fc   :  { %2097 = vtanh.f32 %v1513_v49 }
0x1201   :  { %v1534_v3 = vpop.permute.xlu2 %1533 }
0x1202   :  { %v2098_v40 = vpop.eup %2097  ;;  %v1536_v7 = vmul.f32 %v1534_v3, %v2867_v28  ;;  %v1562_v28 = vld [vmem:[#allocation3 + $0x18] sm:$0xff] }
0x1203   :  { %1529 = vrot.lane.b32.xlu1 %v2098_v40, %s2223_s3 }
0x1229   :  { %v1523_v36 = vpop.permute.xlu1 %1522 }
0x122a   :  { %v1525_v43 = vadd.f32 %v1523_v36, %v1399_v42 }
0x122c   :  { %2099 = vtanh.f32 %v1525_v43 }
0x122d   :  { %2101 = vpow2.f32 %v1941_v46 }
0x1231   :  { %v1545_v59 = vpop.permute.xlu1 %1544 }
0x1232   :  { %v2100_v44 = vpop.eup %2099 }
0x1233   :  { %1540 = vrot.lane.b32.xlu0 %v2100_v44, %s2223_s3  ;;  %v2102_v47 = vpop.eup %2101 }
0x1234   :  { %v1472_v57 = vadd.f32 1.0, %v2102_v47 }
0x1236   :  { %2103 = vrcp.f32 %v1472_v57  ;;  %v1499_v12 = vand.u32 2147483648, %v1472_v57  ;;  %vm1493_vm4 = vweird.f32 %v1472_v57  ;;  %v1497_v52 = vand.u32 2147483647, %v1472_v57 }
0x1238   :  { %v1500_v55 = vor.u32 1.1754944e-38, %v1499_v12  ;;  %vm1498_vm6 = vcmp.eq.f32.partialorder %v1497_v52, 8.507059e+37 }
0x123c   :  { %v2104_v10 = vpop.eup %2103 }
0x123d   :  { %v1489_v13 = vmul.f32 %v2104_v10, %v1472_v57  ;;  %vm1494_vm3 = vweird.f32 %v2104_v10 }
0x123e   :  { %vm1495_vm5 = vmor %vm1493_vm4, %vm1494_vm3 }
0x123f   :  { %v1490_v15 = vsub.f32 1.0, %v1489_v13 }
0x1241   :  { %v1491_v20 = vmul.f32 %v2104_v10, %v1490_v15 }
0x1243   :  { %v1492_v50 = vadd.f32 %v2104_v10, %v1491_v20 }
0x1245   :  { %v1496_v54 = vsel %vm1495_vm5, %v2104_v10, %v1492_v50 }
0x1246   :  { %v1501_v58 = vsel %vm1498_vm6, %v1500_v55, %v1496_v54 }
0x1247   :  { %v1538_v60 = vsub.f32 1.0, %v1501_v58  ;;  %v1547_v51 = vmul.f32 %v1545_v59, %v1501_v58 }
0x1275   :  { %v1530_v41 = vpop.permute.xlu1 %1529 }
0x1276   :  { %v1532_v5 = vmul.f32 %v1530_v41, %v1527_v63  ;;  %v1696_v63 = vld [vmem:[%s2994_s12 + $0x38] sm:$0xff] }
0x1278   :  { %v2883_v4 = vadd.f32 %v1536_v7, %v1532_v5  ;;  %v1695_v5 = vld [vmem:[%s2994_s12 + $0x30] sm:$0xff] }
0x12a5   :  { %v1541_v61 = vpop.permute.xlu0 %1540 }
0x12a6   :  { %v1543_v56 = vmul.f32 %v1541_v61, %v1538_v60 }
0x12a8   :  { %v2877_v0 = vadd.f32 %v1547_v51, %v1543_v56 }
0x12aa   :  { %1555 = vrot.lane.b32.xlu0 %v2877_v0, %s2221_s29 }
0x12b2   :  { %1550 = vrot.lane.b32.xlu0 %v2883_v4, %s2223_s3 }
0x131c   :  { %v1556_v14 = vpop.permute.xlu0 %1555 }
0x131d   :  { %1558 = vst.msk [vmem:[#allocation3] sm:$0xff] %vm417_vm14, %v1556_v14 }
0x1324   :  { %v1551_v24 = vpop.permute.xlu0 %1550  ;;  %v1559_v16 = vld [vmem:[#allocation3] sm:$0xff] }
0x1325   :  { %1553 = vst.msk [vmem:[#allocation3 + $0x38] sm:$0xff] %vm100_vm0, %v1551_v24  ;;  %1942 = vmatmul.msk.f32.vlgmr.msrb.gmra.mxu0 %vm208_vm1, %v1559_v16  ;;  %v1692_v24 = vld [vmem:[%s2994_s12 + $0x18] sm:$0xff]  ;;  %vm1728_vm0 = vcmask 64512  }
0x132c   :  { %v1566_v25 = vld [vmem:[#allocation3 + $0x38] sm:$0xff] }
0x132d   :  { %1943 = vmatmul.msk.f32.gmra.mxu0 %vm208_vm1, %v1560_v22  ;;  %1789 = vmatpush.msrb.mxu3 %v1566_v25 }
0x132f   :  { %1790 = vmatpush.msrb.mxu3 %v1565_v18 }
0x1331   :  { %1791 = vmatpush.msrb.mxu3 %v1564_v27 }
0x1333   :  { %1792 = vmatpush.msrb.mxu3 %v1563_v21 }
0x1335   :  { %1944 = vmatmul.msk.f32.gmra.mxu0 %vm208_vm1, %v1561_v26  ;;  %1793 = vmatpush.msrb.mxu3 %v1562_v28 }
0x1337   :  { %1794 = vmatpush.msrb.mxu3 %v1561_v26 }
0x1339   :  { %1795 = vmatpush.msrb.mxu3 %v1560_v22  ;;  %v1691_v22 = vld [vmem:[%s2994_s12 + $0x10] sm:$0xff] }
0x133b   :  { %1796 = vmatpush.msrb.mxu3 %v1559_v16 }
0x133d   :  { %1945 = vmatmul.msk.f32.gmra.mxu0 %vm208_vm1, %v1562_v28 }
0x1345   :  { %1946 = vmatmul.msk.f32.gmra.mxu0 %vm208_vm1, %v1563_v21  ;;  %v1690_v21 = vld [vmem:[%s2994_s12 + $0x8] sm:$0xff] }
0x134d   :  { %1947 = vmatmul.msk.f32.gmra.mxu0 %vm208_vm1, %v1564_v27 }
0x1355   :  { %1948 = vmatmul.msk.f32.gmra.mxu0 %vm208_vm1, %v1565_v18 }
0x135d   :  { %1949 = vmatmul.msk.f32.gmra.mxu0 %vm208_vm1, %v1566_v25 }
0x13a2   :  { %v1620_v29 = vpop.f32.mrf.mxu0 }
0x13a3   :  { %v1621_v12 = vadd.f32 %v1974_v1, %v1620_v29 }
0x13aa   :  { %v1623_v30 = vpop.f32.mrf.mxu0 }
0x13ab   :  { %v1624_v38 = vadd.f32 %v1974_v1, %v1623_v30  ;;  %v1689_v30 = vld [vmem:[%s2994_s12] sm:$0xff] }
0x13b2   :  { %v1626_v32 = vpop.f32.mrf.mxu0 }
0x13b3   :  { %v1627_v43 = vadd.f32 %v1974_v1, %v1626_v32 }
0x13ba   :  { %v1629_v23 = vpop.f32.mrf.mxu0 }
0x13bb   :  { %v1630_v15 = vadd.f32 %v1974_v1, %v1629_v23 }
0x13c2   :  { %v1632_v53 = vpop.f32.mrf.mxu0 }
0x13c3   :  { %v1633_v33 = vadd.f32 %v1974_v1, %v1632_v53 }
0x13c5   :  { %2105 = vtanh.f32 %v1633_v33 }
0x13ca   :  { %v1635_v31 = vpop.f32.mrf.mxu0 }
0x13cb   :  { %v2106_v35 = vpop.eup %2105  ;;  %v1636_v2 = vadd.f32 %v1974_v1, %v1635_v31  ;;  %v1753_v31 = vld [vmem:[%s2995_s13] sm:$0xff] }
0x13cc   :  { %v1660_v37 = vmul.f32 %v2106_v35, %v1975_v34  ;;  %1772 = vmatpush.msra.mxu0 %v1753_v31 }
0x13cd   :  { %2107 = vtanh.f32 %v1636_v2 }
0x13ce   :  { %v1676_v39 = vsel %vm208_vm1, %v1660_v37, 0.0  ;;  %2109 = vtanh.f32 %v1624_v38 }
0x13cf   :  { %1677 = vadd.xlane.f32.xlu2 %v1676_v39 }
0x13d2   :  { %v1638_v49 = vpop.f32.mrf.mxu0 }
0x13d3   :  { %v2108_v40 = vpop.eup %2107  ;;  %v1639_v42 = vadd.f32 %v1974_v1, %v1638_v49 }
0x13d4   :  { %v1661_v36 = vmul.f32 %v2108_v40, %v1975_v34  ;;  %v2110_v9 = vpop.eup %2109 }
0x13d5   :  { %2111 = vtanh.f32 %v1639_v42  ;;  %v1657_v47 = vmul.f32 %v2110_v9, %v1975_v34 }
0x13d6   :  { %v1679_v44 = vsel %vm208_vm1, %v1661_v36, 0.0  ;;  %2113 = vtanh.f32 %v1627_v43 }
0x13d7   :  { %1680 = vadd.xlane.f32.xlu0 %v1679_v44  ;;  %v1667_v17 = vsel %vm208_vm1, %v1657_v47, 0.0 }
0x13da   :  { %v1641_v46 = vpop.f32.mrf.mxu0 }
0x13db   :  { %v2112_v57 = vpop.eup %2111  ;;  %v1642_v10 = vadd.f32 %v1974_v1, %v1641_v46  ;;  %v1688_v1 = vld [vmem:[%s2993_s11] sm:$0xff]  ;;  %s2224_s11 = smov 5  }
0x13dc   :  { %v1662_v13 = vmul.f32 %v2112_v57, %v1975_v34  ;;  %v2114_v19 = vpop.eup %2113 }
0x13dd   :  { %2115 = vtanh.f32 %v1642_v10  ;;  %v1658_v20 = vmul.f32 %v2114_v19, %v1975_v34  ;;  %v1804_v19 = vld [vmem:[%s2991_s9 + $0x18] sm:$0xff] }
0x13de   :  { %v1682_v45 = vsel %vm208_vm1, %v1662_v13, 0.0  ;;  %2117 = vtanh.f32 %v1630_v15  ;;  %v1808_v13 = vld [vmem:[%s2991_s9 + $0x38] sm:$0xff]  ;;  %v1807_v15 = vld [vmem:[%s2991_s9 + $0x30] sm:$0xff] }
0x13df   :  { %1683 = vadd.xlane.f32.xlu2 %v1682_v45  ;;  %1668 = vadd.xlane.f32.xlu0 %v1667_v17  ;;  %v1670_v52 = vsel %vm208_vm1, %v1658_v20, 0.0  ;;  %2119 = vtanh.f32 %v1621_v12  ;;  %v1806_v45 = vld [vmem:[%s2991_s9 + $0x28] sm:$0xff]  ;;  %v1805_v17 = vld [vmem:[%s2991_s9 + $0x20] sm:$0xff]  ;;  %v1803_v20 = vld [vmem:[%s2991_s9 + $0x10] sm:$0xff] }
0x13e3   :  { %v2116_v48 = vpop.eup %2115 }
0x13e4   :  { %v1663_v50 = vmul.f32 %v2116_v48, %v1975_v34  ;;  %v2118_v55 = vpop.eup %2117  ;;  %v1802_v48 = vld [vmem:[%s2991_s9 + $0x8] sm:$0xff] }
0x13e5   :  { %v1659_v58 = vmul.f32 %v2118_v55, %v1975_v34  ;;  %v2120_v60 = vpop.eup %2119  ;;  %v1976_v55 = vld [vmem:[%s2992_s10] ss:$0 sm:$0xff]  ;;  %s2227_s10 = smov [#allocation9]  }
0x13e6   :  { %v1685_v54 = vsel %vm208_vm1, %v1663_v50, 0.0  ;;  %v1656_v61 = vmul.f32 %v2120_v60, %v1975_v34  ;;  %s1872_s27 = sshll.u32 %s2227_s10, 4  ;;  %s1873_s27 = int_to_ptr.vmem [resolvable:$true] %s1872_s27 }
0x13e7   :  { %1671 = vadd.xlane.f32.xlu2 %v1670_v52  ;;  %1686 = vadd.xlane.f32.xlu1 %v1685_v54  ;;  %v1673_v59 = vsel %vm208_vm1, %v1659_v58, 0.0  ;;  %v1801_v52 = vld [vmem:[%s2991_s9] sm:$0xff]  ;;  %s2226_s9 = smov 45  }
0x13e8   :  { %v1664_v51 = vsel %vm208_vm1, %v1656_v61, 0.0 }
0x13ef   :  { %1674 = vadd.xlane.f32.xlu1 %v1673_v59 }
0x13f7   :  { %1665 = vadd.xlane.f32.xlu1 %v1664_v51 }
0x1442   :  { %v1678_v56 = vpop.xlane.xlu2 %1677 }
0x1443   :  { %v1701_v16 = vmul.f32 %v1693_v6, %v1678_v56 }
0x144a   :  { %v1681_v3 = vpop.xlane.xlu0 %1680 }
0x144b   :  { %v1702_v14 = vmul.f32 %v1694_v62, %v1681_v3 }
0x1452   :  { %v1684_v41 = vpop.xlane.xlu2 %1683  ;;  %v1669_v26 = vpop.xlane.xlu0 %1668 }
0x1453   :  { %v1703_v11 = vmul.f32 %v1695_v5, %v1684_v41  ;;  %v1698_v29 = vmul.f32 %v1690_v21, %v1669_v26 }
0x145a   :  { %v1687_v7 = vpop.xlane.xlu1 %1686  ;;  %v1672_v25 = vpop.xlane.xlu2 %1671 }
0x145b   :  { %v1704_v8 = vmul.f32 %v1696_v63, %v1687_v7  ;;  %v1699_v28 = vmul.f32 %v1691_v22, %v1672_v25 }
0x145d   :  { %1716 = vmatpush.msrb.mxu1 %v1704_v8 }
0x145f   :  { %1717 = vmatpush.msrb.mxu1 %v1703_v11 }
0x1461   :  { %1718 = vmatpush.msrb.mxu1 %v1702_v14 }
0x1462   :  { %v1675_v18 = vpop.xlane.xlu1 %1674 }
0x1463   :  { %v1700_v27 = vmul.f32 %v1692_v24, %v1675_v18  ;;  %1719 = vmatpush.msrb.mxu1 %v1701_v16 }
0x1465   :  { %1720 = vmatpush.msrb.mxu1 %v1700_v27 }
0x1467   :  { %1721 = vmatpush.msrb.mxu1 %v1699_v28 }
0x1469   :  { %1722 = vmatpush.msrb.mxu1 %v1698_v29 }
0x146a   :  { %v1666_v32 = vpop.xlane.xlu1 %1665 }
0x146b   :  { %v1697_v23 = vmul.f32 %v1689_v30, %v1666_v32 }
0x146d   :  { %1723 = vmatpush.msrb.mxu1 %v1697_v23 }
0x146e   :  { %1950 = vmatmul.msk.f32.vlgmr.msrb.gmra.mxu1 %vm208_vm1, %v1688_v1 }
0x146f   :  { %1824 = vmatpush.msra.mxu1 %v1808_v13 }
0x1471   :  { %1825 = vmatpush.msra.mxu1 %v1807_v15 }
0x1473   :  { %1826 = vmatpush.msra.mxu1 %v1806_v45 }
0x1475   :  { %1827 = vmatpush.msra.mxu1 %v1805_v17 }
0x1477   :  { %1828 = vmatpush.msra.mxu1 %v1804_v19 }
0x1479   :  { %1829 = vmatpush.msra.mxu1 %v1803_v20 }
0x147b   :  { %1830 = vmatpush.msra.mxu1 %v1802_v48 }
0x147d   :  { %1831 = vmatpush.msra.mxu1 %v1801_v52 }
0x14eb   :  { %v1725_v53 = vpop.f32.mrf.mxu1 }
0x14ec   :  { %v1729_v33 = vsel %vm1728_vm0, %v1725_v53, -inf }
0x14ed   :  { %1730 = vmax.xlane.f32.xlu2 %v1729_v33 }
0x1560   :  { %v1731_v34 = vpop.xlane.xlu2 %1730 }
0x1561   :  { %v1732_v35 = vsub.f32 %v1725_v53, %v1731_v34 }
0x1563   :  { %v1733_v2 = vmul.f32 1.442695, %v1732_v35 }
0x1565   :  { %2121 = vpow2.f32 %v1733_v2 }
0x156b   :  { %v2122_v37 = vpop.eup %2121 }
0x156c   :  { %v1735_v38 = vsel %vm1728_vm0, %v2122_v37, 0.0 }
0x156d   :  { %1736 = vadd.xlane.f32.xlu0 %v1735_v38 }
0x15e0   :  { %v1737_v39 = vpop.xlane.xlu0 %1736 }
0x15e1   :  { %2123 = vrcp.f32 %v1737_v39  ;;  %v1749_v36 = vand.u32 2147483648, %v1737_v39  ;;  %v1747_v44 = vand.u32 2147483647, %v1737_v39  ;;  %vm1743_vm7 = vweird.f32 %v1737_v39 }
0x15e3   :  { %v1750_v46 = vor.u32 1.1754944e-38, %v1749_v36  ;;  %vm1748_vm9 = vcmp.eq.f32.partialorder %v1747_v44, 8.507059e+37 }
0x15e7   :  { %v2124_v49 = vpop.eup %2123 }
0x15e8   :  { %v1739_v40 = vmul.f32 %v2124_v49, %v1737_v39  ;;  %vm1744_vm14 = vweird.f32 %v2124_v49 }
0x15e9   :  { %vm1745_vm8 = vmor %vm1743_vm7, %vm1744_vm14 }
0x15ea   :  { %v1740_v42 = vsub.f32 1.0, %v1739_v40 }
0x15ec   :  { %v1741_v43 = vmul.f32 %v2124_v49, %v1740_v42 }
0x15ee   :  { %v1742_v9 = vadd.f32 %v2124_v49, %v1741_v43 }
0x15f0   :  { %v1746_v47 = vsel %vm1745_vm8, %v2124_v49, %v1742_v9 }
0x15f1   :  { %v1751_v57 = vsel %vm1748_vm9, %v1750_v46, %v1746_v47 }
0x15f2   :  { %v1752_v10 = vmul.f32 %v2122_v37, %v1751_v57 }
0x15f4   :  { %1850 = vrot.lane.b32.xlu0 %v1752_v10, %s2224_s11  ;;  %1951 = vmatmul.msk.f32.vlgmr.msra.gmra.mxu0 %vm1728_vm0, %v1752_v10 }
0x1666   :  { %v1851_v11 = vpop.permute.xlu0 %1850 }
0x1671   :  { %v1774_v50 = vpop.f32.mrf.mxu0 }
0x1672   :  { %v1777_v12 = vmul.f32 %v1774_v50, %v1688_v1 }
0x1674   :  { %1952 = vmatmul.msk.f32.vlgmr.msrb.gmra.mxu3 %vm208_vm1, %v1777_v12 }
0x16f7   :  { %v1798_v54 = vpop.f32.mrf.mxu3 }
0x16f8   :  { %1953 = vmatmul.msk.f32.vlgmr.msra.gmra.mxu1 %vm208_vm1, %v1798_v54  ;;  %vm1860_vm1 = vcmask 105472  }
0x1775   :  { %v1833_v58 = vpop.f32.mrf.mxu1 }
0x1776   :  { %v1834_v59 = vadd.f32 %v1976_v55, %v1833_v58 }
0x1778   :  { %v1837_v60 = vsel %vm1836_vm10, %v1834_v59, -inf }
0x1779   :  { %1838 = vmax.xlane.f32.xlu1 %v1837_v60 }
0x1792   :  { %1853 = vrot.lane.b32.xlu1 %v2883_v4, %s2225_s26 }
0x17ec   :  { %v1839_v61 = vpop.xlane.xlu1 %1838 }
0x17ed   :  { %v1840_v51 = vsub.f32 %v1834_v59, %v1839_v61 }
0x17ef   :  { %v1841_v56 = vmul.f32 1.442695, %v1840_v51 }
0x17f1   :  { %2125 = vpow2.f32 %v1841_v56 }
0x17f7   :  { %v2126_v41 = vpop.eup %2125 }
0x17f8   :  { %v1843_v63 = vsel %vm1836_vm10, %v2126_v41, 0.0 }
0x17f9   :  { %1844 = vadd.xlane.f32.xlu2 %v1843_v63 }
0x1804   :  { %v1854_v4 = vpop.permute.xlu1 %1853 }
0x1811   :  { %1856 = vrot.lane.b32.xlu2 %v2877_v0, %s2226_s9 }
0x186c   :  { %v1845_v3 = vpop.xlane.xlu2 %1844 }
0x186d   :  { %2127 = vlog2.f32 %v1845_v3 }
0x1873   :  { %v2128_v5 = vpop.eup %2127 }
0x1874   :  { %v1847_v7 = vmul.f32 0.6931472, %v2128_v5  ;;  %v1857_v0 = vpop.permute.xlu2 %1856 }
0x1876   :  { %v1848_v8 = vadd.f32 %v1847_v7, %v1839_v61 }
0x1878   :  { %v1849_v62 = vsub.f32 %v1834_v59, %v1848_v8 }
0x187a   :  { %v1859_v6 = vsel %vm1836_vm10, %v1849_v62, %v1851_v11 }
0x187b   :  { %v1861_v14 = vsel %vm1860_vm1, %v1859_v6, %v1854_v4 }
0x187c   :  { %v1863_v24 = vsel %vm1862_vm11, %v1861_v14, %v1857_v0 }
0x187d   :  { %v1865_v16 = vsel %vm1864_vm12, %v1863_v24, 0.0 }
0x187e   :  { %1866 = vst [vmem:[#allocation9] sm:$0xff] %v1865_v16 }
0x187f   :  { %1877 = dma.vmem_to_hbm [thread:$0]  %s1873_s27, 128, %s1875_s30, [#allocation6]  }
0x1880   :  { %2215 = dma.done.wait [#allocation6], 128  }
0x1881   :  { %2216 = vsyncadd [#allocation6], 4294967168 }
0x1882   :  { %1882 = vsyncpa [#allocation5], 1 }
0x1883   :  { %1883 = vsyncpa [#allocation8], 1 }
0x1884   :  { %1884 = vsyncpa [#allocation6], 1 }

</bundles_post_ra>
